<compile_context>
chip_gen: v7x
topology: tpu7x:2x2x1
jax: 0.10.0
libtpu: 0.0.40
codegen_flags: <defaults>
</compile_context>

<pallas_src>
import jax
import jax.numpy as jnp
from jax import lax
from jax.experimental import pallas as pl
from jax.experimental.pallas import tpu as pltpu

_VMEM_LIMIT = 32 * 1024 * 1024  # explicit scoped-VMEM budget (safe on v5e/v6e/v7x)


def _pick_tile(n, candidates):
    for c in candidates:
        if n % c == 0:
            return c
    return n


# ---------------------------------------------------------------------------
# Shared recurrence body (one direction, one time-block)
# ---------------------------------------------------------------------------
def _lstm_recurrence(gin_sc, whh, out_ref, h_sc, c_sc, batch):
    """Serial LSTM recurrence over one time-block.

    gin_sc : VMEM ref (TB*B, 4H) f32 — precomputed x@W_ih (+ b_ih + b_hh).
    whh    : (H, 4H) bf16 value — recurrent weight (constant over time).
    out_ref: (1, TB*B, H) output block ref.
    h_sc/c_sc: (B, H) f32 VMEM scratch persisting across grid steps.
    Gate order matches PyTorch nn.LSTM: i, f, g, o.
    """
    B = batch
    H = h_sc.shape[1]
    TB = gin_sc.shape[0] // B
    d = pl.program_id(0)

    @pl.when(pl.program_id(1) == 0)
    def _():
        h_sc[...] = jnp.zeros_like(h_sc)
        c_sc[...] = jnp.zeros_like(c_sc)

    def step(i, carry):
        # Forward walks the block front->back, backward back->front.
        tt = jnp.where(d == 0, i, TB - 1 - i)
        row = pl.multiple_of(tt * B, B)          # B is a multiple of 8 -> aligned
        gates = gin_sc[pl.ds(row, B), :] + jnp.dot(
            h_sc[...].astype(whh.dtype), whh, preferred_element_type=jnp.float32)
        i_g = jax.nn.sigmoid(gates[:, 0 * H:1 * H])
        f_g = jax.nn.sigmoid(gates[:, 1 * H:2 * H])
        g_g = jnp.tanh(gates[:, 2 * H:3 * H])
        o_g = jax.nn.sigmoid(gates[:, 3 * H:4 * H])
        c_new = f_g * c_sc[...] + i_g * g_g
        h_new = o_g * jnp.tanh(c_new)
        c_sc[...] = c_new
        h_sc[...] = h_new
        out_ref[0, pl.ds(row, B), :] = h_new.astype(out_ref.dtype)
        return carry

    lax.fori_loop(0, TB, step, 0, unroll=True)


# ---------------------------------------------------------------------------
# Pallas kernels
# ---------------------------------------------------------------------------
def _bilstm_l1_kernel(x_ref, wih_ref, b_ref, whh_ref, out_ref, gin_sc, h_sc, c_sc):
    """Layer 1 (single input): fused input projection + recurrence."""
    gin_sc[...] = (jnp.dot(x_ref[...], wih_ref[0],
                           preferred_element_type=jnp.float32) + b_ref[0])
    _lstm_recurrence(gin_sc, whh_ref[0], out_ref, h_sc, c_sc, h_sc.shape[0])


def _bilstm_l2_kernel(a_ref, bin_ref, wa_ref, wb_ref, bias_ref, whh_ref, out_ref,
                      gin_sc, h_sc, c_sc):
    """Layer 2 (split-weight 'concat' input): fused projection + recurrence."""
    acc = jnp.dot(a_ref[...], wa_ref[0], preferred_element_type=jnp.float32)
    acc = acc + jnp.dot(bin_ref[...], wb_ref[0], preferred_element_type=jnp.float32)
    gin_sc[...] = acc + bias_ref[0]
    _lstm_recurrence(gin_sc, whh_ref[0], out_ref, h_sc, c_sc, h_sc.shape[0])


def _linear_kernel(a_ref, b_ref, wa_ref, wb_ref, bias_ref, o_ref):
    """feats = a @ wa + b @ wb + bias  (split-weight 'concat' GEMM)."""
    acc = jnp.dot(a_ref[...], wa_ref[...], preferred_element_type=jnp.float32)
    acc = acc + jnp.dot(b_ref[...], wb_ref[...], preferred_element_type=jnp.float32)
    o_ref[...] = (acc + bias_ref[...]).astype(o_ref.dtype)


# ---------------------------------------------------------------------------
# pallas_call wrappers
# ---------------------------------------------------------------------------
def bilstm_layer1(x2d, w_ih_t, b, w_hh_t, *, T, B, out_dtype=jnp.bfloat16,
                  time_block=8):
    """First bidirectional layer.  x2d: [T*B, E] time-major.  Returns [2, T*B, H]."""
    E = x2d.shape[1]
    H = w_hh_t.shape[1]
    G4H = 4 * H
    TB = _pick_tile(T, (time_block, 8, 4, 2, 1))
    nTB = T // TB

    def x_map(d, tb):          # same x for both directions; reversed block order bwd
        return (tb * (1 - d) + (nTB - 1 - tb) * d, 0)

    def out_map(d, tb):
        return (d, tb * (1 - d) + (nTB - 1 - tb) * d, 0)

    return pl.pallas_call(
        _bilstm_l1_kernel,
        out_shape=jax.ShapeDtypeStruct((2, T * B, H), out_dtype),
        grid=(2, nTB),
        in_specs=[
            pl.BlockSpec((TB * B, E), x_map),
            pl.BlockSpec((1, E, G4H), lambda d, tb: (d, 0, 0)),
            pl.BlockSpec((1, 1, G4H), lambda d, tb: (d, 0, 0)),
            pl.BlockSpec((1, H, G4H), lambda d, tb: (d, 0, 0)),
        ],
        out_specs=pl.BlockSpec((1, TB * B, H), out_map),
        scratch_shapes=[
            pltpu.VMEM((TB * B, G4H), jnp.float32),   # per-block input gates
            pltpu.VMEM((B, H), jnp.float32),          # h carry
            pltpu.VMEM((B, H), jnp.float32),          # c carry
        ],
        compiler_params=pltpu.CompilerParams(
            dimension_semantics=("parallel", "arbitrary"),
            vmem_limit_bytes=_VMEM_LIMIT),
    )(x2d, w_ih_t, b, w_hh_t)


def bilstm_layer2(hf, hb, w_ih_f, w_ih_b, b, w_hh_t, *, T, B,
                  out_dtype=jnp.bfloat16, time_block=8):
    """Second bidirectional layer.  hf/hb: [T*B, H] fwd/bwd hidden of layer 1."""
    H = w_hh_t.shape[1]
    G4H = 4 * H
    TB = _pick_tile(T, (time_block, 8, 4, 2, 1))
    nTB = T // TB

    def x_map(d, tb):
        return (tb * (1 - d) + (nTB - 1 - tb) * d, 0)

    def out_map(d, tb):
        return (d, tb * (1 - d) + (nTB - 1 - tb) * d, 0)

    return pl.pallas_call(
        _bilstm_l2_kernel,
        out_shape=jax.ShapeDtypeStruct((2, T * B, H), out_dtype),
        grid=(2, nTB),
        in_specs=[
            pl.BlockSpec((TB * B, H), x_map),
            pl.BlockSpec((TB * B, H), x_map),
            pl.BlockSpec((1, H, G4H), lambda d, tb: (d, 0, 0)),
            pl.BlockSpec((1, H, G4H), lambda d, tb: (d, 0, 0)),
            pl.BlockSpec((1, 1, G4H), lambda d, tb: (d, 0, 0)),
            pl.BlockSpec((1, H, G4H), lambda d, tb: (d, 0, 0)),
        ],
        out_specs=pl.BlockSpec((1, TB * B, H), out_map),
        scratch_shapes=[
            pltpu.VMEM((TB * B, G4H), jnp.float32),
            pltpu.VMEM((B, H), jnp.float32),
            pltpu.VMEM((B, H), jnp.float32),
        ],
        compiler_params=pltpu.CompilerParams(
            dimension_semantics=("parallel", "arbitrary"),
            vmem_limit_bytes=_VMEM_LIMIT),
    )(hf, hb, w_ih_f, w_ih_b, b, w_hh_t)


def linear_split(a, b_in, wa, wb, bias, *, out_dtype=jnp.float32):
    """a,b_in: [M, H]; wa,wb: [H, N_pad]; bias: [1, N_pad] -> [M, N_pad]."""
    M, H = a.shape
    n_pad = wa.shape[1]
    tm = _pick_tile(M, (512, 256, 128, 64, 32, 16, 8))
    return pl.pallas_call(
        _linear_kernel,
        out_shape=jax.ShapeDtypeStruct((M, n_pad), out_dtype),
        grid=(M // tm,),
        in_specs=[
            pl.BlockSpec((tm, H), lambda m: (m, 0)),
            pl.BlockSpec((tm, H), lambda m: (m, 0)),
            pl.BlockSpec((H, n_pad), lambda m: (0, 0)),
            pl.BlockSpec((H, n_pad), lambda m: (0, 0)),
            pl.BlockSpec((1, n_pad), lambda m: (0, 0)),
        ],
        out_specs=pl.BlockSpec((tm, n_pad), lambda m: (m, 0)),
        compiler_params=pltpu.CompilerParams(
            dimension_semantics=("parallel",),
            vmem_limit_bytes=_VMEM_LIMIT),
    )(a, b_in, wa, wb, bias)


# ---------------------------------------------------------------------------
# Parameters (PyTorch-style init) and forward glue
# ---------------------------------------------------------------------------
def init_params(key, vocab_size, embedding_dim, hidden_dim, tagset_size):
    H = hidden_dim // 2
    keys = iter(jax.random.split(key, 64))

    def u(shape, bound):
        return jax.random.uniform(next(keys), shape, jnp.float32, -bound, bound)

    p = {}
    # TODO(synk): pretrained BERT encoder cannot be reproduced in-script;
    # bert(sentence)[0] is stood in for by a deterministic embedding lookup
    # (stored bf16 so the gathered activations feed the bf16 MXU path directly).
    p["emb"] = u((vocab_size, embedding_dim), 0.1).astype(jnp.bfloat16)

    bound = 1.0 / float(H) ** 0.5
    p["lstm"] = []
    for layer in range(2):
        d_in = embedding_dim if layer == 0 else hidden_dim
        w_ih_l, w_hh_l, b_l = [], [], []
        for _direction in range(2):
            w_ih_l.append(u((4 * H, d_in), bound))
            w_hh_l.append(u((4 * H, H), bound))
            b_ih = u((4 * H,), bound)
            b_hh = u((4 * H,), bound)
            b_l.append((b_ih + b_hh).reshape(1, 4 * H))   # fold both biases
        w_ih_t = jnp.stack([w.T for w in w_ih_l])          # [2, d_in, 4H]
        lp = {
            "w_hh_t": jnp.stack([w.T for w in w_hh_l]).astype(jnp.bfloat16),  # [2, H, 4H]
            "b": jnp.stack(b_l),                            # [2, 1, 4H] f32
        }
        if layer == 0:
            lp["w_ih_t"] = w_ih_t.astype(jnp.bfloat16)      # [2, E, 4H]
        else:
            # Layer-2 input is concat(h_fwd, h_bwd); split the weight so the
            # concat never has to be materialized in HBM.
            lp["w_ih_f"] = w_ih_t[:, :H, :].astype(jnp.bfloat16)   # [2, H, 4H]
            lp["w_ih_b"] = w_ih_t[:, H:, :].astype(jnp.bfloat16)   # [2, H, 4H]
        p["lstm"].append(lp)

    # Linear(hidden_dim -> tagset_size); output padded to a 128-lane multiple
    # so the kernel issues unmasked stores (extra lanes sliced off in host JAX).
    n_pad = max(128, ((tagset_size + 127) // 128) * 128)
    lb = 1.0 / float(hidden_dim) ** 0.5
    w_lin = u((tagset_size, hidden_dim), lb)                # [tags, 2H]
    b_lin = u((tagset_size,), lb)
    w_lin_t = jnp.zeros((hidden_dim, n_pad), jnp.float32).at[:, :tagset_size].set(w_lin.T)
    b_pad = jnp.zeros((n_pad,), jnp.float32).at[:tagset_size].set(b_lin)
    p["lin_w_f"] = w_lin_t[:H, :].astype(jnp.bfloat16)      # [H, n_pad]
    p["lin_w_b"] = w_lin_t[H:, :].astype(jnp.bfloat16)      # [H, n_pad]
    p["lin_b"] = b_pad.reshape(1, n_pad)

    # CRF parameters (returned untouched by forward()).
    p["start_trans"] = u((tagset_size,), 0.1)
    p["trans_matrix"] = u((tagset_size, tagset_size), 0.1)
    p["end_trans"] = u((tagset_size,), 0.1)
    return p


def bert_bilstm_crf_forward(params, sentence, tags, mask):
    """Mirrors Bert_BiLSTM_CRF.forward(sentence, tags, mask)."""
    del tags, mask  # unused by the reference forward (only CRF params returned)
    B, T = sentence.shape
    n_tags = params["start_trans"].shape[0]

    # _get_features -----------------------------------------------------------
    # Gather directly in time-major [T, B, E] (BERT stand-in), flatten to 2-D.
    embeds = params["emb"][sentence.T]                     # [T, B, E] bf16
    E = embeds.shape[-1]
    x2d = embeds.reshape(T * B, E)

    # Layer 1: fused (input projection + recurrence), both directions on grid.
    l1 = params["lstm"][0]
    h1 = bilstm_layer1(x2d, l1["w_ih_t"], l1["b"], l1["w_hh_t"], T=T, B=B)

    # Layer 2: concat(fwd, bwd) handled as split-weight GEMM inside the kernel.
    l2 = params["lstm"][1]
    h2 = bilstm_layer2(h1[0], h1[1], l2["w_ih_f"], l2["w_ih_b"], l2["b"],
                       l2["w_hh_t"], T=T, B=B)

    # TODO(synk): nn.Dropout(p=0.1) applied with eval-mode semantics (identity);
    # PyTorch train-mode RNG dropout is not reproduced.

    # Linear on time-major activations; 128-lane padded output, sliced +
    # reordered to batch-first only on the tiny [.., tagset] tensor.
    feats = linear_split(h2[0], h2[1], params["lin_w_f"], params["lin_w_b"],
                         params["lin_b"])                  # [T*B, n_pad] f32
    emissions = feats[:, :n_tags].reshape(T, B, n_tags)
    emissions = jnp.transpose(emissions, (1, 0, 2))        # [B, T, tagset]

    return (emissions, params["start_trans"], params["trans_matrix"],
            params["end_trans"])


# ---------------------------------------------------------------------------
if __name__ == "__main__":
    tag_to_ix = {"O": 0, "B-LOC": 1, "I-LOC": 2, "<START>": 3, "<STOP>": 4}
    tagset_size = len(tag_to_ix)

    # Lane/sublane-aligned small demo shapes (hidden_dim matches the module's
    # default 256 -> H = 128 per direction; E = 128 stands in for BERT's 768).
    B, T = 8, 16
    vocab_size = 100
    embedding_dim = 128
    hidden_dim = 256

    key = jax.random.PRNGKey(0)
    k_param, k_sent, k_tags = jax.random.split(key, 3)

    params = init_params(k_param, vocab_size, embedding_dim, hidden_dim,
                         tagset_size)

    sentence = jax.random.randint(k_sent, (B, T), 0, vocab_size, dtype=jnp.int32)
    tags = jax.random.randint(k_tags, (B, T), 0, tagset_size, dtype=jnp.int32)
    mask = jnp.ones((B, T), dtype=jnp.bool_)

    fwd = jax.jit(bert_bilstm_crf_forward)
    emissions, start_trans, trans_matrix, end_trans = fwd(params, sentence,
                                                          tags, mask)
    jax.block_until_ready((emissions, start_trans, trans_matrix, end_trans))

    assert emissions.shape == (B, T, tagset_size)
    assert start_trans.shape == (tagset_size,)
    assert trans_matrix.shape == (tagset_size, tagset_size)
    assert end_trans.shape == (tagset_size,)
    assert bool(jnp.all(jnp.isfinite(emissions)))

    print("KERNEL_OK")
</pallas_src>

<mosaic_0001>
module attributes {stable_mosaic.version = 11 : i64} {
  func.func @_linear_kernel(%arg0: i32, %arg1: memref<128x128xbf16, #tpu.memory_space<vmem>>, %arg2: memref<128x128xbf16, #tpu.memory_space<vmem>>, %arg3: memref<128x128xbf16, #tpu.memory_space<vmem>>, %arg4: memref<128x128xbf16, #tpu.memory_space<vmem>>, %arg5: memref<1x128xf32, #tpu.memory_space<vmem>>, %arg6: memref<128x128xf32, #tpu.memory_space<vmem>>) attributes {dimension_semantics = [#tpu.dimension_semantics<parallel>], iteration_bounds = array<i64: 1>, scalar_prefetch = 0 : i64, scratch_operands = 0 : i64, tpu.core_type = #tpu.core_type<tc>, window_params = [{transform_indices = @transform_0, window_bounds = array<i64: 128, 128>}, {transform_indices = @transform_1, window_bounds = array<i64: 128, 128>}, {pipeline_mode = #tpu.pipeline_mode<synchronous>, transform_indices = @transform_2, window_bounds = array<i64: 128, 128>}, {pipeline_mode = #tpu.pipeline_mode<synchronous>, transform_indices = @transform_3, window_bounds = array<i64: 128, 128>}, {pipeline_mode = #tpu.pipeline_mode<synchronous>, transform_indices = @transform_4, window_bounds = array<i64: 1, 128>}, {transform_indices = @transform_5, window_bounds = array<i64: 128, 128>}]} {
    %c0 = arith.constant 0 : index
    %c0_0 = arith.constant 0 : index
    %0 = vector.load %arg1[%c0, %c0_0] : memref<128x128xbf16, #tpu.memory_space<vmem>>, vector<128x128xbf16>
    %c0_1 = arith.constant 0 : index
    %c0_2 = arith.constant 0 : index
    %1 = vector.load %arg3[%c0_1, %c0_2] : memref<128x128xbf16, #tpu.memory_space<vmem>>, vector<128x128xbf16>
    %cst = arith.constant dense<0.000000e+00> : vector<128x128xf32>
    %2 = tpu.matmul %0, %1, %cst {dimension_numbers = #tpu.dot_dimension_numbers<[1], [0], [0], [1], [0, 0, 1, 1], [], []>} : vector<128x128xbf16>, vector<128x128xbf16>, vector<128x128xf32> -> vector<128x128xf32>
    %c0_3 = arith.constant 0 : index
    %c0_4 = arith.constant 0 : index
    %3 = vector.load %arg2[%c0_3, %c0_4] : memref<128x128xbf16, #tpu.memory_space<vmem>>, vector<128x128xbf16>
    %c0_5 = arith.constant 0 : index
    %c0_6 = arith.constant 0 : index
    %4 = vector.load %arg4[%c0_5, %c0_6] : memref<128x128xbf16, #tpu.memory_space<vmem>>, vector<128x128xbf16>
    %cst_7 = arith.constant dense<0.000000e+00> : vector<128x128xf32>
    %5 = tpu.matmul %3, %4, %cst_7 {dimension_numbers = #tpu.dot_dimension_numbers<[1], [0], [0], [1], [0, 0, 1, 1], [], []>} : vector<128x128xbf16>, vector<128x128xbf16>, vector<128x128xf32> -> vector<128x128xf32>
    %6 = arith.addf %2, %5 : vector<128x128xf32>
    %c0_8 = arith.constant 0 : index
    %c0_9 = arith.constant 0 : index
    %7 = vector.load %arg5[%c0_8, %c0_9] : memref<1x128xf32, #tpu.memory_space<vmem>>, vector<1x128xf32>
    %8 = vector.broadcast %7 : vector<1x128xf32> to vector<128x128xf32>
    %9 = arith.addf %6, %8 : vector<128x128xf32>
    %c0_10 = arith.constant 0 : index
    %c0_11 = arith.constant 0 : index
    %10 = vector.load %arg6[%c0_10, %c0_11] : memref<128x128xf32, #tpu.memory_space<vmem>>, vector<128x128xf32>
    tpu.vector_store %arg6[%c0_10, %c0_11], %9 {strides = array<i32>} : memref<128x128xf32, #tpu.memory_space<vmem>>, vector<128x128xf32>,
    return
  }
  func.func @transform_0(%arg0: i32) -> (i32, i32) {
    %c0_i32 = arith.constant 0 : i32
    %c0_i32_0 = arith.constant 0 : i32
    return %arg0, %c0_i32 : i32, i32
  }
  func.func @transform_1(%arg0: i32) -> (i32, i32) {
    %c0_i32 = arith.constant 0 : i32
    %c0_i32_0 = arith.constant 0 : i32
    return %arg0, %c0_i32 : i32, i32
  }
  func.func @transform_2(%arg0: i32) -> (i32, i32) {
    %c0_i32 = arith.constant 0 : i32
    %c0_i32_0 = arith.constant 0 : i32
    %c0_i32_1 = arith.constant 0 : i32
    return %c0_i32, %c0_i32_0 : i32, i32
  }
  func.func @transform_3(%arg0: i32) -> (i32, i32) {
    %c0_i32 = arith.constant 0 : i32
    %c0_i32_0 = arith.constant 0 : i32
    %c0_i32_1 = arith.constant 0 : i32
    return %c0_i32, %c0_i32_0 : i32, i32
  }
  func.func @transform_4(%arg0: i32) -> (i32, i32) {
    %c0_i32 = arith.constant 0 : i32
    %c0_i32_0 = arith.constant 0 : i32
    %c0_i32_1 = arith.constant 0 : i32
    return %c0_i32, %c0_i32_0 : i32, i32
  }
  func.func @transform_5(%arg0: i32) -> (i32, i32) {
    %c0_i32 = arith.constant 0 : i32
    %c0_i32_0 = arith.constant 0 : i32
    return %arg0, %c0_i32 : i32, i32
  }
}

module attributes {stable_mosaic.version = 11 : i64} {
  func.func @_bilstm_l1_kernel(%arg0: i32, %arg1: i32, %arg2: memref<64x128xbf16, #tpu.memory_space<vmem>>, %arg3: memref<1x128x512xbf16, #tpu.memory_space<vmem>>, %arg4: memref<1x1x512xf32, #tpu.memory_space<vmem>>, %arg5: memref<1x128x512xbf16, #tpu.memory_space<vmem>>, %arg6: memref<1x64x128xbf16, #tpu.memory_space<vmem>>, %arg7: memref<64x512xf32, #tpu.memory_space<vmem>>, %arg8: memref<8x128xf32, #tpu.memory_space<vmem>>, %arg9: memref<8x128xf32, #tpu.memory_space<vmem>>) attributes {dimension_semantics = [#tpu.dimension_semantics<parallel>, #tpu.dimension_semantics<arbitrary>], iteration_bounds = array<i64: 2, 2>, scalar_prefetch = 0 : i64, scratch_operands = 3 : i64, tpu.core_type = #tpu.core_type<tc>, window_params = [{transform_indices = @transform_0, window_bounds = array<i64: 64, 128>}, {transform_indices = @transform_1, window_bounds = array<i64: 1, 128, 512>}, {transform_indices = @transform_2, window_bounds = array<i64: 1, 1, 512>}, {transform_indices = @transform_3, window_bounds = array<i64: 1, 128, 512>}, {transform_indices = @transform_4, window_bounds = array<i64: 1, 64, 128>}]} {
    %c0 = arith.constant 0 : index
    %c0_0 = arith.constant 0 : index
    %0 = vector.load %arg2[%c0, %c0_0] : memref<64x128xbf16, #tpu.memory_space<vmem>>, vector<64x128xbf16>
    %c0_1 = arith.constant 0 : index
    %c0_2 = arith.constant 0 : index
    %c0_3 = arith.constant 0 : index
    %1 = vector.load %arg3[%c0_1, %c0_2, %c0_3] : memref<1x128x512xbf16, #tpu.memory_space<vmem>>, vector<1x128x512xbf16>
    %2 = vector.shape_cast %1 : vector<1x128x512xbf16> to vector<128x512xbf16>
    %cst = arith.constant dense<0.000000e+00> : vector<64x512xf32>
    %3 = tpu.matmul %0, %2, %cst {dimension_numbers = #tpu.dot_dimension_numbers<[1], [0], [0], [1], [0, 0, 1, 1], [], []>} : vector<64x128xbf16>, vector<128x512xbf16>, vector<64x512xf32> -> vector<64x512xf32>
    %c0_4 = arith.constant 0 : index
    %c0_5 = arith.constant 0 : index
    %c0_6 = arith.constant 0 : index
    %4 = vector.load %arg4[%c0_4, %c0_5, %c0_6] : memref<1x1x512xf32, #tpu.memory_space<vmem>>, vector<1x1x512xf32>
    %5 = vector.shape_cast %4 : vector<1x1x512xf32> to vector<1x512xf32>
    %6 = vector.broadcast %5 : vector<1x512xf32> to vector<64x512xf32>
    %7 = arith.addf %3, %6 : vector<64x512xf32>
    %c0_7 = arith.constant 0 : index
    %c0_8 = arith.constant 0 : index
    %8 = vector.load %arg7[%c0_7, %c0_8] : memref<64x512xf32, #tpu.memory_space<vmem>>, vector<64x512xf32>
    tpu.vector_store %arg7[%c0_7, %c0_8], %7 {strides = array<i32>} : memref<64x512xf32, #tpu.memory_space<vmem>>, vector<64x512xf32>,
    %c0_9 = arith.constant 0 : index
    %c0_10 = arith.constant 0 : index
    %c0_11 = arith.constant 0 : index
    %9 = vector.load %arg5[%c0_9, %c0_10, %c0_11] : memref<1x128x512xbf16, #tpu.memory_space<vmem>>, vector<1x128x512xbf16>
    %10 = vector.shape_cast %9 : vector<1x128x512xbf16> to vector<128x512xbf16>
    %c0_i32 = arith.constant 0 : i32
    %11 = arith.cmpi eq, %arg1, %c0_i32 : i32
    %12 = arith.extui %11 : i1 to i32
    %c0_i32_12 = arith.constant 0 : i32
    %13 = arith.cmpi ne, %12, %c0_i32_12 : i32
    scf.if %13 {
      %cst_158 = arith.constant 0.000000e+00 : f32
      %366 = vector.broadcast %cst_158 : f32 to vector<8x128xf32>
      %c0_159 = arith.constant 0 : index
      %c0_160 = arith.constant 0 : index
      %367 = vector.load %arg8[%c0_159, %c0_160] : memref<8x128xf32, #tpu.memory_space<vmem>>, vector<8x128xf32>
      tpu.vector_store %arg8[%c0_159, %c0_160], %366 {strides = array<i32>} : memref<8x128xf32, #tpu.memory_space<vmem>>, vector<8x128xf32>,
      %cst_161 = arith.constant 0.000000e+00 : f32
      %368 = vector.broadcast %cst_161 : f32 to vector<8x128xf32>
      %c0_162 = arith.constant 0 : index
      %c0_163 = arith.constant 0 : index
      %369 = vector.load %arg9[%c0_162, %c0_163] : memref<8x128xf32, #tpu.memory_space<vmem>>, vector<8x128xf32>
      tpu.vector_store %arg9[%c0_162, %c0_163], %368 {strides = array<i32>} : memref<8x128xf32, #tpu.memory_space<vmem>>, vector<8x128xf32>,
    } else {
    }
    %c0_i32_13 = arith.constant 0 : i32
    %c0_i32_14 = arith.constant 0 : i32
    %14 = arith.cmpi eq, %arg0, %c0_i32_14 : i32
    %c7_i32 = arith.constant 7 : i32
    %15 = arith.subi %c7_i32, %c0_i32_13 : i32
    %16 = arith.select %14, %c0_i32_13, %15 : i32
    %c8_i32 = arith.constant 8 : i32
    %17 = arith.muli %16, %c8_i32 : i32
    %18 = tpu.assume_multiple %17, 8 : i32
    %19 = arith.index_cast %18 : i32 to index
    %c0_15 = arith.constant 0 : index
    %20 = vector.load %arg7[%19, %c0_15] : memref<64x512xf32, #tpu.memory_space<vmem>>, vector<8x512xf32>
    %c0_16 = arith.constant 0 : index
    %c0_17 = arith.constant 0 : index
    %21 = vector.load %arg8[%c0_16, %c0_17] : memref<8x128xf32, #tpu.memory_space<vmem>>, vector<8x128xf32>
    %22 = arith.truncf %21 : vector<8x128xf32> to vector<8x128xbf16>
    %cst_18 = arith.constant dense<0.000000e+00> : vector<8x512xf32>
    %23 = tpu.matmul %22, %10, %cst_18 {dimension_numbers = #tpu.dot_dimension_numbers<[1], [0], [0], [1], [0, 0, 1, 1], [], []>} : vector<8x128xbf16>, vector<128x512xbf16>, vector<8x512xf32> -> vector<8x512xf32>
    %24 = arith.addf %20, %23 : vector<8x512xf32>
    %25 = vector.extract_strided_slice %24 {offsets = [0, 0], sizes = [8, 128], strides = [1, 1]} : vector<8x512xf32> to vector<8x128xf32>
    %26 = arith.negf %25 : vector<8x128xf32>
    %27 = math.exp %26 : vector<8x128xf32>
    %cst_19 = arith.constant 1.000000e+00 : f32
    %28 = vector.broadcast %cst_19 : f32 to vector<8x128xf32>
    %29 = arith.addf %28, %27 : vector<8x128xf32>
    %30 = arith.divf %28, %29 : vector<8x128xf32>
    %31 = vector.extract_strided_slice %24 {offsets = [0, 128], sizes = [8, 128], strides = [1, 1]} : vector<8x512xf32> to vector<8x128xf32>
    %32 = arith.negf %31 : vector<8x128xf32>
    %33 = math.exp %32 : vector<8x128xf32>
    %cst_20 = arith.constant 1.000000e+00 : f32
    %34 = vector.broadcast %cst_20 : f32 to vector<8x128xf32>
    %35 = arith.addf %34, %33 : vector<8x128xf32>
    %36 = arith.divf %34, %35 : vector<8x128xf32>
    %37 = vector.extract_strided_slice %24 {offsets = [0, 256], sizes = [8, 128], strides = [1, 1]} : vector<8x512xf32> to vector<8x128xf32>
    %38 = math.tanh %37 : vector<8x128xf32>
    %39 = vector.extract_strided_slice %24 {offsets = [0, 384], sizes = [8, 128], strides = [1, 1]} : vector<8x512xf32> to vector<8x128xf32>
    %40 = arith.negf %39 : vector<8x128xf32>
    %41 = math.exp %40 : vector<8x128xf32>
    %cst_21 = arith.constant 1.000000e+00 : f32
    %42 = vector.broadcast %cst_21 : f32 to vector<8x128xf32>
    %43 = arith.addf %42, %41 : vector<8x128xf32>
    %44 = arith.divf %42, %43 : vector<8x128xf32>
    %c0_22 = arith.constant 0 : index
    %c0_23 = arith.constant 0 : index
    %45 = vector.load %arg9[%c0_22, %c0_23] : memref<8x128xf32, #tpu.memory_space<vmem>>, vector<8x128xf32>
    %46 = arith.mulf %36, %45 : vector<8x128xf32>
    %47 = arith.mulf %30, %38 : vector<8x128xf32>
    %48 = arith.addf %46, %47 : vector<8x128xf32>
    %49 = math.tanh %48 : vector<8x128xf32>
    %50 = arith.mulf %44, %49 : vector<8x128xf32>
    %c0_24 = arith.constant 0 : index
    %c0_25 = arith.constant 0 : index
    %51 = vector.load %arg9[%c0_24, %c0_25] : memref<8x128xf32, #tpu.memory_space<vmem>>, vector<8x128xf32>
    tpu.vector_store %arg9[%c0_24, %c0_25], %48 {strides = array<i32>} : memref<8x128xf32, #tpu.memory_space<vmem>>, vector<8x128xf32>,
    %c0_26 = arith.constant 0 : index
    %c0_27 = arith.constant 0 : index
    %52 = vector.load %arg8[%c0_26, %c0_27] : memref<8x128xf32, #tpu.memory_space<vmem>>, vector<8x128xf32>
    tpu.vector_store %arg8[%c0_26, %c0_27], %50 {strides = array<i32>} : memref<8x128xf32, #tpu.memory_space<vmem>>, vector<8x128xf32>,
    %53 = arith.truncf %50 : vector<8x128xf32> to vector<8x128xbf16>
    %c0_28 = arith.constant 0 : index
    %54 = arith.index_cast %18 : i32 to index
    %c0_29 = arith.constant 0 : index
    %55 = vector.load %arg6[%c0_28, %54, %c0_29] : memref<1x64x128xbf16, #tpu.memory_space<vmem>>, vector<1x8x128xbf16>
    %56 = vector.shape_cast %55 : vector<1x8x128xbf16> to vector<8x128xbf16>
    %57 = vector.shape_cast %53 : vector<8x128xbf16> to vector<1x8x128xbf16>
    tpu.vector_store %arg6[%c0_28, %54, %c0_29], %57 {strides = array<i32>} : memref<1x64x128xbf16, #tpu.memory_space<vmem>>, vector<1x8x128xbf16>,
    %c1_i32 = arith.constant 1 : i32
    %c0_i32_30 = arith.constant 0 : i32
    %58 = arith.cmpi eq, %arg0, %c0_i32_30 : i32
    %c7_i32_31 = arith.constant 7 : i32
    %59 = arith.subi %c7_i32_31, %c1_i32 : i32
    %60 = arith.select %58, %c1_i32, %59 : i32
    %c8_i32_32 = arith.constant 8 : i32
    %61 = arith.muli %60, %c8_i32_32 : i32
    %62 = tpu.assume_multiple %61, 8 : i32
    %63 = arith.index_cast %62 : i32 to index
    %c0_33 = arith.constant 0 : index
    %64 = vector.load %arg7[%63, %c0_33] : memref<64x512xf32, #tpu.memory_space<vmem>>, vector<8x512xf32>
    %c0_34 = arith.constant 0 : index
    %c0_35 = arith.constant 0 : index
    %65 = vector.load %arg8[%c0_34, %c0_35] : memref<8x128xf32, #tpu.memory_space<vmem>>, vector<8x128xf32>
    %66 = arith.truncf %65 : vector<8x128xf32> to vector<8x128xbf16>
    %cst_36 = arith.constant dense<0.000000e+00> : vector<8x512xf32>
    %67 = tpu.matmul %66, %10, %cst_36 {dimension_numbers = #tpu.dot_dimension_numbers<[1], [0], [0], [1], [0, 0, 1, 1], [], []>} : vector<8x128xbf16>, vector<128x512xbf16>, vector<8x512xf32> -> vector<8x512xf32>
    %68 = arith.addf %64, %67 : vector<8x512xf32>
    %69 = vector.extract_strided_slice %68 {offsets = [0, 0], sizes = [8, 128], strides = [1, 1]} : vector<8x512xf32> to vector<8x128xf32>
    %70 = arith.negf %69 : vector<8x128xf32>
    %71 = math.exp %70 : vector<8x128xf32>
    %cst_37 = arith.constant 1.000000e+00 : f32
    %72 = vector.broadcast %cst_37 : f32 to vector<8x128xf32>
    %73 = arith.addf %72, %71 : vector<8x128xf32>
    %74 = arith.divf %72, %73 : vector<8x128xf32>
    %75 = vector.extract_strided_slice %68 {offsets = [0, 128], sizes = [8, 128], strides = [1, 1]} : vector<8x512xf32> to vector<8x128xf32>
    %76 = arith.negf %75 : vector<8x128xf32>
    %77 = math.exp %76 : vector<8x128xf32>
    %cst_38 = arith.constant 1.000000e+00 : f32
    %78 = vector.broadcast %cst_38 : f32 to vector<8x128xf32>
    %79 = arith.addf %78, %77 : vector<8x128xf32>
    %80 = arith.divf %78, %79 : vector<8x128xf32>
    %81 = vector.extract_strided_slice %68 {offsets = [0, 256], sizes = [8, 128], strides = [1, 1]} : vector<8x512xf32> to vector<8x128xf32>
    %82 = math.tanh %81 : vector<8x128xf32>
    %83 = vector.extract_strided_slice %68 {offsets = [0, 384], sizes = [8, 128], strides = [1, 1]} : vector<8x512xf32> to vector<8x128xf32>
    %84 = arith.negf %83 : vector<8x128xf32>
    %85 = math.exp %84 : vector<8x128xf32>
    %cst_39 = arith.constant 1.000000e+00 : f32
    %86 = vector.broadcast %cst_39 : f32 to vector<8x128xf32>
    %87 = arith.addf %86, %85 : vector<8x128xf32>
    %88 = arith.divf %86, %87 : vector<8x128xf32>
    %c0_40 = arith.constant 0 : index
    %c0_41 = arith.constant 0 : index
    %89 = vector.load %arg9[%c0_40, %c0_41] : memref<8x128xf32, #tpu.memory_space<vmem>>, vector<8x128xf32>
    %90 = arith.mulf %80, %89 : vector<8x128xf32>
    %91 = arith.mulf %74, %82 : vector<8x128xf32>
    %92 = arith.addf %90, %91 : vector<8x128xf32>
    %93 = math.tanh %92 : vector<8x128xf32>
    %94 = arith.mulf %88, %93 : vector<8x128xf32>
    %c0_42 = arith.constant 0 : index
    %c0_43 = arith.constant 0 : index
    %95 = vector.load %arg9[%c0_42, %c0_43] : memref<8x128xf32, #tpu.memory_space<vmem>>, vector<8x128xf32>
    tpu.vector_store %arg9[%c0_42, %c0_43], %92 {strides = array<i32>} : memref<8x128xf32, #tpu.memory_space<vmem>>, vector<8x128xf32>,
    %c0_44 = arith.constant 0 : index
    %c0_45 = arith.constant 0 : index
    %96 = vector.load %arg8[%c0_44, %c0_45] : memref<8x128xf32, #tpu.memory_space<vmem>>, vector<8x128xf32>
    tpu.vector_store %arg8[%c0_44, %c0_45], %94 {strides = array<i32>} : memref<8x128xf32, #tpu.memory_space<vmem>>, vector<8x128xf32>,
    %97 = arith.truncf %94 : vector<8x128xf32> to vector<8x128xbf16>
    %c0_46 = arith.constant 0 : index
    %98 = arith.index_cast %62 : i32 to index
    %c0_47 = arith.constant 0 : index
    %99 = vector.load %arg6[%c0_46, %98, %c0_47] : memref<1x64x128xbf16, #tpu.memory_space<vmem>>, vector<1x8x128xbf16>
    %100 = vector.shape_cast %99 : vector<1x8x128xbf16> to vector<8x128xbf16>
    %101 = vector.shape_cast %97 : vector<8x128xbf16> to vector<1x8x128xbf16>
    tpu.vector_store %arg6[%c0_46, %98, %c0_47], %101 {strides = array<i32>} : memref<1x64x128xbf16, #tpu.memory_space<vmem>>, vector<1x8x128xbf16>,
    %c2_i32 = arith.constant 2 : i32
    %c0_i32_48 = arith.constant 0 : i32
    %102 = arith.cmpi eq, %arg0, %c0_i32_48 : i32
    %c7_i32_49 = arith.constant 7 : i32
    %103 = arith.subi %c7_i32_49, %c2_i32 : i32
    %104 = arith.select %102, %c2_i32, %103 : i32
    %c8_i32_50 = arith.constant 8 : i32
    %105 = arith.muli %104, %c8_i32_50 : i32
    %106 = tpu.assume_multiple %105, 8 : i32
    %107 = arith.index_cast %106 : i32 to index
    %c0_51 = arith.constant 0 : index
    %108 = vector.load %arg7[%107, %c0_51] : memref<64x512xf32, #tpu.memory_space<vmem>>, vector<8x512xf32>
    %c0_52 = arith.constant 0 : index
    %c0_53 = arith.constant 0 : index
    %109 = vector.load %arg8[%c0_52, %c0_53] : memref<8x128xf32, #tpu.memory_space<vmem>>, vector<8x128xf32>
    %110 = arith.truncf %109 : vector<8x128xf32> to vector<8x128xbf16>
    %cst_54 = arith.constant dense<0.000000e+00> : vector<8x512xf32>
    %111 = tpu.matmul %110, %10, %cst_54 {dimension_numbers = #tpu.dot_dimension_numbers<[1], [0], [0], [1], [0, 0, 1, 1], [], []>} : vector<8x128xbf16>, vector<128x512xbf16>, vector<8x512xf32> -> vector<8x512xf32>
    %112 = arith.addf %108, %111 : vector<8x512xf32>
    %113 = vector.extract_strided_slice %112 {offsets = [0, 0], sizes = [8, 128], strides = [1, 1]} : vector<8x512xf32> to vector<8x128xf32>
    %114 = arith.negf %113 : vector<8x128xf32>
    %115 = math.exp %114 : vector<8x128xf32>
    %cst_55 = arith.constant 1.000000e+00 : f32
    %116 = vector.broadcast %cst_55 : f32 to vector<8x128xf32>
    %117 = arith.addf %116, %115 : vector<8x128xf32>
    %118 = arith.divf %116, %117 : vector<8x128xf32>
    %119 = vector.extract_strided_slice %112 {offsets = [0, 128], sizes = [8, 128], strides = [1, 1]} : vector<8x512xf32> to vector<8x128xf32>
    %120 = arith.negf %119 : vector<8x128xf32>
    %121 = math.exp %120 : vector<8x128xf32>
    %cst_56 = arith.constant 1.000000e+00 : f32
    %122 = vector.broadcast %cst_56 : f32 to vector<8x128xf32>
    %123 = arith.addf %122, %121 : vector<8x128xf32>
    %124 = arith.divf %122, %123 : vector<8x128xf32>
    %125 = vector.extract_strided_slice %112 {offsets = [0, 256], sizes = [8, 128], strides = [1, 1]} : vector<8x512xf32> to vector<8x128xf32>
    %126 = math.tanh %125 : vector<8x128xf32>
    %127 = vector.extract_strided_slice %112 {offsets = [0, 384], sizes = [8, 128], strides = [1, 1]} : vector<8x512xf32> to vector<8x128xf32>
    %128 = arith.negf %127 : vector<8x128xf32>
    %129 = math.exp %128 : vector<8x128xf32>
    %cst_57 = arith.constant 1.000000e+00 : f32
    %130 = vector.broadcast %cst_57 : f32 to vector<8x128xf32>
    %131 = arith.addf %130, %129 : vector<8x128xf32>
    %132 = arith.divf %130, %131 : vector<8x128xf32>
    %c0_58 = arith.constant 0 : index
    %c0_59 = arith.constant 0 : index
    %133 = vector.load %arg9[%c0_58, %c0_59] : memref<8x128xf32, #tpu.memory_space<vmem>>, vector<8x128xf32>
    %134 = arith.mulf %124, %133 : vector<8x128xf32>
    %135 = arith.mulf %118, %126 : vector<8x128xf32>
    %136 = arith.addf %134, %135 : vector<8x128xf32>
    %137 = math.tanh %136 : vector<8x128xf32>
    %138 = arith.mulf %132, %137 : vector<8x128xf32>
    %c0_60 = arith.constant 0 : index
    %c0_61 = arith.constant 0 : index
    %139 = vector.load %arg9[%c0_60, %c0_61] : memref<8x128xf32, #tpu.memory_space<vmem>>, vector<8x128xf32>
    tpu.vector_store %arg9[%c0_60, %c0_61], %136 {strides = array<i32>} : memref<8x128xf32, #tpu.memory_space<vmem>>, vector<8x128xf32>,
    %c0_62 = arith.constant 0 : index
    %c0_63 = arith.constant 0 : index
    %140 = vector.load %arg8[%c0_62, %c0_63] : memref<8x128xf32, #tpu.memory_space<vmem>>, vector<8x128xf32>
    tpu.vector_store %arg8[%c0_62, %c0_63], %138 {strides = array<i32>} : memref<8x128xf32, #tpu.memory_space<vmem>>, vector<8x128xf32>,
    %141 = arith.truncf %138 : vector<8x128xf32> to vector<8x128xbf16>
    %c0_64 = arith.constant 0 : index
    %142 = arith.index_cast %106 : i32 to index
    %c0_65 = arith.constant 0 : index
    %143 = vector.load %arg6[%c0_64, %142, %c0_65] : memref<1x64x128xbf16, #tpu.memory_space<vmem>>, vector<1x8x128xbf16>
    %144 = vector.shape_cast %143 : vector<1x8x128xbf16> to vector<8x128xbf16>
    %145 = vector.shape_cast %141 : vector<8x128xbf16> to vector<1x8x128xbf16>
    tpu.vector_store %arg6[%c0_64, %142, %c0_65], %145 {strides = array<i32>} : memref<1x64x128xbf16, #tpu.memory_space<vmem>>, vector<1x8x128xbf16>,
    %c3_i32 = arith.constant 3 : i32
    %c0_i32_66 = arith.constant 0 : i32
    %146 = arith.cmpi eq, %arg0, %c0_i32_66 : i32
    %c7_i32_67 = arith.constant 7 : i32
    %147 = arith.subi %c7_i32_67, %c3_i32 : i32
    %148 = arith.select %146, %c3_i32, %147 : i32
    %c8_i32_68 = arith.constant 8 : i32
    %149 = arith.muli %148, %c8_i32_68 : i32
    %150 = tpu.assume_multiple %149, 8 : i32
    %151 = arith.index_cast %150 : i32 to index
    %c0_69 = arith.constant 0 : index
    %152 = vector.load %arg7[%151, %c0_69] : memref<64x512xf32, #tpu.memory_space<vmem>>, vector<8x512xf32>
    %c0_70 = arith.constant 0 : index
    %c0_71 = arith.constant 0 : index
    %153 = vector.load %arg8[%c0_70, %c0_71] : memref<8x128xf32, #tpu.memory_space<vmem>>, vector<8x128xf32>
    %154 = arith.truncf %153 : vector<8x128xf32> to vector<8x128xbf16>
    %cst_72 = arith.constant dense<0.000000e+00> : vector<8x512xf32>
    %155 = tpu.matmul %154, %10, %cst_72 {dimension_numbers = #tpu.dot_dimension_numbers<[1], [0], [0], [1], [0, 0, 1, 1], [], []>} : vector<8x128xbf16>, vector<128x512xbf16>, vector<8x512xf32> -> vector<8x512xf32>
    %156 = arith.addf %152, %155 : vector<8x512xf32>
    %157 = vector.extract_strided_slice %156 {offsets = [0, 0], sizes = [8, 128], strides = [1, 1]} : vector<8x512xf32> to vector<8x128xf32>
    %158 = arith.negf %157 : vector<8x128xf32>
    %159 = math.exp %158 : vector<8x128xf32>
    %cst_73 = arith.constant 1.000000e+00 : f32
    %160 = vector.broadcast %cst_73 : f32 to vector<8x128xf32>
    %161 = arith.addf %160, %159 : vector<8x128xf32>
    %162 = arith.divf %160, %161 : vector<8x128xf32>
    %163 = vector.extract_strided_slice %156 {offsets = [0, 128], sizes = [8, 128], strides = [1, 1]} : vector<8x512xf32> to vector<8x128xf32>
    %164 = arith.negf %163 : vector<8x128xf32>
    %165 = math.exp %164 : vector<8x128xf32>
    %cst_74 = arith.constant 1.000000e+00 : f32
    %166 = vector.broadcast %cst_74 : f32 to vector<8x128xf32>
    %167 = arith.addf %166, %165 : vector<8x128xf32>
    %168 = arith.divf %166, %167 : vector<8x128xf32>
    %169 = vector.extract_strided_slice %156 {offsets = [0, 256], sizes = [8, 128], strides = [1, 1]} : vector<8x512xf32> to vector<8x128xf32>
    %170 = math.tanh %169 : vector<8x128xf32>
    %171 = vector.extract_strided_slice %156 {offsets = [0, 384], sizes = [8, 128], strides = [1, 1]} : vector<8x512xf32> to vector<8x128xf32>
    %172 = arith.negf %171 : vector<8x128xf32>
    %173 = math.exp %172 : vector<8x128xf32>
    %cst_75 = arith.constant 1.000000e+00 : f32
    %174 = vector.broadcast %cst_75 : f32 to vector<8x128xf32>
    %175 = arith.addf %174, %173 : vector<8x128xf32>
    %176 = arith.divf %174, %175 : vector<8x128xf32>
    %c0_76 = arith.constant 0 : index
    %c0_77 = arith.constant 0 : index
    %177 = vector.load %arg9[%c0_76, %c0_77] : memref<8x128xf32, #tpu.memory_space<vmem>>, vector<8x128xf32>
    %178 = arith.mulf %168, %177 : vector<8x128xf32>
    %179 = arith.mulf %162, %170 : vector<8x128xf32>
    %180 = arith.addf %178, %179 : vector<8x128xf32>
    %181 = math.tanh %180 : vector<8x128xf32>
    %182 = arith.mulf %176, %181 : vector<8x128xf32>
    %c0_78 = arith.constant 0 : index
    %c0_79 = arith.constant 0 : index
    %183 = vector.load %arg9[%c0_78, %c0_79] : memref<8x128xf32, #tpu.memory_space<vmem>>, vector<8x128xf32>
    tpu.vector_store %arg9[%c0_78, %c0_79], %180 {strides = array<i32>} : memref<8x128xf32, #tpu.memory_space<vmem>>, vector<8x128xf32>,
    %c0_80 = arith.constant 0 : index
    %c0_81 = arith.constant 0 : index
    %184 = vector.load %arg8[%c0_80, %c0_81] : memref<8x128xf32, #tpu.memory_space<vmem>>, vector<8x128xf32>
    tpu.vector_store %arg8[%c0_80, %c0_81], %182 {strides = array<i32>} : memref<8x128xf32, #tpu.memory_space<vmem>>, vector<8x128xf32>,
    %185 = arith.truncf %182 : vector<8x128xf32> to vector<8x128xbf16>
    %c0_82 = arith.constant 0 : index
    %186 = arith.index_cast %150 : i32 to index
    %c0_83 = arith.constant 0 : index
    %187 = vector.load %arg6[%c0_82, %186, %c0_83] : memref<1x64x128xbf16, #tpu.memory_space<vmem>>, vector<1x8x128xbf16>
    %188 = vector.shape_cast %187 : vector<1x8x128xbf16> to vector<8x128xbf16>
    %189 = vector.shape_cast %185 : vector<8x128xbf16> to vector<1x8x128xbf16>
    tpu.vector_store %arg6[%c0_82, %186, %c0_83], %189 {strides = array<i32>} : memref<1x64x128xbf16, #tpu.memory_space<vmem>>, vector<1x8x128xbf16>,
    %c4_i32 = arith.constant 4 : i32
    %c0_i32_84 = arith.constant 0 : i32
    %190 = arith.cmpi eq, %arg0, %c0_i32_84 : i32
    %c7_i32_85 = arith.constant 7 : i32
    %191 = arith.subi %c7_i32_85, %c4_i32 : i32
    %192 = arith.select %190, %c4_i32, %191 : i32
    %c8_i32_86 = arith.constant 8 : i32
    %193 = arith.muli %192, %c8_i32_86 : i32
    %194 = tpu.assume_multiple %193, 8 : i32
    %195 = arith.index_cast %194 : i32 to index
    %c0_87 = arith.constant 0 : index
    %196 = vector.load %arg7[%195, %c0_87] : memref<64x512xf32, #tpu.memory_space<vmem>>, vector<8x512xf32>
    %c0_88 = arith.constant 0 : index
    %c0_89 = arith.constant 0 : index
    %197 = vector.load %arg8[%c0_88, %c0_89] : memref<8x128xf32, #tpu.memory_space<vmem>>, vector<8x128xf32>
    %198 = arith.truncf %197 : vector<8x128xf32> to vector<8x128xbf16>
    %cst_90 = arith.constant dense<0.000000e+00> : vector<8x512xf32>
    %199 = tpu.matmul %198, %10, %cst_90 {dimension_numbers = #tpu.dot_dimension_numbers<[1], [0], [0], [1], [0, 0, 1, 1], [], []>} : vector<8x128xbf16>, vector<128x512xbf16>, vector<8x512xf32> -> vector<8x512xf32>
    %200 = arith.addf %196, %199 : vector<8x512xf32>
    %201 = vector.extract_strided_slice %200 {offsets = [0, 0], sizes = [8, 128], strides = [1, 1]} : vector<8x512xf32> to vector<8x128xf32>
    %202 = arith.negf %201 : vector<8x128xf32>
    %203 = math.exp %202 : vector<8x128xf32>
    %cst_91 = arith.constant 1.000000e+00 : f32
    %204 = vector.broadcast %cst_91 : f32 to vector<8x128xf32>
    %205 = arith.addf %204, %203 : vector<8x128xf32>
    %206 = arith.divf %204, %205 : vector<8x128xf32>
    %207 = vector.extract_strided_slice %200 {offsets = [0, 128], sizes = [8, 128], strides = [1, 1]} : vector<8x512xf32> to vector<8x128xf32>
    %208 = arith.negf %207 : vector<8x128xf32>
    %209 = math.exp %208 : vector<8x128xf32>
    %cst_92 = arith.constant 1.000000e+00 : f32
    %210 = vector.broadcast %cst_92 : f32 to vector<8x128xf32>
    %211 = arith.addf %210, %209 : vector<8x128xf32>
    %212 = arith.divf %210, %211 : vector<8x128xf32>
    %213 = vector.extract_strided_slice %200 {offsets = [0, 256], sizes = [8, 128], strides = [1, 1]} : vector<8x512xf32> to vector<8x128xf32>
    %214 = math.tanh %213 : vector<8x128xf32>
    %215 = vector.extract_strided_slice %200 {offsets = [0, 384], sizes = [8, 128], strides = [1, 1]} : vector<8x512xf32> to vector<8x128xf32>
    %216 = arith.negf %215 : vector<8x128xf32>
    %217 = math.exp %216 : vector<8x128xf32>
    %cst_93 = arith.constant 1.000000e+00 : f32
    %218 = vector.broadcast %cst_93 : f32 to vector<8x128xf32>
    %219 = arith.addf %218, %217 : vector<8x128xf32>
    %220 = arith.divf %218, %219 : vector<8x128xf32>
    %c0_94 = arith.constant 0 : index
    %c0_95 = arith.constant 0 : index
    %221 = vector.load %arg9[%c0_94, %c0_95] : memref<8x128xf32, #tpu.memory_space<vmem>>, vector<8x128xf32>
    %222 = arith.mulf %212, %221 : vector<8x128xf32>
    %223 = arith.mulf %206, %214 : vector<8x128xf32>
    %224 = arith.addf %222, %223 : vector<8x128xf32>
    %225 = math.tanh %224 : vector<8x128xf32>
    %226 = arith.mulf %220, %225 : vector<8x128xf32>
    %c0_96 = arith.constant 0 : index
    %c0_97 = arith.constant 0 : index
    %227 = vector.load %arg9[%c0_96, %c0_97] : memref<8x128xf32, #tpu.memory_space<vmem>>, vector<8x128xf32>
    tpu.vector_store %arg9[%c0_96, %c0_97], %224 {strides = array<i32>} : memref<8x128xf32, #tpu.memory_space<vmem>>, vector<8x128xf32>,
    %c0_98 = arith.constant 0 : index
    %c0_99 = arith.constant 0 : index
    %228 = vector.load %arg8[%c0_98, %c0_99] : memref<8x128xf32, #tpu.memory_space<vmem>>, vector<8x128xf32>
    tpu.vector_store %arg8[%c0_98, %c0_99], %226 {strides = array<i32>} : memref<8x128xf32, #tpu.memory_space<vmem>>, vector<8x128xf32>,
    %229 = arith.truncf %226 : vector<8x128xf32> to vector<8x128xbf16>
    %c0_100 = arith.constant 0 : index
    %230 = arith.index_cast %194 : i32 to index
    %c0_101 = arith.constant 0 : index
    %231 = vector.load %arg6[%c0_100, %230, %c0_101] : memref<1x64x128xbf16, #tpu.memory_space<vmem>>, vector<1x8x128xbf16>
    %232 = vector.shape_cast %231 : vector<1x8x128xbf16> to vector<8x128xbf16>
    %233 = vector.shape_cast %229 : vector<8x128xbf16> to vector<1x8x128xbf16>
    tpu.vector_store %arg6[%c0_100, %230, %c0_101], %233 {strides = array<i32>} : memref<1x64x128xbf16, #tpu.memory_space<vmem>>, vector<1x8x128xbf16>,
    %c5_i32 = arith.constant 5 : i32
    %c0_i32_102 = arith.constant 0 : i32
    %234 = arith.cmpi eq, %arg0, %c0_i32_102 : i32
    %c7_i32_103 = arith.constant 7 : i32
    %235 = arith.subi %c7_i32_103, %c5_i32 : i32
    %236 = arith.select %234, %c5_i32, %235 : i32
    %c8_i32_104 = arith.constant 8 : i32
    %237 = arith.muli %236, %c8_i32_104 : i32
    %238 = tpu.assume_multiple %237, 8 : i32
    %239 = arith.index_cast %238 : i32 to index
    %c0_105 = arith.constant 0 : index
    %240 = vector.load %arg7[%239, %c0_105] : memref<64x512xf32, #tpu.memory_space<vmem>>, vector<8x512xf32>
    %c0_106 = arith.constant 0 : index
    %c0_107 = arith.constant 0 : index
    %241 = vector.load %arg8[%c0_106, %c0_107] : memref<8x128xf32, #tpu.memory_space<vmem>>, vector<8x128xf32>
    %242 = arith.truncf %241 : vector<8x128xf32> to vector<8x128xbf16>
    %cst_108 = arith.constant dense<0.000000e+00> : vector<8x512xf32>
    %243 = tpu.matmul %242, %10, %cst_108 {dimension_numbers = #tpu.dot_dimension_numbers<[1], [0], [0], [1], [0, 0, 1, 1], [], []>} : vector<8x128xbf16>, vector<128x512xbf16>, vector<8x512xf32> -> vector<8x512xf32>
    %244 = arith.addf %240, %243 : vector<8x512xf32>
    %245 = vector.extract_strided_slice %244 {offsets = [0, 0], sizes = [8, 128], strides = [1, 1]} : vector<8x512xf32> to vector<8x128xf32>
    %246 = arith.negf %245 : vector<8x128xf32>
    %247 = math.exp %246 : vector<8x128xf32>
    %cst_109 = arith.constant 1.000000e+00 : f32
    %248 = vector.broadcast %cst_109 : f32 to vector<8x128xf32>
    %249 = arith.addf %248, %247 : vector<8x128xf32>
    %250 = arith.divf %248, %249 : vector<8x128xf32>
    %251 = vector.extract_strided_slice %244 {offsets = [0, 128], sizes = [8, 128], strides = [1, 1]} : vector<8x512xf32> to vector<8x128xf32>
    %252 = arith.negf %251 : vector<8x128xf32>
    %253 = math.exp %252 : vector<8x128xf32>
    %cst_110 = arith.constant 1.000000e+00 : f32
    %254 = vector.broadcast %cst_110 : f32 to vector<8x128xf32>
    %255 = arith.addf %254, %253 : vector<8x128xf32>
    %256 = arith.divf %254, %255 : vector<8x128xf32>
    %257 = vector.extract_strided_slice %244 {offsets = [0, 256], sizes = [8, 128], strides = [1, 1]} : vector<8x512xf32> to vector<8x128xf32>
    %258 = math.tanh %257 : vector<8x128xf32>
    %259 = vector.extract_strided_slice %244 {offsets = [0, 384], sizes = [8, 128], strides = [1, 1]} : vector<8x512xf32> to vector<8x128xf32>
    %260 = arith.negf %259 : vector<8x128xf32>
    %261 = math.exp %260 : vector<8x128xf32>
    %cst_111 = arith.constant 1.000000e+00 : f32
    %262 = vector.broadcast %cst_111 : f32 to vector<8x128xf32>
    %263 = arith.addf %262, %261 : vector<8x128xf32>
    %264 = arith.divf %262, %263 : vector<8x128xf32>
    %c0_112 = arith.constant 0 : index
    %c0_113 = arith.constant 0 : index
    %265 = vector.load %arg9[%c0_112, %c0_113] : memref<8x128xf32, #tpu.memory_space<vmem>>, vector<8x128xf32>
    %266 = arith.mulf %256, %265 : vector<8x128xf32>
    %267 = arith.mulf %250, %258 : vector<8x128xf32>
    %268 = arith.addf %266, %267 : vector<8x128xf32>
    %269 = math.tanh %268 : vector<8x128xf32>
    %270 = arith.mulf %264, %269 : vector<8x128xf32>
    %c0_114 = arith.constant 0 : index
    %c0_115 = arith.constant 0 : index
    %271 = vector.load %arg9[%c0_114, %c0_115] : memref<8x128xf32, #tpu.memory_space<vmem>>, vector<8x128xf32>
    tpu.vector_store %arg9[%c0_114, %c0_115], %268 {strides = array<i32>} : memref<8x128xf32, #tpu.memory_space<vmem>>, vector<8x128xf32>,
    %c0_116 = arith.constant 0 : index
    %c0_117 = arith.constant 0 : index
    %272 = vector.load %arg8[%c0_116, %c0_117] : memref<8x128xf32, #tpu.memory_space<vmem>>, vector<8x128xf32>
    tpu.vector_store %arg8[%c0_116, %c0_117], %270 {strides = array<i32>} : memref<8x128xf32, #tpu.memory_space<vmem>>, vector<8x128xf32>,
    %273 = arith.truncf %270 : vector<8x128xf32> to vector<8x128xbf16>
    %c0_118 = arith.constant 0 : index
    %274 = arith.index_cast %238 : i32 to index
    %c0_119 = arith.constant 0 : index
    %275 = vector.load %arg6[%c0_118, %274, %c0_119] : memref<1x64x128xbf16, #tpu.memory_space<vmem>>, vector<1x8x128xbf16>
    %276 = vector.shape_cast %275 : vector<1x8x128xbf16> to vector<8x128xbf16>
    %277 = vector.shape_cast %273 : vector<8x128xbf16> to vector<1x8x128xbf16>
    tpu.vector_store %arg6[%c0_118, %274, %c0_119], %277 {strides = array<i32>} : memref<1x64x128xbf16, #tpu.memory_space<vmem>>, vector<1x8x128xbf16>,
    %c6_i32 = arith.constant 6 : i32
    %c0_i32_120 = arith.constant 0 : i32
    %278 = arith.cmpi eq, %arg0, %c0_i32_120 : i32
    %c7_i32_121 = arith.constant 7 : i32
    %279 = arith.subi %c7_i32_121, %c6_i32 : i32
    %280 = arith.select %278, %c6_i32, %279 : i32
    %c8_i32_122 = arith.constant 8 : i32
    %281 = arith.muli %280, %c8_i32_122 : i32
    %282 = tpu.assume_multiple %281, 8 : i32
    %283 = arith.index_cast %282 : i32 to index
    %c0_123 = arith.constant 0 : index
    %284 = vector.load %arg7[%283, %c0_123] : memref<64x512xf32, #tpu.memory_space<vmem>>, vector<8x512xf32>
    %c0_124 = arith.constant 0 : index
    %c0_125 = arith.constant 0 : index
    %285 = vector.load %arg8[%c0_124, %c0_125] : memref<8x128xf32, #tpu.memory_space<vmem>>, vector<8x128xf32>
    %286 = arith.truncf %285 : vector<8x128xf32> to vector<8x128xbf16>
    %cst_126 = arith.constant dense<0.000000e+00> : vector<8x512xf32>
    %287 = tpu.matmul %286, %10, %cst_126 {dimension_numbers = #tpu.dot_dimension_numbers<[1], [0], [0], [1], [0, 0, 1, 1], [], []>} : vector<8x128xbf16>, vector<128x512xbf16>, vector<8x512xf32> -> vector<8x512xf32>
    %288 = arith.addf %284, %287 : vector<8x512xf32>
    %289 = vector.extract_strided_slice %288 {offsets = [0, 0], sizes = [8, 128], strides = [1, 1]} : vector<8x512xf32> to vector<8x128xf32>
    %290 = arith.negf %289 : vector<8x128xf32>
    %291 = math.exp %290 : vector<8x128xf32>
    %cst_127 = arith.constant 1.000000e+00 : f32
    %292 = vector.broadcast %cst_127 : f32 to vector<8x128xf32>
    %293 = arith.addf %292, %291 : vector<8x128xf32>
    %294 = arith.divf %292, %293 : vector<8x128xf32>
    %295 = vector.extract_strided_slice %288 {offsets = [0, 128], sizes = [8, 128], strides = [1, 1]} : vector<8x512xf32> to vector<8x128xf32>
    %296 = arith.negf %295 : vector<8x128xf32>
    %297 = math.exp %296 : vector<8x128xf32>
    %cst_128 = arith.constant 1.000000e+00 : f32
    %298 = vector.broadcast %cst_128 : f32 to vector<8x128xf32>
    %299 = arith.addf %298, %297 : vector<8x128xf32>
    %300 = arith.divf %298, %299 : vector<8x128xf32>
    %301 = vector.extract_strided_slice %288 {offsets = [0, 256], sizes = [8, 128], strides = [1, 1]} : vector<8x512xf32> to vector<8x128xf32>
    %302 = math.tanh %301 : vector<8x128xf32>
    %303 = vector.extract_strided_slice %288 {offsets = [0, 384], sizes = [8, 128], strides = [1, 1]} : vector<8x512xf32> to vector<8x128xf32>
    %304 = arith.negf %303 : vector<8x128xf32>
    %305 = math.exp %304 : vector<8x128xf32>
    %cst_129 = arith.constant 1.000000e+00 : f32
    %306 = vector.broadcast %cst_129 : f32 to vector<8x128xf32>
    %307 = arith.addf %306, %305 : vector<8x128xf32>
    %308 = arith.divf %306, %307 : vector<8x128xf32>
    %c0_130 = arith.constant 0 : index
    %c0_131 = arith.constant 0 : index
    %309 = vector.load %arg9[%c0_130, %c0_131] : memref<8x128xf32, #tpu.memory_space<vmem>>, vector<8x128xf32>
    %310 = arith.mulf %300, %309 : vector<8x128xf32>
    %311 = arith.mulf %294, %302 : vector<8x128xf32>
    %312 = arith.addf %310, %311 : vector<8x128xf32>
    %313 = math.tanh %312 : vector<8x128xf32>
    %314 = arith.mulf %308, %313 : vector<8x128xf32>
    %c0_132 = arith.constant 0 : index
    %c0_133 = arith.constant 0 : index
    %315 = vector.load %arg9[%c0_132, %c0_133] : memref<8x128xf32, #tpu.memory_space<vmem>>, vector<8x128xf32>
    tpu.vector_store %arg9[%c0_132, %c0_133], %312 {strides = array<i32>} : memref<8x128xf32, #tpu.memory_space<vmem>>, vector<8x128xf32>,
    %c0_134 = arith.constant 0 : index
    %c0_135 = arith.constant 0 : index
    %316 = vector.load %arg8[%c0_134, %c0_135] : memref<8x128xf32, #tpu.memory_space<vmem>>, vector<8x128xf32>
    tpu.vector_store %arg8[%c0_134, %c0_135], %314 {strides = array<i32>} : memref<8x128xf32, #tpu.memory_space<vmem>>, vector<8x128xf32>,
    %317 = arith.truncf %314 : vector<8x128xf32> to vector<8x128xbf16>
    %c0_136 = arith.constant 0 : index
    %318 = arith.index_cast %282 : i32 to index
    %c0_137 = arith.constant 0 : index
    %319 = vector.load %arg6[%c0_136, %318, %c0_137] : memref<1x64x128xbf16, #tpu.memory_space<vmem>>, vector<1x8x128xbf16>
    %320 = vector.shape_cast %319 : vector<1x8x128xbf16> to vector<8x128xbf16>
    %321 = vector.shape_cast %317 : vector<8x128xbf16> to vector<1x8x128xbf16>
    tpu.vector_store %arg6[%c0_136, %318, %c0_137], %321 {strides = array<i32>} : memref<1x64x128xbf16, #tpu.memory_space<vmem>>, vector<1x8x128xbf16>,
    %c7_i32_138 = arith.constant 7 : i32
    %c0_i32_139 = arith.constant 0 : i32
    %322 = arith.cmpi eq, %arg0, %c0_i32_139 : i32
    %c7_i32_140 = arith.constant 7 : i32
    %323 = arith.subi %c7_i32_140, %c7_i32_138 : i32
    %324 = arith.select %322, %c7_i32_138, %323 : i32
    %c8_i32_141 = arith.constant 8 : i32
    %325 = arith.muli %324, %c8_i32_141 : i32
    %326 = tpu.assume_multiple %325, 8 : i32
    %327 = arith.index_cast %326 : i32 to index
    %c0_142 = arith.constant 0 : index
    %328 = vector.load %arg7[%327, %c0_142] : memref<64x512xf32, #tpu.memory_space<vmem>>, vector<8x512xf32>
    %c0_143 = arith.constant 0 : index
    %c0_144 = arith.constant 0 : index
    %329 = vector.load %arg8[%c0_143, %c0_144] : memref<8x128xf32, #tpu.memory_space<vmem>>, vector<8x128xf32>
    %330 = arith.truncf %329 : vector<8x128xf32> to vector<8x128xbf16>
    %cst_145 = arith.constant dense<0.000000e+00> : vector<8x512xf32>
    %331 = tpu.matmul %330, %10, %cst_145 {dimension_numbers = #tpu.dot_dimension_numbers<[1], [0], [0], [1], [0, 0, 1, 1], [], []>} : vector<8x128xbf16>, vector<128x512xbf16>, vector<8x512xf32> -> vector<8x512xf32>
    %332 = arith.addf %328, %331 : vector<8x512xf32>
    %333 = vector.extract_strided_slice %332 {offsets = [0, 0], sizes = [8, 128], strides = [1, 1]} : vector<8x512xf32> to vector<8x128xf32>
    %334 = arith.negf %333 : vector<8x128xf32>
    %335 = math.exp %334 : vector<8x128xf32>
    %cst_146 = arith.constant 1.000000e+00 : f32
    %336 = vector.broadcast %cst_146 : f32 to vector<8x128xf32>
    %337 = arith.addf %336, %335 : vector<8x128xf32>
    %338 = arith.divf %336, %337 : vector<8x128xf32>
    %339 = vector.extract_strided_slice %332 {offsets = [0, 128], sizes = [8, 128], strides = [1, 1]} : vector<8x512xf32> to vector<8x128xf32>
    %340 = arith.negf %339 : vector<8x128xf32>
    %341 = math.exp %340 : vector<8x128xf32>
    %cst_147 = arith.constant 1.000000e+00 : f32
    %342 = vector.broadcast %cst_147 : f32 to vector<8x128xf32>
    %343 = arith.addf %342, %341 : vector<8x128xf32>
    %344 = arith.divf %342, %343 : vector<8x128xf32>
    %345 = vector.extract_strided_slice %332 {offsets = [0, 256], sizes = [8, 128], strides = [1, 1]} : vector<8x512xf32> to vector<8x128xf32>
    %346 = math.tanh %345 : vector<8x128xf32>
    %347 = vector.extract_strided_slice %332 {offsets = [0, 384], sizes = [8, 128], strides = [1, 1]} : vector<8x512xf32> to vector<8x128xf32>
    %348 = arith.negf %347 : vector<8x128xf32>
    %349 = math.exp %348 : vector<8x128xf32>
    %cst_148 = arith.constant 1.000000e+00 : f32
    %350 = vector.broadcast %cst_148 : f32 to vector<8x128xf32>
    %351 = arith.addf %350, %349 : vector<8x128xf32>
    %352 = arith.divf %350, %351 : vector<8x128xf32>
    %c0_149 = arith.constant 0 : index
    %c0_150 = arith.constant 0 : index
    %353 = vector.load %arg9[%c0_149, %c0_150] : memref<8x128xf32, #tpu.memory_space<vmem>>, vector<8x128xf32>
    %354 = arith.mulf %344, %353 : vector<8x128xf32>
    %355 = arith.mulf %338, %346 : vector<8x128xf32>
    %356 = arith.addf %354, %355 : vector<8x128xf32>
    %357 = math.tanh %356 : vector<8x128xf32>
    %358 = arith.mulf %352, %357 : vector<8x128xf32>
    %c0_151 = arith.constant 0 : index
    %c0_152 = arith.constant 0 : index
    %359 = vector.load %arg9[%c0_151, %c0_152] : memref<8x128xf32, #tpu.memory_space<vmem>>, vector<8x128xf32>
    tpu.vector_store %arg9[%c0_151, %c0_152], %356 {strides = array<i32>} : memref<8x128xf32, #tpu.memory_space<vmem>>, vector<8x128xf32>,
    %c0_153 = arith.constant 0 : index
    %c0_154 = arith.constant 0 : index
    %360 = vector.load %arg8[%c0_153, %c0_154] : memref<8x128xf32, #tpu.memory_space<vmem>>, vector<8x128xf32>
    tpu.vector_store %arg8[%c0_153, %c0_154], %358 {strides = array<i32>} : memref<8x128xf32, #tpu.memory_space<vmem>>, vector<8x128xf32>,
    %361 = arith.truncf %358 : vector<8x128xf32> to vector<8x128xbf16>
    %c0_155 = arith.constant 0 : index
    %362 = arith.index_cast %326 : i32 to index
    %c0_156 = arith.constant 0 : index
    %363 = vector.load %arg6[%c0_155, %362, %c0_156] : memref<1x64x128xbf16, #tpu.memory_space<vmem>>, vector<1x8x128xbf16>
    %364 = vector.shape_cast %363 : vector<1x8x128xbf16> to vector<8x128xbf16>
    %365 = vector.shape_cast %361 : vector<8x128xbf16> to vector<1x8x128xbf16>
    tpu.vector_store %arg6[%c0_155, %362, %c0_156], %365 {strides = array<i32>} : memref<1x64x128xbf16, #tpu.memory_space<vmem>>, vector<1x8x128xbf16>,
    %c8_i32_157 = arith.constant 8 : i32
    return
  }
  func.func @transform_0(%arg0: i32, %arg1: i32) -> (i32, i32) {
    %c1_i32 = arith.constant 1 : i32
    %0 = arith.subi %c1_i32, %arg0 : i32
    %1 = arith.muli %arg1, %0 : i32
    %c1_i32_0 = arith.constant 1 : i32
    %2 = arith.subi %c1_i32_0, %arg1 : i32
    %3 = arith.muli %2, %arg0 : i32
    %4 = arith.addi %1, %3 : i32
    %c0_i32 = arith.constant 0 : i32
    %c0_i32_1 = arith.constant 0 : i32
    return %4, %c0_i32 : i32, i32
  }
  func.func @transform_1(%arg0: i32, %arg1: i32) -> (i32, i32, i32) {
    %c0_i32 = arith.constant 0 : i32
    %c0_i32_0 = arith.constant 0 : i32
    %c0_i32_1 = arith.constant 0 : i32
    return %arg0, %c0_i32, %c0_i32_0 : i32, i32, i32
  }
  func.func @transform_2(%arg0: i32, %arg1: i32) -> (i32, i32, i32) {
    %c0_i32 = arith.constant 0 : i32
    %c0_i32_0 = arith.constant 0 : i32
    %c0_i32_1 = arith.constant 0 : i32
    return %arg0, %c0_i32, %c0_i32_0 : i32, i32, i32
  }
  func.func @transform_3(%arg0: i32, %arg1: i32) -> (i32, i32, i32) {
    %c0_i32 = arith.constant 0 : i32
    %c0_i32_0 = arith.constant 0 : i32
    %c0_i32_1 = arith.constant 0 : i32
    return %arg0, %c0_i32, %c0_i32_0 : i32, i32, i32
  }
  func.func @transform_4(%arg0: i32, %arg1: i32) -> (i32, i32, i32) {
    %c1_i32 = arith.constant 1 : i32
    %0 = arith.subi %c1_i32, %arg0 : i32
    %1 = arith.muli %arg1, %0 : i32
    %c1_i32_0 = arith.constant 1 : i32
    %2 = arith.subi %c1_i32_0, %arg1 : i32
    %3 = arith.muli %2, %arg0 : i32
    %4 = arith.addi %1, %3 : i32
    %c0_i32 = arith.constant 0 : i32
    %c0_i32_1 = arith.constant 0 : i32
    return %arg0, %4, %c0_i32 : i32, i32, i32
  }
}

module attributes {stable_mosaic.version = 11 : i64} {
  func.func @_bilstm_l2_kernel(%arg0: i32, %arg1: i32, %arg2: memref<64x128xbf16, #tpu.memory_space<vmem>>, %arg3: memref<64x128xbf16, #tpu.memory_space<vmem>>, %arg4: memref<1x128x512xbf16, #tpu.memory_space<vmem>>, %arg5: memref<1x128x512xbf16, #tpu.memory_space<vmem>>, %arg6: memref<1x1x512xf32, #tpu.memory_space<vmem>>, %arg7: memref<1x128x512xbf16, #tpu.memory_space<vmem>>, %arg8: memref<1x64x128xbf16, #tpu.memory_space<vmem>>, %arg9: memref<64x512xf32, #tpu.memory_space<vmem>>, %arg10: memref<8x128xf32, #tpu.memory_space<vmem>>, %arg11: memref<8x128xf32, #tpu.memory_space<vmem>>) attributes {dimension_semantics = [#tpu.dimension_semantics<parallel>, #tpu.dimension_semantics<arbitrary>], iteration_bounds = array<i64: 2, 2>, scalar_prefetch = 0 : i64, scratch_operands = 3 : i64, tpu.core_type = #tpu.core_type<tc>, window_params = [{transform_indices = @transform_0, window_bounds = array<i64: 64, 128>}, {transform_indices = @transform_1, window_bounds = array<i64: 64, 128>}, {transform_indices = @transform_2, window_bounds = array<i64: 1, 128, 512>}, {transform_indices = @transform_3, window_bounds = array<i64: 1, 128, 512>}, {transform_indices = @transform_4, window_bounds = array<i64: 1, 1, 512>}, {transform_indices = @transform_5, window_bounds = array<i64: 1, 128, 512>}, {transform_indices = @transform_6, window_bounds = array<i64: 1, 64, 128>}]} {
    %c0 = arith.constant 0 : index
    %c0_0 = arith.constant 0 : index
    %0 = vector.load %arg2[%c0, %c0_0] : memref<64x128xbf16, #tpu.memory_space<vmem>>, vector<64x128xbf16>
    %c0_1 = arith.constant 0 : index
    %c0_2 = arith.constant 0 : index
    %c0_3 = arith.constant 0 : index
    %1 = vector.load %arg4[%c0_1, %c0_2, %c0_3] : memref<1x128x512xbf16, #tpu.memory_space<vmem>>, vector<1x128x512xbf16>
    %2 = vector.shape_cast %1 : vector<1x128x512xbf16> to vector<128x512xbf16>
    %cst = arith.constant dense<0.000000e+00> : vector<64x512xf32>
    %3 = tpu.matmul %0, %2, %cst {dimension_numbers = #tpu.dot_dimension_numbers<[1], [0], [0], [1], [0, 0, 1, 1], [], []>} : vector<64x128xbf16>, vector<128x512xbf16>, vector<64x512xf32> -> vector<64x512xf32>
    %c0_4 = arith.constant 0 : index
    %c0_5 = arith.constant 0 : index
    %4 = vector.load %arg3[%c0_4, %c0_5] : memref<64x128xbf16, #tpu.memory_space<vmem>>, vector<64x128xbf16>
    %c0_6 = arith.constant 0 : index
    %c0_7 = arith.constant 0 : index
    %c0_8 = arith.constant 0 : index
    %5 = vector.load %arg5[%c0_6, %c0_7, %c0_8] : memref<1x128x512xbf16, #tpu.memory_space<vmem>>, vector<1x128x512xbf16>
    %6 = vector.shape_cast %5 : vector<1x128x512xbf16> to vector<128x512xbf16>
    %cst_9 = arith.constant dense<0.000000e+00> : vector<64x512xf32>
    %7 = tpu.matmul %4, %6, %cst_9 {dimension_numbers = #tpu.dot_dimension_numbers<[1], [0], [0], [1], [0, 0, 1, 1], [], []>} : vector<64x128xbf16>, vector<128x512xbf16>, vector<64x512xf32> -> vector<64x512xf32>
    %8 = arith.addf %3, %7 : vector<64x512xf32>
    %c0_10 = arith.constant 0 : index
    %c0_11 = arith.constant 0 : index
    %c0_12 = arith.constant 0 : index
    %9 = vector.load %arg6[%c0_10, %c0_11, %c0_12] : memref<1x1x512xf32, #tpu.memory_space<vmem>>, vector<1x1x512xf32>
    %10 = vector.shape_cast %9 : vector<1x1x512xf32> to vector<1x512xf32>
    %11 = vector.broadcast %10 : vector<1x512xf32> to vector<64x512xf32>
    %12 = arith.addf %8, %11 : vector<64x512xf32>
    %c0_13 = arith.constant 0 : index
    %c0_14 = arith.constant 0 : index
    %13 = vector.load %arg9[%c0_13, %c0_14] : memref<64x512xf32, #tpu.memory_space<vmem>>, vector<64x512xf32>
    tpu.vector_store %arg9[%c0_13, %c0_14], %12 {strides = array<i32>} : memref<64x512xf32, #tpu.memory_space<vmem>>, vector<64x512xf32>,
    %c0_15 = arith.constant 0 : index
    %c0_16 = arith.constant 0 : index
    %c0_17 = arith.constant 0 : index
    %14 = vector.load %arg7[%c0_15, %c0_16, %c0_17] : memref<1x128x512xbf16, #tpu.memory_space<vmem>>, vector<1x128x512xbf16>
    %15 = vector.shape_cast %14 : vector<1x128x512xbf16> to vector<128x512xbf16>
    %c0_i32 = arith.constant 0 : i32
    %16 = arith.cmpi eq, %arg1, %c0_i32 : i32
    %17 = arith.extui %16 : i1 to i32
    %c0_i32_18 = arith.constant 0 : i32
    %18 = arith.cmpi ne, %17, %c0_i32_18 : i32
    scf.if %18 {
      %cst_164 = arith.constant 0.000000e+00 : f32
      %371 = vector.broadcast %cst_164 : f32 to vector<8x128xf32>
      %c0_165 = arith.constant 0 : index
      %c0_166 = arith.constant 0 : index
      %372 = vector.load %arg10[%c0_165, %c0_166] : memref<8x128xf32, #tpu.memory_space<vmem>>, vector<8x128xf32>
      tpu.vector_store %arg10[%c0_165, %c0_166], %371 {strides = array<i32>} : memref<8x128xf32, #tpu.memory_space<vmem>>, vector<8x128xf32>,
      %cst_167 = arith.constant 0.000000e+00 : f32
      %373 = vector.broadcast %cst_167 : f32 to vector<8x128xf32>
      %c0_168 = arith.constant 0 : index
      %c0_169 = arith.constant 0 : index
      %374 = vector.load %arg11[%c0_168, %c0_169] : memref<8x128xf32, #tpu.memory_space<vmem>>, vector<8x128xf32>
      tpu.vector_store %arg11[%c0_168, %c0_169], %373 {strides = array<i32>} : memref<8x128xf32, #tpu.memory_space<vmem>>, vector<8x128xf32>,
    } else {
    }
    %c0_i32_19 = arith.constant 0 : i32
    %c0_i32_20 = arith.constant 0 : i32
    %19 = arith.cmpi eq, %arg0, %c0_i32_20 : i32
    %c7_i32 = arith.constant 7 : i32
    %20 = arith.subi %c7_i32, %c0_i32_19 : i32
    %21 = arith.select %19, %c0_i32_19, %20 : i32
    %c8_i32 = arith.constant 8 : i32
    %22 = arith.muli %21, %c8_i32 : i32
    %23 = tpu.assume_multiple %22, 8 : i32
    %24 = arith.index_cast %23 : i32 to index
    %c0_21 = arith.constant 0 : index
    %25 = vector.load %arg9[%24, %c0_21] : memref<64x512xf32, #tpu.memory_space<vmem>>, vector<8x512xf32>
    %c0_22 = arith.constant 0 : index
    %c0_23 = arith.constant 0 : index
    %26 = vector.load %arg10[%c0_22, %c0_23] : memref<8x128xf32, #tpu.memory_space<vmem>>, vector<8x128xf32>
    %27 = arith.truncf %26 : vector<8x128xf32> to vector<8x128xbf16>
    %cst_24 = arith.constant dense<0.000000e+00> : vector<8x512xf32>
    %28 = tpu.matmul %27, %15, %cst_24 {dimension_numbers = #tpu.dot_dimension_numbers<[1], [0], [0], [1], [0, 0, 1, 1], [], []>} : vector<8x128xbf16>, vector<128x512xbf16>, vector<8x512xf32> -> vector<8x512xf32>
    %29 = arith.addf %25, %28 : vector<8x512xf32>
    %30 = vector.extract_strided_slice %29 {offsets = [0, 0], sizes = [8, 128], strides = [1, 1]} : vector<8x512xf32> to vector<8x128xf32>
    %31 = arith.negf %30 : vector<8x128xf32>
    %32 = math.exp %31 : vector<8x128xf32>
    %cst_25 = arith.constant 1.000000e+00 : f32
    %33 = vector.broadcast %cst_25 : f32 to vector<8x128xf32>
    %34 = arith.addf %33, %32 : vector<8x128xf32>
    %35 = arith.divf %33, %34 : vector<8x128xf32>
    %36 = vector.extract_strided_slice %29 {offsets = [0, 128], sizes = [8, 128], strides = [1, 1]} : vector<8x512xf32> to vector<8x128xf32>
    %37 = arith.negf %36 : vector<8x128xf32>
    %38 = math.exp %37 : vector<8x128xf32>
    %cst_26 = arith.constant 1.000000e+00 : f32
    %39 = vector.broadcast %cst_26 : f32 to vector<8x128xf32>
    %40 = arith.addf %39, %38 : vector<8x128xf32>
    %41 = arith.divf %39, %40 : vector<8x128xf32>
    %42 = vector.extract_strided_slice %29 {offsets = [0, 256], sizes = [8, 128], strides = [1, 1]} : vector<8x512xf32> to vector<8x128xf32>
    %43 = math.tanh %42 : vector<8x128xf32>
    %44 = vector.extract_strided_slice %29 {offsets = [0, 384], sizes = [8, 128], strides = [1, 1]} : vector<8x512xf32> to vector<8x128xf32>
    %45 = arith.negf %44 : vector<8x128xf32>
    %46 = math.exp %45 : vector<8x128xf32>
    %cst_27 = arith.constant 1.000000e+00 : f32
    %47 = vector.broadcast %cst_27 : f32 to vector<8x128xf32>
    %48 = arith.addf %47, %46 : vector<8x128xf32>
    %49 = arith.divf %47, %48 : vector<8x128xf32>
    %c0_28 = arith.constant 0 : index
    %c0_29 = arith.constant 0 : index
    %50 = vector.load %arg11[%c0_28, %c0_29] : memref<8x128xf32, #tpu.memory_space<vmem>>, vector<8x128xf32>
    %51 = arith.mulf %41, %50 : vector<8x128xf32>
    %52 = arith.mulf %35, %43 : vector<8x128xf32>
    %53 = arith.addf %51, %52 : vector<8x128xf32>
    %54 = math.tanh %53 : vector<8x128xf32>
    %55 = arith.mulf %49, %54 : vector<8x128xf32>
    %c0_30 = arith.constant 0 : index
    %c0_31 = arith.constant 0 : index
    %56 = vector.load %arg11[%c0_30, %c0_31] : memref<8x128xf32, #tpu.memory_space<vmem>>, vector<8x128xf32>
    tpu.vector_store %arg11[%c0_30, %c0_31], %53 {strides = array<i32>} : memref<8x128xf32, #tpu.memory_space<vmem>>, vector<8x128xf32>,
    %c0_32 = arith.constant 0 : index
    %c0_33 = arith.constant 0 : index
    %57 = vector.load %arg10[%c0_32, %c0_33] : memref<8x128xf32, #tpu.memory_space<vmem>>, vector<8x128xf32>
    tpu.vector_store %arg10[%c0_32, %c0_33], %55 {strides = array<i32>} : memref<8x128xf32, #tpu.memory_space<vmem>>, vector<8x128xf32>,
    %58 = arith.truncf %55 : vector<8x128xf32> to vector<8x128xbf16>
    %c0_34 = arith.constant 0 : index
    %59 = arith.index_cast %23 : i32 to index
    %c0_35 = arith.constant 0 : index
    %60 = vector.load %arg8[%c0_34, %59, %c0_35] : memref<1x64x128xbf16, #tpu.memory_space<vmem>>, vector<1x8x128xbf16>
    %61 = vector.shape_cast %60 : vector<1x8x128xbf16> to vector<8x128xbf16>
    %62 = vector.shape_cast %58 : vector<8x128xbf16> to vector<1x8x128xbf16>
    tpu.vector_store %arg8[%c0_34, %59, %c0_35], %62 {strides = array<i32>} : memref<1x64x128xbf16, #tpu.memory_space<vmem>>, vector<1x8x128xbf16>,
    %c1_i32 = arith.constant 1 : i32
    %c0_i32_36 = arith.constant 0 : i32
    %63 = arith.cmpi eq, %arg0, %c0_i32_36 : i32
    %c7_i32_37 = arith.constant 7 : i32
    %64 = arith.subi %c7_i32_37, %c1_i32 : i32
    %65 = arith.select %63, %c1_i32, %64 : i32
    %c8_i32_38 = arith.constant 8 : i32
    %66 = arith.muli %65, %c8_i32_38 : i32
    %67 = tpu.assume_multiple %66, 8 : i32
    %68 = arith.index_cast %67 : i32 to index
    %c0_39 = arith.constant 0 : index
    %69 = vector.load %arg9[%68, %c0_39] : memref<64x512xf32, #tpu.memory_space<vmem>>, vector<8x512xf32>
    %c0_40 = arith.constant 0 : index
    %c0_41 = arith.constant 0 : index
    %70 = vector.load %arg10[%c0_40, %c0_41] : memref<8x128xf32, #tpu.memory_space<vmem>>, vector<8x128xf32>
    %71 = arith.truncf %70 : vector<8x128xf32> to vector<8x128xbf16>
    %cst_42 = arith.constant dense<0.000000e+00> : vector<8x512xf32>
    %72 = tpu.matmul %71, %15, %cst_42 {dimension_numbers = #tpu.dot_dimension_numbers<[1], [0], [0], [1], [0, 0, 1, 1], [], []>} : vector<8x128xbf16>, vector<128x512xbf16>, vector<8x512xf32> -> vector<8x512xf32>
    %73 = arith.addf %69, %72 : vector<8x512xf32>
    %74 = vector.extract_strided_slice %73 {offsets = [0, 0], sizes = [8, 128], strides = [1, 1]} : vector<8x512xf32> to vector<8x128xf32>
    %75 = arith.negf %74 : vector<8x128xf32>
    %76 = math.exp %75 : vector<8x128xf32>
    %cst_43 = arith.constant 1.000000e+00 : f32
    %77 = vector.broadcast %cst_43 : f32 to vector<8x128xf32>
    %78 = arith.addf %77, %76 : vector<8x128xf32>
    %79 = arith.divf %77, %78 : vector<8x128xf32>
    %80 = vector.extract_strided_slice %73 {offsets = [0, 128], sizes = [8, 128], strides = [1, 1]} : vector<8x512xf32> to vector<8x128xf32>
    %81 = arith.negf %80 : vector<8x128xf32>
    %82 = math.exp %81 : vector<8x128xf32>
    %cst_44 = arith.constant 1.000000e+00 : f32
    %83 = vector.broadcast %cst_44 : f32 to vector<8x128xf32>
    %84 = arith.addf %83, %82 : vector<8x128xf32>
    %85 = arith.divf %83, %84 : vector<8x128xf32>
    %86 = vector.extract_strided_slice %73 {offsets = [0, 256], sizes = [8, 128], strides = [1, 1]} : vector<8x512xf32> to vector<8x128xf32>
    %87 = math.tanh %86 : vector<8x128xf32>
    %88 = vector.extract_strided_slice %73 {offsets = [0, 384], sizes = [8, 128], strides = [1, 1]} : vector<8x512xf32> to vector<8x128xf32>
    %89 = arith.negf %88 : vector<8x128xf32>
    %90 = math.exp %89 : vector<8x128xf32>
    %cst_45 = arith.constant 1.000000e+00 : f32
    %91 = vector.broadcast %cst_45 : f32 to vector<8x128xf32>
    %92 = arith.addf %91, %90 : vector<8x128xf32>
    %93 = arith.divf %91, %92 : vector<8x128xf32>
    %c0_46 = arith.constant 0 : index
    %c0_47 = arith.constant 0 : index
    %94 = vector.load %arg11[%c0_46, %c0_47] : memref<8x128xf32, #tpu.memory_space<vmem>>, vector<8x128xf32>
    %95 = arith.mulf %85, %94 : vector<8x128xf32>
    %96 = arith.mulf %79, %87 : vector<8x128xf32>
    %97 = arith.addf %95, %96 : vector<8x128xf32>
    %98 = math.tanh %97 : vector<8x128xf32>
    %99 = arith.mulf %93, %98 : vector<8x128xf32>
    %c0_48 = arith.constant 0 : index
    %c0_49 = arith.constant 0 : index
    %100 = vector.load %arg11[%c0_48, %c0_49] : memref<8x128xf32, #tpu.memory_space<vmem>>, vector<8x128xf32>
    tpu.vector_store %arg11[%c0_48, %c0_49], %97 {strides = array<i32>} : memref<8x128xf32, #tpu.memory_space<vmem>>, vector<8x128xf32>,
    %c0_50 = arith.constant 0 : index
    %c0_51 = arith.constant 0 : index
    %101 = vector.load %arg10[%c0_50, %c0_51] : memref<8x128xf32, #tpu.memory_space<vmem>>, vector<8x128xf32>
    tpu.vector_store %arg10[%c0_50, %c0_51], %99 {strides = array<i32>} : memref<8x128xf32, #tpu.memory_space<vmem>>, vector<8x128xf32>,
    %102 = arith.truncf %99 : vector<8x128xf32> to vector<8x128xbf16>
    %c0_52 = arith.constant 0 : index
    %103 = arith.index_cast %67 : i32 to index
    %c0_53 = arith.constant 0 : index
    %104 = vector.load %arg8[%c0_52, %103, %c0_53] : memref<1x64x128xbf16, #tpu.memory_space<vmem>>, vector<1x8x128xbf16>
    %105 = vector.shape_cast %104 : vector<1x8x128xbf16> to vector<8x128xbf16>
    %106 = vector.shape_cast %102 : vector<8x128xbf16> to vector<1x8x128xbf16>
    tpu.vector_store %arg8[%c0_52, %103, %c0_53], %106 {strides = array<i32>} : memref<1x64x128xbf16, #tpu.memory_space<vmem>>, vector<1x8x128xbf16>,
    %c2_i32 = arith.constant 2 : i32
    %c0_i32_54 = arith.constant 0 : i32
    %107 = arith.cmpi eq, %arg0, %c0_i32_54 : i32
    %c7_i32_55 = arith.constant 7 : i32
    %108 = arith.subi %c7_i32_55, %c2_i32 : i32
    %109 = arith.select %107, %c2_i32, %108 : i32
    %c8_i32_56 = arith.constant 8 : i32
    %110 = arith.muli %109, %c8_i32_56 : i32
    %111 = tpu.assume_multiple %110, 8 : i32
    %112 = arith.index_cast %111 : i32 to index
    %c0_57 = arith.constant 0 : index
    %113 = vector.load %arg9[%112, %c0_57] : memref<64x512xf32, #tpu.memory_space<vmem>>, vector<8x512xf32>
    %c0_58 = arith.constant 0 : index
    %c0_59 = arith.constant 0 : index
    %114 = vector.load %arg10[%c0_58, %c0_59] : memref<8x128xf32, #tpu.memory_space<vmem>>, vector<8x128xf32>
    %115 = arith.truncf %114 : vector<8x128xf32> to vector<8x128xbf16>
    %cst_60 = arith.constant dense<0.000000e+00> : vector<8x512xf32>
    %116 = tpu.matmul %115, %15, %cst_60 {dimension_numbers = #tpu.dot_dimension_numbers<[1], [0], [0], [1], [0, 0, 1, 1], [], []>} : vector<8x128xbf16>, vector<128x512xbf16>, vector<8x512xf32> -> vector<8x512xf32>
    %117 = arith.addf %113, %116 : vector<8x512xf32>
    %118 = vector.extract_strided_slice %117 {offsets = [0, 0], sizes = [8, 128], strides = [1, 1]} : vector<8x512xf32> to vector<8x128xf32>
    %119 = arith.negf %118 : vector<8x128xf32>
    %120 = math.exp %119 : vector<8x128xf32>
    %cst_61 = arith.constant 1.000000e+00 : f32
    %121 = vector.broadcast %cst_61 : f32 to vector<8x128xf32>
    %122 = arith.addf %121, %120 : vector<8x128xf32>
    %123 = arith.divf %121, %122 : vector<8x128xf32>
    %124 = vector.extract_strided_slice %117 {offsets = [0, 128], sizes = [8, 128], strides = [1, 1]} : vector<8x512xf32> to vector<8x128xf32>
    %125 = arith.negf %124 : vector<8x128xf32>
    %126 = math.exp %125 : vector<8x128xf32>
    %cst_62 = arith.constant 1.000000e+00 : f32
    %127 = vector.broadcast %cst_62 : f32 to vector<8x128xf32>
    %128 = arith.addf %127, %126 : vector<8x128xf32>
    %129 = arith.divf %127, %128 : vector<8x128xf32>
    %130 = vector.extract_strided_slice %117 {offsets = [0, 256], sizes = [8, 128], strides = [1, 1]} : vector<8x512xf32> to vector<8x128xf32>
    %131 = math.tanh %130 : vector<8x128xf32>
    %132 = vector.extract_strided_slice %117 {offsets = [0, 384], sizes = [8, 128], strides = [1, 1]} : vector<8x512xf32> to vector<8x128xf32>
    %133 = arith.negf %132 : vector<8x128xf32>
    %134 = math.exp %133 : vector<8x128xf32>
    %cst_63 = arith.constant 1.000000e+00 : f32
    %135 = vector.broadcast %cst_63 : f32 to vector<8x128xf32>
    %136 = arith.addf %135, %134 : vector<8x128xf32>
    %137 = arith.divf %135, %136 : vector<8x128xf32>
    %c0_64 = arith.constant 0 : index
    %c0_65 = arith.constant 0 : index
    %138 = vector.load %arg11[%c0_64, %c0_65] : memref<8x128xf32, #tpu.memory_space<vmem>>, vector<8x128xf32>
    %139 = arith.mulf %129, %138 : vector<8x128xf32>
    %140 = arith.mulf %123, %131 : vector<8x128xf32>
    %141 = arith.addf %139, %140 : vector<8x128xf32>
    %142 = math.tanh %141 : vector<8x128xf32>
    %143 = arith.mulf %137, %142 : vector<8x128xf32>
    %c0_66 = arith.constant 0 : index
    %c0_67 = arith.constant 0 : index
    %144 = vector.load %arg11[%c0_66, %c0_67] : memref<8x128xf32, #tpu.memory_space<vmem>>, vector<8x128xf32>
    tpu.vector_store %arg11[%c0_66, %c0_67], %141 {strides = array<i32>} : memref<8x128xf32, #tpu.memory_space<vmem>>, vector<8x128xf32>,
    %c0_68 = arith.constant 0 : index
    %c0_69 = arith.constant 0 : index
    %145 = vector.load %arg10[%c0_68, %c0_69] : memref<8x128xf32, #tpu.memory_space<vmem>>, vector<8x128xf32>
    tpu.vector_store %arg10[%c0_68, %c0_69], %143 {strides = array<i32>} : memref<8x128xf32, #tpu.memory_space<vmem>>, vector<8x128xf32>,
    %146 = arith.truncf %143 : vector<8x128xf32> to vector<8x128xbf16>
    %c0_70 = arith.constant 0 : index
    %147 = arith.index_cast %111 : i32 to index
    %c0_71 = arith.constant 0 : index
    %148 = vector.load %arg8[%c0_70, %147, %c0_71] : memref<1x64x128xbf16, #tpu.memory_space<vmem>>, vector<1x8x128xbf16>
    %149 = vector.shape_cast %148 : vector<1x8x128xbf16> to vector<8x128xbf16>
    %150 = vector.shape_cast %146 : vector<8x128xbf16> to vector<1x8x128xbf16>
    tpu.vector_store %arg8[%c0_70, %147, %c0_71], %150 {strides = array<i32>} : memref<1x64x128xbf16, #tpu.memory_space<vmem>>, vector<1x8x128xbf16>,
    %c3_i32 = arith.constant 3 : i32
    %c0_i32_72 = arith.constant 0 : i32
    %151 = arith.cmpi eq, %arg0, %c0_i32_72 : i32
    %c7_i32_73 = arith.constant 7 : i32
    %152 = arith.subi %c7_i32_73, %c3_i32 : i32
    %153 = arith.select %151, %c3_i32, %152 : i32
    %c8_i32_74 = arith.constant 8 : i32
    %154 = arith.muli %153, %c8_i32_74 : i32
    %155 = tpu.assume_multiple %154, 8 : i32
    %156 = arith.index_cast %155 : i32 to index
    %c0_75 = arith.constant 0 : index
    %157 = vector.load %arg9[%156, %c0_75] : memref<64x512xf32, #tpu.memory_space<vmem>>, vector<8x512xf32>
    %c0_76 = arith.constant 0 : index
    %c0_77 = arith.constant 0 : index
    %158 = vector.load %arg10[%c0_76, %c0_77] : memref<8x128xf32, #tpu.memory_space<vmem>>, vector<8x128xf32>
    %159 = arith.truncf %158 : vector<8x128xf32> to vector<8x128xbf16>
    %cst_78 = arith.constant dense<0.000000e+00> : vector<8x512xf32>
    %160 = tpu.matmul %159, %15, %cst_78 {dimension_numbers = #tpu.dot_dimension_numbers<[1], [0], [0], [1], [0, 0, 1, 1], [], []>} : vector<8x128xbf16>, vector<128x512xbf16>, vector<8x512xf32> -> vector<8x512xf32>
    %161 = arith.addf %157, %160 : vector<8x512xf32>
    %162 = vector.extract_strided_slice %161 {offsets = [0, 0], sizes = [8, 128], strides = [1, 1]} : vector<8x512xf32> to vector<8x128xf32>
    %163 = arith.negf %162 : vector<8x128xf32>
    %164 = math.exp %163 : vector<8x128xf32>
    %cst_79 = arith.constant 1.000000e+00 : f32
    %165 = vector.broadcast %cst_79 : f32 to vector<8x128xf32>
    %166 = arith.addf %165, %164 : vector<8x128xf32>
    %167 = arith.divf %165, %166 : vector<8x128xf32>
    %168 = vector.extract_strided_slice %161 {offsets = [0, 128], sizes = [8, 128], strides = [1, 1]} : vector<8x512xf32> to vector<8x128xf32>
    %169 = arith.negf %168 : vector<8x128xf32>
    %170 = math.exp %169 : vector<8x128xf32>
    %cst_80 = arith.constant 1.000000e+00 : f32
    %171 = vector.broadcast %cst_80 : f32 to vector<8x128xf32>
    %172 = arith.addf %171, %170 : vector<8x128xf32>
    %173 = arith.divf %171, %172 : vector<8x128xf32>
    %174 = vector.extract_strided_slice %161 {offsets = [0, 256], sizes = [8, 128], strides = [1, 1]} : vector<8x512xf32> to vector<8x128xf32>
    %175 = math.tanh %174 : vector<8x128xf32>
    %176 = vector.extract_strided_slice %161 {offsets = [0, 384], sizes = [8, 128], strides = [1, 1]} : vector<8x512xf32> to vector<8x128xf32>
    %177 = arith.negf %176 : vector<8x128xf32>
    %178 = math.exp %177 : vector<8x128xf32>
    %cst_81 = arith.constant 1.000000e+00 : f32
    %179 = vector.broadcast %cst_81 : f32 to vector<8x128xf32>
    %180 = arith.addf %179, %178 : vector<8x128xf32>
    %181 = arith.divf %179, %180 : vector<8x128xf32>
    %c0_82 = arith.constant 0 : index
    %c0_83 = arith.constant 0 : index
    %182 = vector.load %arg11[%c0_82, %c0_83] : memref<8x128xf32, #tpu.memory_space<vmem>>, vector<8x128xf32>
    %183 = arith.mulf %173, %182 : vector<8x128xf32>
    %184 = arith.mulf %167, %175 : vector<8x128xf32>
    %185 = arith.addf %183, %184 : vector<8x128xf32>
    %186 = math.tanh %185 : vector<8x128xf32>
    %187 = arith.mulf %181, %186 : vector<8x128xf32>
    %c0_84 = arith.constant 0 : index
    %c0_85 = arith.constant 0 : index
    %188 = vector.load %arg11[%c0_84, %c0_85] : memref<8x128xf32, #tpu.memory_space<vmem>>, vector<8x128xf32>
    tpu.vector_store %arg11[%c0_84, %c0_85], %185 {strides = array<i32>} : memref<8x128xf32, #tpu.memory_space<vmem>>, vector<8x128xf32>,
    %c0_86 = arith.constant 0 : index
    %c0_87 = arith.constant 0 : index
    %189 = vector.load %arg10[%c0_86, %c0_87] : memref<8x128xf32, #tpu.memory_space<vmem>>, vector<8x128xf32>
    tpu.vector_store %arg10[%c0_86, %c0_87], %187 {strides = array<i32>} : memref<8x128xf32, #tpu.memory_space<vmem>>, vector<8x128xf32>,
    %190 = arith.truncf %187 : vector<8x128xf32> to vector<8x128xbf16>
    %c0_88 = arith.constant 0 : index
    %191 = arith.index_cast %155 : i32 to index
    %c0_89 = arith.constant 0 : index
    %192 = vector.load %arg8[%c0_88, %191, %c0_89] : memref<1x64x128xbf16, #tpu.memory_space<vmem>>, vector<1x8x128xbf16>
    %193 = vector.shape_cast %192 : vector<1x8x128xbf16> to vector<8x128xbf16>
    %194 = vector.shape_cast %190 : vector<8x128xbf16> to vector<1x8x128xbf16>
    tpu.vector_store %arg8[%c0_88, %191, %c0_89], %194 {strides = array<i32>} : memref<1x64x128xbf16, #tpu.memory_space<vmem>>, vector<1x8x128xbf16>,
    %c4_i32 = arith.constant 4 : i32
    %c0_i32_90 = arith.constant 0 : i32
    %195 = arith.cmpi eq, %arg0, %c0_i32_90 : i32
    %c7_i32_91 = arith.constant 7 : i32
    %196 = arith.subi %c7_i32_91, %c4_i32 : i32
    %197 = arith.select %195, %c4_i32, %196 : i32
    %c8_i32_92 = arith.constant 8 : i32
    %198 = arith.muli %197, %c8_i32_92 : i32
    %199 = tpu.assume_multiple %198, 8 : i32
    %200 = arith.index_cast %199 : i32 to index
    %c0_93 = arith.constant 0 : index
    %201 = vector.load %arg9[%200, %c0_93] : memref<64x512xf32, #tpu.memory_space<vmem>>, vector<8x512xf32>
    %c0_94 = arith.constant 0 : index
    %c0_95 = arith.constant 0 : index
    %202 = vector.load %arg10[%c0_94, %c0_95] : memref<8x128xf32, #tpu.memory_space<vmem>>, vector<8x128xf32>
    %203 = arith.truncf %202 : vector<8x128xf32> to vector<8x128xbf16>
    %cst_96 = arith.constant dense<0.000000e+00> : vector<8x512xf32>
    %204 = tpu.matmul %203, %15, %cst_96 {dimension_numbers = #tpu.dot_dimension_numbers<[1], [0], [0], [1], [0, 0, 1, 1], [], []>} : vector<8x128xbf16>, vector<128x512xbf16>, vector<8x512xf32> -> vector<8x512xf32>
    %205 = arith.addf %201, %204 : vector<8x512xf32>
    %206 = vector.extract_strided_slice %205 {offsets = [0, 0], sizes = [8, 128], strides = [1, 1]} : vector<8x512xf32> to vector<8x128xf32>
    %207 = arith.negf %206 : vector<8x128xf32>
    %208 = math.exp %207 : vector<8x128xf32>
    %cst_97 = arith.constant 1.000000e+00 : f32
    %209 = vector.broadcast %cst_97 : f32 to vector<8x128xf32>
    %210 = arith.addf %209, %208 : vector<8x128xf32>
    %211 = arith.divf %209, %210 : vector<8x128xf32>
    %212 = vector.extract_strided_slice %205 {offsets = [0, 128], sizes = [8, 128], strides = [1, 1]} : vector<8x512xf32> to vector<8x128xf32>
    %213 = arith.negf %212 : vector<8x128xf32>
    %214 = math.exp %213 : vector<8x128xf32>
    %cst_98 = arith.constant 1.000000e+00 : f32
    %215 = vector.broadcast %cst_98 : f32 to vector<8x128xf32>
    %216 = arith.addf %215, %214 : vector<8x128xf32>
    %217 = arith.divf %215, %216 : vector<8x128xf32>
    %218 = vector.extract_strided_slice %205 {offsets = [0, 256], sizes = [8, 128], strides = [1, 1]} : vector<8x512xf32> to vector<8x128xf32>
    %219 = math.tanh %218 : vector<8x128xf32>
    %220 = vector.extract_strided_slice %205 {offsets = [0, 384], sizes = [8, 128], strides = [1, 1]} : vector<8x512xf32> to vector<8x128xf32>
    %221 = arith.negf %220 : vector<8x128xf32>
    %222 = math.exp %221 : vector<8x128xf32>
    %cst_99 = arith.constant 1.000000e+00 : f32
    %223 = vector.broadcast %cst_99 : f32 to vector<8x128xf32>
    %224 = arith.addf %223, %222 : vector<8x128xf32>
    %225 = arith.divf %223, %224 : vector<8x128xf32>
    %c0_100 = arith.constant 0 : index
    %c0_101 = arith.constant 0 : index
    %226 = vector.load %arg11[%c0_100, %c0_101] : memref<8x128xf32, #tpu.memory_space<vmem>>, vector<8x128xf32>
    %227 = arith.mulf %217, %226 : vector<8x128xf32>
    %228 = arith.mulf %211, %219 : vector<8x128xf32>
    %229 = arith.addf %227, %228 : vector<8x128xf32>
    %230 = math.tanh %229 : vector<8x128xf32>
    %231 = arith.mulf %225, %230 : vector<8x128xf32>
    %c0_102 = arith.constant 0 : index
    %c0_103 = arith.constant 0 : index
    %232 = vector.load %arg11[%c0_102, %c0_103] : memref<8x128xf32, #tpu.memory_space<vmem>>, vector<8x128xf32>
    tpu.vector_store %arg11[%c0_102, %c0_103], %229 {strides = array<i32>} : memref<8x128xf32, #tpu.memory_space<vmem>>, vector<8x128xf32>,
    %c0_104 = arith.constant 0 : index
    %c0_105 = arith.constant 0 : index
    %233 = vector.load %arg10[%c0_104, %c0_105] : memref<8x128xf32, #tpu.memory_space<vmem>>, vector<8x128xf32>
    tpu.vector_store %arg10[%c0_104, %c0_105], %231 {strides = array<i32>} : memref<8x128xf32, #tpu.memory_space<vmem>>, vector<8x128xf32>,
    %234 = arith.truncf %231 : vector<8x128xf32> to vector<8x128xbf16>
    %c0_106 = arith.constant 0 : index
    %235 = arith.index_cast %199 : i32 to index
    %c0_107 = arith.constant 0 : index
    %236 = vector.load %arg8[%c0_106, %235, %c0_107] : memref<1x64x128xbf16, #tpu.memory_space<vmem>>, vector<1x8x128xbf16>
    %237 = vector.shape_cast %236 : vector<1x8x128xbf16> to vector<8x128xbf16>
    %238 = vector.shape_cast %234 : vector<8x128xbf16> to vector<1x8x128xbf16>
    tpu.vector_store %arg8[%c0_106, %235, %c0_107], %238 {strides = array<i32>} : memref<1x64x128xbf16, #tpu.memory_space<vmem>>, vector<1x8x128xbf16>,
    %c5_i32 = arith.constant 5 : i32
    %c0_i32_108 = arith.constant 0 : i32
    %239 = arith.cmpi eq, %arg0, %c0_i32_108 : i32
    %c7_i32_109 = arith.constant 7 : i32
    %240 = arith.subi %c7_i32_109, %c5_i32 : i32
    %241 = arith.select %239, %c5_i32, %240 : i32
    %c8_i32_110 = arith.constant 8 : i32
    %242 = arith.muli %241, %c8_i32_110 : i32
    %243 = tpu.assume_multiple %242, 8 : i32
    %244 = arith.index_cast %243 : i32 to index
    %c0_111 = arith.constant 0 : index
    %245 = vector.load %arg9[%244, %c0_111] : memref<64x512xf32, #tpu.memory_space<vmem>>, vector<8x512xf32>
    %c0_112 = arith.constant 0 : index
    %c0_113 = arith.constant 0 : index
    %246 = vector.load %arg10[%c0_112, %c0_113] : memref<8x128xf32, #tpu.memory_space<vmem>>, vector<8x128xf32>
    %247 = arith.truncf %246 : vector<8x128xf32> to vector<8x128xbf16>
    %cst_114 = arith.constant dense<0.000000e+00> : vector<8x512xf32>
    %248 = tpu.matmul %247, %15, %cst_114 {dimension_numbers = #tpu.dot_dimension_numbers<[1], [0], [0], [1], [0, 0, 1, 1], [], []>} : vector<8x128xbf16>, vector<128x512xbf16>, vector<8x512xf32> -> vector<8x512xf32>
    %249 = arith.addf %245, %248 : vector<8x512xf32>
    %250 = vector.extract_strided_slice %249 {offsets = [0, 0], sizes = [8, 128], strides = [1, 1]} : vector<8x512xf32> to vector<8x128xf32>
    %251 = arith.negf %250 : vector<8x128xf32>
    %252 = math.exp %251 : vector<8x128xf32>
    %cst_115 = arith.constant 1.000000e+00 : f32
    %253 = vector.broadcast %cst_115 : f32 to vector<8x128xf32>
    %254 = arith.addf %253, %252 : vector<8x128xf32>
    %255 = arith.divf %253, %254 : vector<8x128xf32>
    %256 = vector.extract_strided_slice %249 {offsets = [0, 128], sizes = [8, 128], strides = [1, 1]} : vector<8x512xf32> to vector<8x128xf32>
    %257 = arith.negf %256 : vector<8x128xf32>
    %258 = math.exp %257 : vector<8x128xf32>
    %cst_116 = arith.constant 1.000000e+00 : f32
    %259 = vector.broadcast %cst_116 : f32 to vector<8x128xf32>
    %260 = arith.addf %259, %258 : vector<8x128xf32>
    %261 = arith.divf %259, %260 : vector<8x128xf32>
    %262 = vector.extract_strided_slice %249 {offsets = [0, 256], sizes = [8, 128], strides = [1, 1]} : vector<8x512xf32> to vector<8x128xf32>
    %263 = math.tanh %262 : vector<8x128xf32>
    %264 = vector.extract_strided_slice %249 {offsets = [0, 384], sizes = [8, 128], strides = [1, 1]} : vector<8x512xf32> to vector<8x128xf32>
    %265 = arith.negf %264 : vector<8x128xf32>
    %266 = math.exp %265 : vector<8x128xf32>
    %cst_117 = arith.constant 1.000000e+00 : f32
    %267 = vector.broadcast %cst_117 : f32 to vector<8x128xf32>
    %268 = arith.addf %267, %266 : vector<8x128xf32>
    %269 = arith.divf %267, %268 : vector<8x128xf32>
    %c0_118 = arith.constant 0 : index
    %c0_119 = arith.constant 0 : index
    %270 = vector.load %arg11[%c0_118, %c0_119] : memref<8x128xf32, #tpu.memory_space<vmem>>, vector<8x128xf32>
    %271 = arith.mulf %261, %270 : vector<8x128xf32>
    %272 = arith.mulf %255, %263 : vector<8x128xf32>
    %273 = arith.addf %271, %272 : vector<8x128xf32>
    %274 = math.tanh %273 : vector<8x128xf32>
    %275 = arith.mulf %269, %274 : vector<8x128xf32>
    %c0_120 = arith.constant 0 : index
    %c0_121 = arith.constant 0 : index
    %276 = vector.load %arg11[%c0_120, %c0_121] : memref<8x128xf32, #tpu.memory_space<vmem>>, vector<8x128xf32>
    tpu.vector_store %arg11[%c0_120, %c0_121], %273 {strides = array<i32>} : memref<8x128xf32, #tpu.memory_space<vmem>>, vector<8x128xf32>,
    %c0_122 = arith.constant 0 : index
    %c0_123 = arith.constant 0 : index
    %277 = vector.load %arg10[%c0_122, %c0_123] : memref<8x128xf32, #tpu.memory_space<vmem>>, vector<8x128xf32>
    tpu.vector_store %arg10[%c0_122, %c0_123], %275 {strides = array<i32>} : memref<8x128xf32, #tpu.memory_space<vmem>>, vector<8x128xf32>,
    %278 = arith.truncf %275 : vector<8x128xf32> to vector<8x128xbf16>
    %c0_124 = arith.constant 0 : index
    %279 = arith.index_cast %243 : i32 to index
    %c0_125 = arith.constant 0 : index
    %280 = vector.load %arg8[%c0_124, %279, %c0_125] : memref<1x64x128xbf16, #tpu.memory_space<vmem>>, vector<1x8x128xbf16>
    %281 = vector.shape_cast %280 : vector<1x8x128xbf16> to vector<8x128xbf16>
    %282 = vector.shape_cast %278 : vector<8x128xbf16> to vector<1x8x128xbf16>
    tpu.vector_store %arg8[%c0_124, %279, %c0_125], %282 {strides = array<i32>} : memref<1x64x128xbf16, #tpu.memory_space<vmem>>, vector<1x8x128xbf16>,
    %c6_i32 = arith.constant 6 : i32
    %c0_i32_126 = arith.constant 0 : i32
    %283 = arith.cmpi eq, %arg0, %c0_i32_126 : i32
    %c7_i32_127 = arith.constant 7 : i32
    %284 = arith.subi %c7_i32_127, %c6_i32 : i32
    %285 = arith.select %283, %c6_i32, %284 : i32
    %c8_i32_128 = arith.constant 8 : i32
    %286 = arith.muli %285, %c8_i32_128 : i32
    %287 = tpu.assume_multiple %286, 8 : i32
    %288 = arith.index_cast %287 : i32 to index
    %c0_129 = arith.constant 0 : index
    %289 = vector.load %arg9[%288, %c0_129] : memref<64x512xf32, #tpu.memory_space<vmem>>, vector<8x512xf32>
    %c0_130 = arith.constant 0 : index
    %c0_131 = arith.constant 0 : index
    %290 = vector.load %arg10[%c0_130, %c0_131] : memref<8x128xf32, #tpu.memory_space<vmem>>, vector<8x128xf32>
    %291 = arith.truncf %290 : vector<8x128xf32> to vector<8x128xbf16>
    %cst_132 = arith.constant dense<0.000000e+00> : vector<8x512xf32>
    %292 = tpu.matmul %291, %15, %cst_132 {dimension_numbers = #tpu.dot_dimension_numbers<[1], [0], [0], [1], [0, 0, 1, 1], [], []>} : vector<8x128xbf16>, vector<128x512xbf16>, vector<8x512xf32> -> vector<8x512xf32>
    %293 = arith.addf %289, %292 : vector<8x512xf32>
    %294 = vector.extract_strided_slice %293 {offsets = [0, 0], sizes = [8, 128], strides = [1, 1]} : vector<8x512xf32> to vector<8x128xf32>
    %295 = arith.negf %294 : vector<8x128xf32>
    %296 = math.exp %295 : vector<8x128xf32>
    %cst_133 = arith.constant 1.000000e+00 : f32
    %297 = vector.broadcast %cst_133 : f32 to vector<8x128xf32>
    %298 = arith.addf %297, %296 : vector<8x128xf32>
    %299 = arith.divf %297, %298 : vector<8x128xf32>
    %300 = vector.extract_strided_slice %293 {offsets = [0, 128], sizes = [8, 128], strides = [1, 1]} : vector<8x512xf32> to vector<8x128xf32>
    %301 = arith.negf %300 : vector<8x128xf32>
    %302 = math.exp %301 : vector<8x128xf32>
    %cst_134 = arith.constant 1.000000e+00 : f32
    %303 = vector.broadcast %cst_134 : f32 to vector<8x128xf32>
    %304 = arith.addf %303, %302 : vector<8x128xf32>
    %305 = arith.divf %303, %304 : vector<8x128xf32>
    %306 = vector.extract_strided_slice %293 {offsets = [0, 256], sizes = [8, 128], strides = [1, 1]} : vector<8x512xf32> to vector<8x128xf32>
    %307 = math.tanh %306 : vector<8x128xf32>
    %308 = vector.extract_strided_slice %293 {offsets = [0, 384], sizes = [8, 128], strides = [1, 1]} : vector<8x512xf32> to vector<8x128xf32>
    %309 = arith.negf %308 : vector<8x128xf32>
    %310 = math.exp %309 : vector<8x128xf32>
    %cst_135 = arith.constant 1.000000e+00 : f32
    %311 = vector.broadcast %cst_135 : f32 to vector<8x128xf32>
    %312 = arith.addf %311, %310 : vector<8x128xf32>
    %313 = arith.divf %311, %312 : vector<8x128xf32>
    %c0_136 = arith.constant 0 : index
    %c0_137 = arith.constant 0 : index
    %314 = vector.load %arg11[%c0_136, %c0_137] : memref<8x128xf32, #tpu.memory_space<vmem>>, vector<8x128xf32>
    %315 = arith.mulf %305, %314 : vector<8x128xf32>
    %316 = arith.mulf %299, %307 : vector<8x128xf32>
    %317 = arith.addf %315, %316 : vector<8x128xf32>
    %318 = math.tanh %317 : vector<8x128xf32>
    %319 = arith.mulf %313, %318 : vector<8x128xf32>
    %c0_138 = arith.constant 0 : index
    %c0_139 = arith.constant 0 : index
    %320 = vector.load %arg11[%c0_138, %c0_139] : memref<8x128xf32, #tpu.memory_space<vmem>>, vector<8x128xf32>
    tpu.vector_store %arg11[%c0_138, %c0_139], %317 {strides = array<i32>} : memref<8x128xf32, #tpu.memory_space<vmem>>, vector<8x128xf32>,
    %c0_140 = arith.constant 0 : index
    %c0_141 = arith.constant 0 : index
    %321 = vector.load %arg10[%c0_140, %c0_141] : memref<8x128xf32, #tpu.memory_space<vmem>>, vector<8x128xf32>
    tpu.vector_store %arg10[%c0_140, %c0_141], %319 {strides = array<i32>} : memref<8x128xf32, #tpu.memory_space<vmem>>, vector<8x128xf32>,
    %322 = arith.truncf %319 : vector<8x128xf32> to vector<8x128xbf16>
    %c0_142 = arith.constant 0 : index
    %323 = arith.index_cast %287 : i32 to index
    %c0_143 = arith.constant 0 : index
    %324 = vector.load %arg8[%c0_142, %323, %c0_143] : memref<1x64x128xbf16, #tpu.memory_space<vmem>>, vector<1x8x128xbf16>
    %325 = vector.shape_cast %324 : vector<1x8x128xbf16> to vector<8x128xbf16>
    %326 = vector.shape_cast %322 : vector<8x128xbf16> to vector<1x8x128xbf16>
    tpu.vector_store %arg8[%c0_142, %323, %c0_143], %326 {strides = array<i32>} : memref<1x64x128xbf16, #tpu.memory_space<vmem>>, vector<1x8x128xbf16>,
    %c7_i32_144 = arith.constant 7 : i32
    %c0_i32_145 = arith.constant 0 : i32
    %327 = arith.cmpi eq, %arg0, %c0_i32_145 : i32
    %c7_i32_146 = arith.constant 7 : i32
    %328 = arith.subi %c7_i32_146, %c7_i32_144 : i32
    %329 = arith.select %327, %c7_i32_144, %328 : i32
    %c8_i32_147 = arith.constant 8 : i32
    %330 = arith.muli %329, %c8_i32_147 : i32
    %331 = tpu.assume_multiple %330, 8 : i32
    %332 = arith.index_cast %331 : i32 to index
    %c0_148 = arith.constant 0 : index
    %333 = vector.load %arg9[%332, %c0_148] : memref<64x512xf32, #tpu.memory_space<vmem>>, vector<8x512xf32>
    %c0_149 = arith.constant 0 : index
    %c0_150 = arith.constant 0 : index
    %334 = vector.load %arg10[%c0_149, %c0_150] : memref<8x128xf32, #tpu.memory_space<vmem>>, vector<8x128xf32>
    %335 = arith.truncf %334 : vector<8x128xf32> to vector<8x128xbf16>
    %cst_151 = arith.constant dense<0.000000e+00> : vector<8x512xf32>
    %336 = tpu.matmul %335, %15, %cst_151 {dimension_numbers = #tpu.dot_dimension_numbers<[1], [0], [0], [1], [0, 0, 1, 1], [], []>} : vector<8x128xbf16>, vector<128x512xbf16>, vector<8x512xf32> -> vector<8x512xf32>
    %337 = arith.addf %333, %336 : vector<8x512xf32>
    %338 = vector.extract_strided_slice %337 {offsets = [0, 0], sizes = [8, 128], strides = [1, 1]} : vector<8x512xf32> to vector<8x128xf32>
    %339 = arith.negf %338 : vector<8x128xf32>
    %340 = math.exp %339 : vector<8x128xf32>
    %cst_152 = arith.constant 1.000000e+00 : f32
    %341 = vector.broadcast %cst_152 : f32 to vector<8x128xf32>
    %342 = arith.addf %341, %340 : vector<8x128xf32>
    %343 = arith.divf %341, %342 : vector<8x128xf32>
    %344 = vector.extract_strided_slice %337 {offsets = [0, 128], sizes = [8, 128], strides = [1, 1]} : vector<8x512xf32> to vector<8x128xf32>
    %345 = arith.negf %344 : vector<8x128xf32>
    %346 = math.exp %345 : vector<8x128xf32>
    %cst_153 = arith.constant 1.000000e+00 : f32
    %347 = vector.broadcast %cst_153 : f32 to vector<8x128xf32>
    %348 = arith.addf %347, %346 : vector<8x128xf32>
    %349 = arith.divf %347, %348 : vector<8x128xf32>
    %350 = vector.extract_strided_slice %337 {offsets = [0, 256], sizes = [8, 128], strides = [1, 1]} : vector<8x512xf32> to vector<8x128xf32>
    %351 = math.tanh %350 : vector<8x128xf32>
    %352 = vector.extract_strided_slice %337 {offsets = [0, 384], sizes = [8, 128], strides = [1, 1]} : vector<8x512xf32> to vector<8x128xf32>
    %353 = arith.negf %352 : vector<8x128xf32>
    %354 = math.exp %353 : vector<8x128xf32>
    %cst_154 = arith.constant 1.000000e+00 : f32
    %355 = vector.broadcast %cst_154 : f32 to vector<8x128xf32>
    %356 = arith.addf %355, %354 : vector<8x128xf32>
    %357 = arith.divf %355, %356 : vector<8x128xf32>
    %c0_155 = arith.constant 0 : index
    %c0_156 = arith.constant 0 : index
    %358 = vector.load %arg11[%c0_155, %c0_156] : memref<8x128xf32, #tpu.memory_space<vmem>>, vector<8x128xf32>
    %359 = arith.mulf %349, %358 : vector<8x128xf32>
    %360 = arith.mulf %343, %351 : vector<8x128xf32>
    %361 = arith.addf %359, %360 : vector<8x128xf32>
    %362 = math.tanh %361 : vector<8x128xf32>
    %363 = arith.mulf %357, %362 : vector<8x128xf32>
    %c0_157 = arith.constant 0 : index
    %c0_158 = arith.constant 0 : index
    %364 = vector.load %arg11[%c0_157, %c0_158] : memref<8x128xf32, #tpu.memory_space<vmem>>, vector<8x128xf32>
    tpu.vector_store %arg11[%c0_157, %c0_158], %361 {strides = array<i32>} : memref<8x128xf32, #tpu.memory_space<vmem>>, vector<8x128xf32>,
    %c0_159 = arith.constant 0 : index
    %c0_160 = arith.constant 0 : index
    %365 = vector.load %arg10[%c0_159, %c0_160] : memref<8x128xf32, #tpu.memory_space<vmem>>, vector<8x128xf32>
    tpu.vector_store %arg10[%c0_159, %c0_160], %363 {strides = array<i32>} : memref<8x128xf32, #tpu.memory_space<vmem>>, vector<8x128xf32>,
    %366 = arith.truncf %363 : vector<8x128xf32> to vector<8x128xbf16>
    %c0_161 = arith.constant 0 : index
    %367 = arith.index_cast %331 : i32 to index
    %c0_162 = arith.constant 0 : index
    %368 = vector.load %arg8[%c0_161, %367, %c0_162] : memref<1x64x128xbf16, #tpu.memory_space<vmem>>, vector<1x8x128xbf16>
    %369 = vector.shape_cast %368 : vector<1x8x128xbf16> to vector<8x128xbf16>
    %370 = vector.shape_cast %366 : vector<8x128xbf16> to vector<1x8x128xbf16>
    tpu.vector_store %arg8[%c0_161, %367, %c0_162], %370 {strides = array<i32>} : memref<1x64x128xbf16, #tpu.memory_space<vmem>>, vector<1x8x128xbf16>,
    %c8_i32_163 = arith.constant 8 : i32
    return
  }
  func.func @transform_0(%arg0: i32, %arg1: i32) -> (i32, i32) {
    %c1_i32 = arith.constant 1 : i32
    %0 = arith.subi %c1_i32, %arg0 : i32
    %1 = arith.muli %arg1, %0 : i32
    %c1_i32_0 = arith.constant 1 : i32
    %2 = arith.subi %c1_i32_0, %arg1 : i32
    %3 = arith.muli %2, %arg0 : i32
    %4 = arith.addi %1, %3 : i32
    %c0_i32 = arith.constant 0 : i32
    %c0_i32_1 = arith.constant 0 : i32
    return %4, %c0_i32 : i32, i32
  }
  func.func @transform_1(%arg0: i32, %arg1: i32) -> (i32, i32) {
    %c1_i32 = arith.constant 1 : i32
    %0 = arith.subi %c1_i32, %arg0 : i32
    %1 = arith.muli %arg1, %0 : i32
    %c1_i32_0 = arith.constant 1 : i32
    %2 = arith.subi %c1_i32_0, %arg1 : i32
    %3 = arith.muli %2, %arg0 : i32
    %4 = arith.addi %1, %3 : i32
    %c0_i32 = arith.constant 0 : i32
    %c0_i32_1 = arith.constant 0 : i32
    return %4, %c0_i32 : i32, i32
  }
  func.func @transform_2(%arg0: i32, %arg1: i32) -> (i32, i32, i32) {
    %c0_i32 = arith.constant 0 : i32
    %c0_i32_0 = arith.constant 0 : i32
    %c0_i32_1 = arith.constant 0 : i32
    return %arg0, %c0_i32, %c0_i32_0 : i32, i32, i32
  }
  func.func @transform_3(%arg0: i32, %arg1: i32) -> (i32, i32, i32) {
    %c0_i32 = arith.constant 0 : i32
    %c0_i32_0 = arith.constant 0 : i32
    %c0_i32_1 = arith.constant 0 : i32
    return %arg0, %c0_i32, %c0_i32_0 : i32, i32, i32
  }
  func.func @transform_4(%arg0: i32, %arg1: i32) -> (i32, i32, i32) {
    %c0_i32 = arith.constant 0 : i32
    %c0_i32_0 = arith.constant 0 : i32
    %c0_i32_1 = arith.constant 0 : i32
    return %arg0, %c0_i32, %c0_i32_0 : i32, i32, i32
  }
  func.func @transform_5(%arg0: i32, %arg1: i32) -> (i32, i32, i32) {
    %c0_i32 = arith.constant 0 : i32
    %c0_i32_0 = arith.constant 0 : i32
    %c0_i32_1 = arith.constant 0 : i32
    return %arg0, %c0_i32, %c0_i32_0 : i32, i32, i32
  }
  func.func @transform_6(%arg0: i32, %arg1: i32) -> (i32, i32, i32) {
    %c1_i32 = arith.constant 1 : i32
    %0 = arith.subi %c1_i32, %arg0 : i32
    %1 = arith.muli %arg1, %0 : i32
    %c1_i32_0 = arith.constant 1 : i32
    %2 = arith.subi %c1_i32_0, %arg1 : i32
    %3 = arith.muli %2, %arg0 : i32
    %4 = arith.addi %1, %3 : i32
    %c0_i32 = arith.constant 0 : i32
    %c0_i32_1 = arith.constant 0 : i32
    return %arg0, %4, %c0_i32 : i32, i32, i32
  }
}

</mosaic_0001>

<bundles_post_ra>
// kernel: bert_bilstm_crf_forward.5
= control target key start
LH: loop header
LB: loop body
LE: loop exit
PB: predicated region body
PF: predicated region fallthrough
CT: control target
= control target key end

     0   :  { %s886_s3 = inlined_call_operand.vmem [shape: bf16[128,128], index: 3, kind: input, shape index: {}]   ;;  %s887_s2 = inlined_call_operand.vmem [shape: bf16[128,128], index: 2, kind: input, shape index: {}]   ;;  %s888_s1 = inlined_call_operand.vmem [shape: bf16[128,128], index: 1, kind: input, shape index: {}]   ;;  %s889_s0 = inlined_call_operand.vmem [shape: bf16[128,128], index: 0, kind: input, shape index: {}]   ;;  %s890_s4 = inlined_call_operand.vmem [shape: f32[1,128], index: 4, kind: input, shape index: {}]   ;;  %s891_s5 = inlined_call_operand.vmem [shape: f32[128,128], index: 5, kind: output, shape index: {}]  }
   0x1   :  { %v659_v0 = vld [vmem:[%s886_s3] sm:$0xff]   ;;  %v661_v2 = vld [vmem:[%s886_s3 + $0x8] sm:$0xff]   ;;  %v663_v4 = vld [vmem:[%s886_s3 + $0x10] sm:$0xff]  }
   0x2   :  { %v660_v1 = vld [vmem:[%s887_s2] sm:$0xff]   ;;  %579 = vmatprep.subr.bf16.mxu1 %v659_v0  ;;  %v662_v3 = vld [vmem:[%s887_s2 + $0x8] sm:$0xff]   ;;  %v664_v5 = vld [vmem:[%s887_s2 + $0x10] sm:$0xff]  }
   0x3   :  { %611 = vmatprep.subr.bf16.mxu0 %v660_v1  ;;  %580 = vmatpush3.bf16.msra.mxu1 %v659_v0  ;;  %v665_v6 = vld [vmem:[%s886_s3 + $0x18] sm:$0xff]   ;;  %v667_v8 = vld [vmem:[%s886_s3 + $0x20] sm:$0xff]   ;;  %v669_v10 = vld [vmem:[%s886_s3 + $0x28] sm:$0xff]  }
   0x4   :  { %612 = vmatpush3.bf16.msra.mxu0 %v660_v1  ;;  %581 = vmatprep.subr.bf16.mxu1 %v661_v2  ;;  %v666_v7 = vld [vmem:[%s887_s2 + $0x18] sm:$0xff]   ;;  %v668_v9 = vld [vmem:[%s887_s2 + $0x20] sm:$0xff]   ;;  %v670_v11 = vld [vmem:[%s887_s2 + $0x28] sm:$0xff]  }
   0x5   :  { %613 = vmatprep.subr.bf16.mxu0 %v662_v3  ;;  %v675_v12 = vld [vmem:[%s888_s1] sm:$0xff]   ;;  %v671_v14 = vld [vmem:[%s886_s3 + $0x30] sm:$0xff]   ;;  %v673_v16 = vld [vmem:[%s886_s3 + $0x38] sm:$0xff]  }
   0x6   :  { %v676_v13 = vld [vmem:[%s889_s0] sm:$0xff]   ;;  %595 = vmatprep.mubr.bf16.mxu1 %v675_v12  ;;  %v672_v15 = vld [vmem:[%s887_s2 + $0x30] sm:$0xff]   ;;  %v674_v17 = vld [vmem:[%s887_s2 + $0x38] sm:$0xff]  }
   0x7   :  { %582 = vmatpush3.bf16.msra.mxu1 %v661_v2  ;;  %627 = vmatprep.mubr.bf16.mxu0 %v676_v13  ;;  %v677_v18 = vld [vmem:[%s888_s1 + $0x8] sm:$0xff]   ;;  %v679_v20 = vld [vmem:[%s888_s1 + $0x10] sm:$0xff]   ;;  %v681_v22 = vld [vmem:[%s888_s1 + $0x18] sm:$0xff]  }
   0x8   :  { %614 = vmatpush3.bf16.msra.mxu0 %v662_v3  ;;  %583 = vmatprep.subr.bf16.mxu1 %v663_v4  ;;  %v678_v19 = vld [vmem:[%s889_s0 + $0x8] sm:$0xff]   ;;  %v680_v21 = vld [vmem:[%s889_s0 + $0x10] sm:$0xff]   ;;  %v682_v23 = vld [vmem:[%s889_s0 + $0x18] sm:$0xff]  }
   0x9   :  { %615 = vmatprep.subr.bf16.mxu0 %v664_v5  ;;  %v683_v24 = vld [vmem:[%s888_s1 + $0x20] sm:$0xff]   ;;  %v685_v26 = vld [vmem:[%s888_s1 + $0x28] sm:$0xff]   ;;  %v687_v28 = vld [vmem:[%s888_s1 + $0x30] sm:$0xff]  }
   0xa   :  { %v684_v25 = vld [vmem:[%s889_s0 + $0x20] sm:$0xff]   ;;  %v686_v27 = vld [vmem:[%s889_s0 + $0x28] sm:$0xff]   ;;  %v688_v29 = vld [vmem:[%s889_s0 + $0x30] sm:$0xff]  }
   0xb   :  { %584 = vmatpush3.bf16.msra.mxu1 %v663_v4  ;;  %v689_v30 = vld [vmem:[%s888_s1 + $0x38] sm:$0xff]   ;;  %v820_v34 = vld [vmem:[%s890_s4] ss:$0 sm:$0xff] }
   0xc   :  { %616 = vmatpush3.bf16.msra.mxu0 %v664_v5  ;;  %585 = vmatprep.subr.bf16.mxu1 %v665_v6  ;;  %v690_v31 = vld [vmem:[%s889_s0 + $0x38] sm:$0xff]  }
   0xd   :  { %617 = vmatprep.subr.bf16.mxu0 %v666_v7 }
   0xf   :  { %586 = vmatpush3.bf16.msra.mxu1 %v665_v6 }
  0x10   :  { %618 = vmatpush3.bf16.msra.mxu0 %v666_v7  ;;  %587 = vmatprep.subr.bf16.mxu1 %v667_v8 }
  0x11   :  { %619 = vmatprep.subr.bf16.mxu0 %v668_v9 }
  0x13   :  { %588 = vmatpush3.bf16.msra.mxu1 %v667_v8 }
  0x14   :  { %620 = vmatpush3.bf16.msra.mxu0 %v668_v9  ;;  %589 = vmatprep.subr.bf16.mxu1 %v669_v10 }
  0x15   :  { %621 = vmatprep.subr.bf16.mxu0 %v670_v11 }
  0x17   :  { %590 = vmatpush3.bf16.msra.mxu1 %v669_v10 }
  0x18   :  { %622 = vmatpush3.bf16.msra.mxu0 %v670_v11  ;;  %591 = vmatprep.subr.bf16.mxu1 %v671_v14 }
  0x19   :  { %623 = vmatprep.subr.bf16.mxu0 %v672_v15 }
  0x1b   :  { %592 = vmatpush3.bf16.msra.mxu1 %v671_v14 }
  0x1c   :  { %624 = vmatpush3.bf16.msra.mxu0 %v672_v15  ;;  %593 = vmatprep.subr.bf16.mxu1 %v673_v16 }
  0x1d   :  { %625 = vmatprep.subr.bf16.mxu0 %v674_v17 }
  0x1f   :  { %594 = vmatpush3.bf16.msra.mxu1 %v673_v16 }
  0x20   :  { %626 = vmatpush3.bf16.msra.mxu0 %v674_v17 }
  0x22   :  { %596 = vmatmul.mubr.bf16.vlgmr.msra.gmra.mrb[0].mxu1 %v677_v18 }
  0x23   :  { %628 = vmatmul.mubr.bf16.vlgmr.msra.gmra.mrb[0].mxu0 %v678_v19  ;;  %599 = vmatprep.mubr.bf16.mxu1 %v679_v20 }
  0x24   :  { %631 = vmatprep.mubr.bf16.mxu0 %v680_v21 }
  0x2a   :  { %600 = vmatmul.mubr.bf16.gmra.mrb[4].mxu1 %v681_v22 }
  0x2b   :  { %632 = vmatmul.mubr.bf16.gmra.mrb[4].mxu0 %v682_v23  ;;  %603 = vmatprep.mubr.bf16.mxu1 %v683_v24 }
  0x2c   :  { %635 = vmatprep.mubr.bf16.mxu0 %v684_v25 }
  0x32   :  { %604 = vmatmul.mubr.bf16.gmra.mrb[8].mxu1 %v685_v26 }
  0x33   :  { %636 = vmatmul.mubr.bf16.gmra.mrb[8].mxu0 %v686_v27  ;;  %607 = vmatprep.mubr.bf16.mxu1 %v687_v28 }
  0x34   :  { %639 = vmatprep.mubr.bf16.mxu0 %v688_v29 }
  0x3a   :  { %608 = vmatmul.mubr.bf16.gmra.mrb[12].mxu1 %v689_v30 }
  0x3b   :  { %640 = vmatmul.mubr.bf16.gmra.mrb[12].mxu0 %v690_v31 }
  0xf5   :  { %v597_v32 = vpop.f32.mrb[0].mxu1 }
  0xf6   :  { %v629_v33 = vpop.f32.mrb[0].mxu0  ;;  %v215_v35 = vpop.f32.mrb[1].mxu1 }
  0xf7   :  { %v417_v36 = vadd.f32 %v629_v33, %v597_v32  ;;  %v408_v37 = vpop.f32.mrb[1].mxu0  ;;  %v598_v38 = vpop.f32.mrb[2].mxu1 }
  0xf8   :  { %v409_v39 = vadd.f32 %v408_v37, %v215_v35  ;;  %v630_v40 = vpop.f32.mrb[2].mxu0  ;;  %v218_v41 = vpop.f32.mrb[3].mxu1 }
  0xf9   :  { %v480_v42 = vadd.f32 %v820_v34, %v417_v36  ;;  %v420_v43 = vadd.f32 %v630_v40, %v598_v38  ;;  %v411_v44 = vpop.f32.mrb[3].mxu0 }
  0xfa   :  { %v478_v45 = vadd.f32 %v820_v34, %v409_v39  ;;  %v412_v46 = vadd.f32 %v411_v44, %v218_v41 }
  0xfb   :  { %496 = vst [vmem:[%s891_s5 + $0x10] sm:$0xff] %v480_v42  ;;  %v481_v47 = vadd.f32 %v820_v34, %v420_v43 }
  0xfc   :  { %494 = vst [vmem:[%s891_s5] sm:$0xff] %v478_v45  ;;  %v479_v48 = vadd.f32 %v820_v34, %v412_v46 }
  0xfd   :  { %497 = vst [vmem:[%s891_s5 + $0x18] sm:$0xff] %v481_v47  ;;  %v601_v49 = vpop.f32.mrb[4].mxu1 }
  0xfe   :  { %495 = vst [vmem:[%s891_s5 + $0x8] sm:$0xff] %v479_v48  ;;  %v633_v50 = vpop.f32.mrb[4].mxu0  ;;  %v231_v51 = vpop.f32.mrb[5].mxu1 }
  0xff   :  { %v433_v52 = vadd.f32 %v633_v50, %v601_v49  ;;  %v424_v53 = vpop.f32.mrb[5].mxu0  ;;  %v602_v54 = vpop.f32.mrb[6].mxu1 }
 0x100   :  { %v425_v55 = vadd.f32 %v424_v53, %v231_v51  ;;  %v634_v56 = vpop.f32.mrb[6].mxu0  ;;  %v234_v57 = vpop.f32.mrb[7].mxu1 }
 0x101   :  { %v484_v58 = vadd.f32 %v820_v34, %v433_v52  ;;  %v436_v59 = vadd.f32 %v634_v56, %v602_v54  ;;  %v427_v60 = vpop.f32.mrb[7].mxu0 }
 0x102   :  { %v482_v61 = vadd.f32 %v820_v34, %v425_v55  ;;  %v428_v62 = vadd.f32 %v427_v60, %v234_v57 }
 0x103   :  { %500 = vst [vmem:[%s891_s5 + $0x30] sm:$0xff] %v484_v58  ;;  %v485_v63 = vadd.f32 %v820_v34, %v436_v59 }
 0x104   :  { %498 = vst [vmem:[%s891_s5 + $0x20] sm:$0xff] %v482_v61  ;;  %v483_v0 = vadd.f32 %v820_v34, %v428_v62 }
 0x105   :  { %501 = vst [vmem:[%s891_s5 + $0x38] sm:$0xff] %v485_v63  ;;  %v605_v1 = vpop.f32.mrb[8].mxu1 }
 0x106   :  { %499 = vst [vmem:[%s891_s5 + $0x28] sm:$0xff] %v483_v0  ;;  %v637_v2 = vpop.f32.mrb[8].mxu0  ;;  %v247_v3 = vpop.f32.mrb[9].mxu1 }
 0x107   :  { %v449_v4 = vadd.f32 %v637_v2, %v605_v1  ;;  %v440_v5 = vpop.f32.mrb[9].mxu0  ;;  %v606_v6 = vpop.f32.mrb[10].mxu1 }
 0x108   :  { %v441_v7 = vadd.f32 %v440_v5, %v247_v3  ;;  %v638_v8 = vpop.f32.mrb[10].mxu0  ;;  %v250_v9 = vpop.f32.mrb[11].mxu1 }
 0x109   :  { %v488_v10 = vadd.f32 %v820_v34, %v449_v4  ;;  %v452_v11 = vadd.f32 %v638_v8, %v606_v6  ;;  %v443_v12 = vpop.f32.mrb[11].mxu0 }
 0x10a   :  { %v486_v13 = vadd.f32 %v820_v34, %v441_v7  ;;  %v444_v14 = vadd.f32 %v443_v12, %v250_v9 }
 0x10b   :  { %504 = vst [vmem:[%s891_s5 + $0x50] sm:$0xff] %v488_v10  ;;  %v489_v15 = vadd.f32 %v820_v34, %v452_v11 }
 0x10c   :  { %502 = vst [vmem:[%s891_s5 + $0x40] sm:$0xff] %v486_v13  ;;  %v487_v16 = vadd.f32 %v820_v34, %v444_v14 }
 0x10d   :  { %505 = vst [vmem:[%s891_s5 + $0x58] sm:$0xff] %v489_v15  ;;  %v609_v17 = vpop.f32.mrb[12].mxu1 }
 0x10e   :  { %503 = vst [vmem:[%s891_s5 + $0x48] sm:$0xff] %v487_v16  ;;  %v641_v18 = vpop.f32.mrb[12].mxu0  ;;  %v263_v19 = vpop.f32.mrb[13].mxu1 }
 0x10f   :  { %v465_v20 = vadd.f32 %v641_v18, %v609_v17  ;;  %v456_v21 = vpop.f32.mrb[13].mxu0  ;;  %v610_v22 = vpop.f32.mrb[14].mxu1 }
 0x110   :  { %v457_v23 = vadd.f32 %v456_v21, %v263_v19  ;;  %v642_v24 = vpop.f32.mrb[14].mxu0  ;;  %v266_v25 = vpop.f32.mrb[15].mxu1 }
 0x111   :  { %v492_v26 = vadd.f32 %v820_v34, %v465_v20  ;;  %v468_v27 = vadd.f32 %v642_v24, %v610_v22  ;;  %v459_v28 = vpop.f32.mrb[15].mxu0 }
 0x112   :  { %v490_v29 = vadd.f32 %v820_v34, %v457_v23  ;;  %v460_v30 = vadd.f32 %v459_v28, %v266_v25 }
 0x113   :  { %508 = vst [vmem:[%s891_s5 + $0x70] sm:$0xff] %v492_v26  ;;  %v493_v31 = vadd.f32 %v820_v34, %v468_v27 }
 0x114   :  { %506 = vst [vmem:[%s891_s5 + $0x60] sm:$0xff] %v490_v29  ;;  %v491_v32 = vadd.f32 %v820_v34, %v460_v30 }
 0x115   :  { %509 = vst [vmem:[%s891_s5 + $0x78] sm:$0xff] %v493_v31 }
 0x116   :  { %507 = vst [vmem:[%s891_s5 + $0x68] sm:$0xff] %v491_v32 }

// kernel: bert_bilstm_crf_forward.3
= control target key start
LH: loop header
LB: loop body
LE: loop exit
PB: predicated region body
PF: predicated region fallthrough
CT: control target
= control target key end

     0   :  { %9 = vsyncpa [#allocation6], 0  ;;  %s3575_s0 = inlined_call_operand.vmem [shape: bf16[128,128], index: 0, kind: input, shape index: {}]   ;;  %s3576_s1 = inlined_call_operand.vmem [shape: bf16[2,128,512], index: 1, kind: input, shape index: {}]   ;;  %s3577_s2 = inlined_call_operand.vmem [shape: f32[2,1,512], index: 2, kind: input, shape index: {}]   ;;  %s3578_s3 = inlined_call_operand.hbm [shape: bf16[2,128,512], index: 3, kind: input, shape index: {}]   ;;  %s3579_s4 = inlined_call_operand.vmem [shape: bf16[2,128,128], index: 4, kind: output, shape index: {}]  }
   0x1   :  { %11 = vsyncpa [#allocation6 + $0x1], 0  ;;  %s2739_s15 = smov 0   ;;  %s2741_s16 = smov 0  }
   0x2   :  { %s2743_s17 = smov 0   ;;  %s2745_s18 = smov 0  }
   0x3   :  { %s2747_s19 = smov 0   ;;  %s2749_s20 = smov 0  }
   0x4   :  { %s2751_s21 = smov 0   ;;  %s2753_s22 = smov 0  }
   0x5 LB: > { %s2202_s23 = sadd.s32 4294967295, %s2707_s22   ;;  %s26_s24 = sadd.s32 1, %s2699_s20  ;;  %s2707_s22 = sphi %s2753_s22, %s17_s22   ;;  %s2703_s21 = sphi %s2751_s21, %s3589_s21   ;;  %s2699_s20 = sphi %s2749_s20, %s3588_s20   ;;  %s2695_s19 = sphi %s2747_s19, %s3587_s19   ;;  %s2691_s18 = sphi %s2745_s18, %s3586_s18   ;;  %s2687_s17 = sphi %s2743_s17, %s3585_s17   ;;  %s2683_s16 = sphi %s2741_s16, %s3584_s16   ;;  %s2679_s15 = sphi %s2739_s15, %s3583_s15  }
   0x6   : > { %p27_p0 = scmp.ge.s32.totalorder %s26_s24, 2  ;;  %s29_s25 = sadd.s32 1, %s2703_s21 }
   0x7   : > { %s124_s26 = sadd.s32 1, %s2687_s17  ;;  %p131_p1 = scmp.ne.s32.totalorder %s2687_s17, %s2683_s16 }
   0x8   : > { %s3591_s24 = smov (%p27_p0, %s26_s24), 0  ;;  %s3593_s25 = smov (!%p27_p0, %s29_s25), %s2703_s21 }
   0x9   : > { %p132_p2 = scmp.eq.s32.totalorder %s2707_s22, 0  ;;  %p137_p3 = scmp.ne.s32.totalorder %s2683_s16, %s2679_s15 }
   0xa   : > { %p31_p4 = scmp.ge.s32.totalorder %s3593_s25, 2  ;;  %p138_p5 = scmp.eq.s32.totalorder %s2202_s23, 0 }
   0xb   : > { %p2788_p6 = por %p132_p2, %p131_p1  ;;  %p2362_p8 = scmp.lt.s32.totalorder %s2707_s22, 4 }
   0xc   : > { %s3595_s25 = smov (%p31_p4, %s3593_s25), 0  ;;  %p2794_p7 = por %p138_p5, %p137_p3 }
   0xd   : > { %s121_s29 = ssub.s32 %s2703_s21, %s3595_s25  ;;  %s233_s30 = sand.u32 1, %s2687_s17  }
   0xe   : > { %p122_p9 = scmp.eq.s32.totalorder %s121_s29, 0  ;;  %s2206_s5 = sshll.u32 %s233_s30, 8 }
   0xf   : > { %s2346_s6 = sshll.u32 %s2703_s21, 12  ;;  %s237_s11 = scalar_lea.vmem [#allocation5], %s2206_s5 }
  0x10   : > { %s2804_s7 = scalar_select %p122_p9, %s2687_s17, %s124_s26  }
  0x11   : > { %s2809_s10 = scalar_lea.hbm %s3578_s3, %s2346_s6  ;;  %s244_s12 = sshll.u32 %s237_s11, 4  ;;  %s2817_s12 = int_to_ptr.vmem [resolvable:$true] %s244_s12 }
  0x12   : > { %p2813_p10 = pnand %p2362_p8, %p2788_p6  ;;  %s2819_s14 = scalar_lea.sflag [#allocation6], %s233_s30 }
  0x13   : > { %s2611_s15 = scalar_lea.hbm %s2809_s10, 4096  ;;  %s2616_s27 = scalar_lea.hbm %s3578_s3, 8192 }
  0x14   : > { %p2612_p11 = scmp.ne.s32.totalorder %s2809_s10, %s2611_s15  ;;  %p2613_p12 = pneg %p2813_p10 }
  0x15   : > { %p2617_p1 = scmp.lt.u32.totalorder %s2809_s10, %s3578_s3  ;;  %p2618_p2 = scmp.lt.u32.totalorder %s2616_s27, %s2611_s15 }
  0x16   : > { %p2614_p13 = pnand %p2613_p12, %p2612_p11  ;;  %p2620_p4 = scmp.lt.u32.totalorder %s2611_s15, %s2809_s10 }
  0x17   : > { %p2619_p3 = por %p2618_p2, %p2617_p1 }
  0x18   : > { %p2615_p0 = pneg %p2614_p13 }
  0x19   : > { %p2621_p5 = por %p2620_p4, %p2619_p3 }
  0x1b   : > { %p2622_p6 = pnand %p2621_p5, %p2615_p0 }
  0x1d   : > { %2625 = shalt.err (!%p2622_p6)
}
  0x1e   : > { %s2626_s30 = scalar_lea.vmem %s2817_s12, 4096  ;;  %s2709_s6 = smov [#allocation5]  }
  0x1f   : > { %p2627_p8 = scmp.ne.s32.totalorder %s2817_s12, %s2626_s30  ;;  %s2631_s8 = sshll.u32 %s2709_s6, 4  ;;  %s2632_s8 = int_to_ptr.vmem [resolvable:$false] %s2631_s8 }
  0x20   : > { %s2633_s9 = scalar_lea.vmem %s2632_s8, 8192  ;;  %p2634_p13 = scmp.lt.s32.totalorder %s2817_s12, %s2632_s8 }
  0x21   : > { %p2629_p9 = pnand %p2627_p8, %p2613_p12  ;;  %p2635_p1 = scmp.lt.s32.totalorder %s2633_s9, %s2626_s30 }
  0x23   : > { %p2630_p11 = pneg %p2629_p9  ;;  %p2636_p2 = por %p2635_p1, %p2634_p13 }
  0x25   : > { %p2637_p3 = pnand %p2636_p2, %p2630_p11 }
  0x27   : > { %2640 = shalt.err (!%p2637_p3)
}
  0x28   : > { %s2710_s11 = smov 256   ;;  %s2711_s15 = smov 16  }
  0x29   : > { %2361 = dma.hbm_to_vmem [thread:$0]  (!%p2813_p10), %s2809_s10, 4096, %s2817_s12, %s2819_s14, %s2710_s11, %s2710_s11, %s2711_s15  }
  0x2a   : > { %p2209_p12 = scmp.ge.s32.totalorder %s2707_s22, 1  ;;  %p252_p0 = scmp.lt.s32.totalorder %s2707_s22, 5 }
  0x2c   : > { %p253_p4 = pnand %p2209_p12, %p252_p0 }
  0x2d   : > { %s258_s23 = sand.u32 (!%p253_p4), 1, %s2683_s16  }
  0x2e   : > { %256 = sbr.rel (%p253_p4) target bundleno = 2456 (0x998), region = 36  ;;  %s2210_s26 = sshll.u32 (!%p253_p4), %s258_s23, 8 }
  0x2f   : > { %s259_s27 = scalar_lea.sflag (!%p253_p4), [#allocation6], %s258_s23  ;;  %s2850_s29 = scalar_lea.vmem (!%p253_p4), [#allocation5], %s2210_s26 }
  0x35   : > { %2674 = dma.done.wait (%p2794_p7), %s259_s27, 4096  }
  0x36   : > { %2676 = vsyncadd (%p2794_p7), %s259_s27, 4294963200  ;;  %p331_p10 = scmp.lt.s32.totalorder %s2695_s19, 1  ;;  %s315_s10 = ssub.s32 1, %s2695_s19  ;;  %v2712_v0 = vmov 0   ;;  %v2867_v1 = vld [vmem:[%s2850_s29] sm:$0xff]  ;;  %v2870_v2 = vld [vmem:[%s2850_s29 + $0x8] sm:$0xff] }
  0x37   : > { %639 = vmatprep.mubr.bf16.mxu0 %v2712_v0  ;;  %712 = vmatprep.mubr.bf16.mxu1 %v2712_v0  ;;  %s316_s28 = smul.u32 %s2691_s18, %s315_s10  ;;  %s317_s12 = ssub.s32 1, %s2691_s18  ;;  %v2873_v3 = vld [vmem:[%s2850_s29 + $0x10] sm:$0xff]  ;;  %v2876_v4 = vld [vmem:[%s2850_s29 + $0x18] sm:$0xff]  ;;  %v2879_v5 = vld [vmem:[%s2850_s29 + $0x20] sm:$0xff] }
  0x38   : > { %s318_s13 = smul.u32 %s2695_s19, %s317_s12  ;;  %v2882_v6 = vld [vmem:[%s2850_s29 + $0x28] sm:$0xff]  ;;  %v2886_v7 = vld [vmem:[%s2850_s29 + $0x30] sm:$0xff]  ;;  %v2889_v8 = vld [vmem:[%s2850_s29 + $0x38] sm:$0xff]  ;;  %p2255_p5 = scmp.ne.s32.totalorder %s2691_s18, 0 }
  0x39   : > { %s2864_s14 = scalar_select %p331_p10, %s2695_s19, 1  ;;  %v2892_v9 = vld [vmem:[%s2850_s29 + $0x40] sm:$0xff]  ;;  %v2897_v10 = vld [vmem:[%s2850_s29 + $0x48] sm:$0xff]  ;;  %v2900_v11 = vld [vmem:[%s2850_s29 + $0x50] sm:$0xff] }
  0x3a   : > { %s319_s5 = sadd.s32 %s318_s13, %s316_s28  ;;  %v2903_v12 = vld [vmem:[%s2850_s29 + $0x58] sm:$0xff]  ;;  %v2906_v13 = vld [vmem:[%s2850_s29 + $0x60] sm:$0xff]  ;;  %v2909_v14 = vld [vmem:[%s2850_s29 + $0x68] sm:$0xff] }
  0x3b   : > { %s2211_s30 = sshll.u32 %s319_s5, 3  ;;  %s2217_s6 = sshll.u32 %s2864_s14, 4  ;;  %v2912_v15 = vld [vmem:[%s2850_s29 + $0x70] sm:$0xff]  ;;  %v2916_v16 = vld [vmem:[%s2850_s29 + $0x78] sm:$0xff]  ;;  %v2919_v17 = vld [vmem:[%s2850_s29 + $0x80] sm:$0xff] }
  0x3c   : > { %p321_p7 = scmp.lt.s32.totalorder %s2211_s30, 15  ;;  %v2922_v18 = vld [vmem:[%s2850_s29 + $0x88] sm:$0xff]  ;;  %s2347_s9 = sshll.u32 %s2864_s14, 8  ;;  %v2926_v19 = vld [vmem:[%s2850_s29 + $0x90] sm:$0xff]  ;;  %v2929_v20 = vld [vmem:[%s2850_s29 + $0x98] sm:$0xff] }
  0x3d   : > { %v2932_v21 = vld [vmem:[%s2850_s29 + $0xa0] sm:$0xff]  ;;  %v2940_v22 = vld [vmem:[%s2850_s29 + $0xa8] sm:$0xff]  ;;  %v2943_v23 = vld [vmem:[%s2850_s29 + $0xb0] sm:$0xff]  ;;  %s2960_s28 = scalar_lea.vmem %s3576_s1, %s2347_s9 }
  0x3e   : > { %s3597_s30 = smov (!%p321_p7, %s2211_s30), 15  ;;  %v2946_v24 = vld [vmem:[%s2850_s29 + $0xb8] sm:$0xff]  ;;  %v2949_v25 = vld [vmem:[%s2850_s29 + $0xc0] sm:$0xff]  ;;  %v2952_v26 = vld [vmem:[%s2850_s29 + $0xc8] sm:$0xff] }
  0x3f   : > { %s351_s8 = sadd.s32 %s2217_s6, %s3597_s30  ;;  %v2955_v27 = vld [vmem:[%s2850_s29 + $0xd0] sm:$0xff]  ;;  %v2963_v28 = vld [vmem:[%s2850_s29 + $0xd8] sm:$0xff]  ;;  %v2966_v29 = vld [vmem:[%s2850_s29 + $0xe0] sm:$0xff] }
  0x40   : > { %s2218_s11 = sshll.u32 %s351_s8, 2  ;;  %v2969_v30 = vld [vmem:[%s2850_s29 + $0xe8] sm:$0xff]  ;;  %v2972_v31 = vld [vmem:[%s2850_s29 + $0xf0] sm:$0xff]  ;;  %v2975_v32 = vld [vmem:[%s2850_s29 + $0xf8] sm:$0xff]  ;;  %s2212_s29 = sshll.u32 %s3597_s30, 2 }
  0x41   : > { %s2937_s26 = scalar_lea.vmem %s3579_s4, %s2218_s11  ;;  %v2431_v33 = vld [vmem:[%s2960_s28 + $0x4] ss:$16 sps:$4 sm:$0xff]   ;;  %v2433_v34 = vld [vmem:[%s2960_s28 + $0xc] ss:$16 sps:$4 sm:$0xff]   ;;  %v2435_v35 = vld [vmem:[%s2960_s28] ss:$16 sps:$4 sm:$0xff]   ;;  %s3006_s5 = scalar_lea.vmem %s3575_s0, %s2212_s29 }
  0x42   : > { %607 = vmatprep.subr.bf16.mxu0 %v2431_v33  ;;  %v2436_v36 = vld [vmem:[%s2960_s28 + $0x8] ss:$16 sps:$4 sm:$0xff]   ;;  %680 = vmatprep.subr.bf16.mxu1 %v2433_v34  ;;  %v2437_v37 = vld [vmem:[%s2960_s28 + $0x24] ss:$16 sps:$4 sm:$0xff]   ;;  %v2439_v38 = vld [vmem:[%s2960_s28 + $0x2c] ss:$16 sps:$4 sm:$0xff]  }
  0x43   : > { %608 = vmatpush1.bf16.msra.mxu0 %v2435_v35  ;;  %681 = vmatpush1.bf16.msra.mxu1 %v2436_v36  ;;  %v2441_v39 = vld [vmem:[%s2960_s28 + $0x20] ss:$16 sps:$4 sm:$0xff]   ;;  %v2442_v40 = vld [vmem:[%s2960_s28 + $0x28] ss:$16 sps:$4 sm:$0xff]   ;;  %v2443_v41 = vld [vmem:[%s2960_s28 + $0x44] ss:$16 sps:$4 sm:$0xff]  }
  0x44   : > { %609 = vmatprep.subr.bf16.mxu0 %v2437_v37  ;;  %682 = vmatprep.subr.bf16.mxu1 %v2439_v38  ;;  %v2445_v42 = vld [vmem:[%s2960_s28 + $0x4c] ss:$16 sps:$4 sm:$0xff]   ;;  %v2447_v43 = vld [vmem:[%s2960_s28 + $0x40] ss:$16 sps:$4 sm:$0xff]   ;;  %v2448_v44 = vld [vmem:[%s2960_s28 + $0x48] ss:$16 sps:$4 sm:$0xff]   ;;  %v403_v38 = vlaneseq }
  0x45   : > { %v2449_v45 = vld [vmem:[%s2960_s28 + $0x64] ss:$16 sps:$4 sm:$0xff]   ;;  %v2451_v46 = vld [vmem:[%s2960_s28 + $0x6c] ss:$16 sps:$4 sm:$0xff]   ;;  %v2453_v47 = vld [vmem:[%s2960_s28 + $0x60] ss:$16 sps:$4 sm:$0xff]  }
  0x46   : > { %v2454_v48 = vld [vmem:[%s2960_s28 + $0x68] ss:$16 sps:$4 sm:$0xff]   ;;  %v2455_v49 = vld [vmem:[%s2960_s28 + $0x84] ss:$16 sps:$4 sm:$0xff]   ;;  %v2457_v50 = vld [vmem:[%s2960_s28 + $0x8c] ss:$16 sps:$4 sm:$0xff]  }
  0x47   : > { %610 = vmatpush1.bf16.msra.mxu0 %v2441_v39  ;;  %683 = vmatpush1.bf16.msra.mxu1 %v2442_v40  ;;  %v2459_v51 = vld [vmem:[%s2960_s28 + $0x80] ss:$16 sps:$4 sm:$0xff]   ;;  %v2460_v52 = vld [vmem:[%s2960_s28 + $0x88] ss:$16 sps:$4 sm:$0xff]   ;;  %v2461_v53 = vld [vmem:[%s2960_s28 + $0xa4] ss:$16 sps:$4 sm:$0xff]  }
  0x48   : > { %611 = vmatprep.subr.bf16.mxu0 %v2443_v41  ;;  %684 = vmatprep.subr.bf16.mxu1 %v2445_v42  ;;  %v2463_v54 = vld [vmem:[%s2960_s28 + $0xac] ss:$16 sps:$4 sm:$0xff]   ;;  %v2465_v55 = vld [vmem:[%s2960_s28 + $0xa0] ss:$16 sps:$4 sm:$0xff]   ;;  %v2466_v56 = vld [vmem:[%s2960_s28 + $0xa8] ss:$16 sps:$4 sm:$0xff]  }
  0x49   : > { %v2467_v57 = vld [vmem:[%s2960_s28 + $0xc4] ss:$16 sps:$4 sm:$0xff]   ;;  %v2469_v58 = vld [vmem:[%s2960_s28 + $0xcc] ss:$16 sps:$4 sm:$0xff]   ;;  %v2471_v59 = vld [vmem:[%s2960_s28 + $0xc0] ss:$16 sps:$4 sm:$0xff]  }
  0x4a   : > { %v2472_v60 = vld [vmem:[%s2960_s28 + $0xc8] ss:$16 sps:$4 sm:$0xff]   ;;  %v2473_v61 = vld [vmem:[%s2960_s28 + $0xe4] ss:$16 sps:$4 sm:$0xff]   ;;  %v2475_v62 = vld [vmem:[%s2960_s28 + $0xec] ss:$16 sps:$4 sm:$0xff]  }
  0x4b   : > { %612 = vmatpush1.bf16.msra.mxu0 %v2447_v43  ;;  %685 = vmatpush1.bf16.msra.mxu1 %v2448_v44  ;;  %v2477_v63 = vld [vmem:[%s2960_s28 + $0xe0] ss:$16 sps:$4 sm:$0xff]   ;;  %v2478_v33 = vld [vmem:[%s2960_s28 + $0xe8] ss:$16 sps:$4 sm:$0xff]   ;;  %s2215_s30 = sshll.u32 %s2864_s14, 2  ;;  %v404_v39 = vshrl.u32 %v403_v38, 7 }
  0x4c   : > { %613 = vmatprep.subr.bf16.mxu0 %v2449_v45  ;;  %686 = vmatprep.subr.bf16.mxu1 %v2451_v46  ;;  %v2479_v34 = vld [vmem:[%s3006_s5] sm:$0xff]   ;;  %v2480_v35 = vld [vmem:[%s3006_s5 + $0x8] sm:$0xff]   ;;  %v2481_v36 = vld [vmem:[%s3006_s5 + $0x10] sm:$0xff]   ;;  %s339_s9 = scalar_lea.vmem %s3577_s2, %s2215_s30 }
  0x4d   : > { %v2482_v37 = vld [vmem:[%s3006_s5 + $0x18] sm:$0xff]   ;;  %v405_v40 = vsub.s32 0, %v404_v39  ;;  %v401_v41 = vld [vmem:[%s339_s9] sm:$0xf]  ;;  %v413_v42 = vsub.s32 2, %v404_v39  ;;  %v409_v43 = vsub.s32 1, %v404_v39 }
  0x4e   : > { %v417_v44 = vsub.s32 3, %v404_v39 }
  0x4f   : > { %614 = vmatpush1.bf16.msra.mxu0 %v2453_v47  ;;  %687 = vmatpush1.bf16.msra.mxu1 %v2454_v48  ;;  %v3029_v45 = vrot.slane %v401_v41, %v405_v40  ;;  %v3031_v46 = vrot.slane %v401_v41, %v413_v42  ;;  %v3033_v47 = vrot.slane %v401_v41, %v409_v43 }
  0x50   : > { %615 = vmatprep.subr.bf16.mxu0 %v2455_v49  ;;  %688 = vmatprep.subr.bf16.mxu1 %v2457_v50  ;;  %v3035_v48 = vrot.slane %v401_v41, %v417_v44 }
  0x53   : > { %616 = vmatpush1.bf16.msra.mxu0 %v2459_v51  ;;  %689 = vmatpush1.bf16.msra.mxu1 %v2460_v52 }
  0x54   : > { %617 = vmatprep.subr.bf16.mxu0 %v2461_v53  ;;  %690 = vmatprep.subr.bf16.mxu1 %v2463_v54 }
  0x57   : > { %618 = vmatpush1.bf16.msra.mxu0 %v2465_v55  ;;  %691 = vmatpush1.bf16.msra.mxu1 %v2466_v56 }
  0x58   : > { %619 = vmatprep.subr.bf16.mxu0 %v2467_v57  ;;  %692 = vmatprep.subr.bf16.mxu1 %v2469_v58 }
  0x5b   : > { %620 = vmatpush1.bf16.msra.mxu0 %v2471_v59  ;;  %693 = vmatpush1.bf16.msra.mxu1 %v2472_v60 }
  0x5c   : > { %621 = vmatprep.subr.bf16.mxu0 %v2473_v61  ;;  %694 = vmatprep.subr.bf16.mxu1 %v2475_v62 }
  0x5f   : > { %622 = vmatpush1.bf16.msra.mxu0 %v2477_v63  ;;  %695 = vmatpush1.bf16.msra.mxu1 %v2478_v33 }
  0x62   : > { %640 = vmatmul.mubr.bf16.vlgmr.msra.gmra.mrb[0].mxu0 %v2479_v34  ;;  %713 = vmatmul.mubr.bf16.vlgmr.msra.gmra.mrb[0].mxu1 %v2479_v34 }
  0x63   : > { %649 = vmatprep.mubr.bf16.mxu0 %v2712_v0  ;;  %722 = vmatprep.mubr.bf16.mxu1 %v2712_v0 }
  0x6a   : > { %650 = vmatmul.mubr.bf16.gmra.mrb[4].mxu0 %v2480_v35  ;;  %723 = vmatmul.mubr.bf16.gmra.mrb[4].mxu1 %v2480_v35 }
  0x6b   : > { %659 = vmatprep.mubr.bf16.mxu0 %v2712_v0  ;;  %732 = vmatprep.mubr.bf16.mxu1 %v2712_v0 }
  0x72   : > { %660 = vmatmul.mubr.bf16.gmra.mrb[8].mxu0 %v2481_v36  ;;  %733 = vmatmul.mubr.bf16.gmra.mrb[8].mxu1 %v2481_v36 }
  0x73   : > { %669 = vmatprep.mubr.bf16.mxu0 %v2712_v0  ;;  %742 = vmatprep.mubr.bf16.mxu1 %v2712_v0 }
  0x7a   : > { %670 = vmatmul.mubr.bf16.gmra.mrb[12].mxu0 %v2482_v37  ;;  %743 = vmatmul.mubr.bf16.gmra.mrb[12].mxu1 %v2482_v37 }
 0x135   : > { %v641_v49 = vpop.f32.mrb[0].mxu0  ;;  %v714_v51 = vpop.f32.mrb[0].mxu1 }
 0x136   : > { %v642_v50 = vadd.f32 %v641_v49, %v3029_v45  ;;  %v643_v52 = vpop.f32.mrb[1].mxu0  ;;  %v715_v53 = vadd.f32 %v714_v51, %v3031_v46  ;;  %v716_v55 = vpop.f32.mrb[1].mxu1 }
 0x137   : > { %v644_v54 = vadd.f32 %v643_v52, %v3033_v47  ;;  %v645_v56 = vpop.f32.mrb[2].mxu0  ;;  %v717_v57 = vadd.f32 %v716_v55, %v3035_v48  ;;  %v718_v59 = vpop.f32.mrb[2].mxu1 }
 0x138   : > { %753 = vst [vmem:[#allocation2] sm:$0xff] %v642_v50  ;;  %v646_v58 = vadd.f32 %v645_v56, %v3029_v45  ;;  %v647_v60 = vpop.f32.mrb[3].mxu0  ;;  %755 = vst [vmem:[#allocation2 + $0x10] sm:$0xff] %v715_v53  ;;  %v719_v61 = vadd.f32 %v718_v59, %v3031_v46  ;;  %v720_v63 = vpop.f32.mrb[3].mxu1 }
 0x139   : > { %754 = vst [vmem:[#allocation2 + $0x8] sm:$0xff] %v644_v54  ;;  %v648_v62 = vadd.f32 %v647_v60, %v3033_v47  ;;  %756 = vst [vmem:[#allocation2 + $0x18] sm:$0xff] %v717_v57  ;;  %v721_v33 = vadd.f32 %v720_v63, %v3035_v48 }
 0x13a   : > { %757 = vst [vmem:[#allocation2 + $0x20] sm:$0xff] %v646_v58  ;;  %759 = vst [vmem:[#allocation2 + $0x30] sm:$0xff] %v719_v61 }
 0x13b   : > { %758 = vst [vmem:[#allocation2 + $0x28] sm:$0xff] %v648_v62  ;;  %760 = vst [vmem:[#allocation2 + $0x38] sm:$0xff] %v721_v33 }
 0x13d   : > { %v651_v34 = vpop.f32.mrb[4].mxu0  ;;  %v724_v36 = vpop.f32.mrb[4].mxu1 }
 0x13e   : > { %v652_v35 = vadd.f32 %v651_v34, %v3029_v45  ;;  %v653_v37 = vpop.f32.mrb[5].mxu0  ;;  %v725_v38 = vadd.f32 %v724_v36, %v3031_v46  ;;  %v726_v40 = vpop.f32.mrb[5].mxu1 }
 0x13f   : > { %v654_v39 = vadd.f32 %v653_v37, %v3033_v47  ;;  %v655_v41 = vpop.f32.mrb[6].mxu0  ;;  %v727_v42 = vadd.f32 %v726_v40, %v3035_v48  ;;  %v728_v44 = vpop.f32.mrb[6].mxu1 }
 0x140   : > { %761 = vst [vmem:[#allocation2 + $0x40] sm:$0xff] %v652_v35  ;;  %v656_v43 = vadd.f32 %v655_v41, %v3029_v45  ;;  %v657_v49 = vpop.f32.mrb[7].mxu0  ;;  %763 = vst [vmem:[#allocation2 + $0x50] sm:$0xff] %v725_v38  ;;  %v729_v50 = vadd.f32 %v728_v44, %v3031_v46  ;;  %v730_v52 = vpop.f32.mrb[7].mxu1 }
 0x141   : > { %762 = vst [vmem:[#allocation2 + $0x48] sm:$0xff] %v654_v39  ;;  %v658_v51 = vadd.f32 %v657_v49, %v3033_v47  ;;  %764 = vst [vmem:[#allocation2 + $0x58] sm:$0xff] %v727_v42  ;;  %v731_v53 = vadd.f32 %v730_v52, %v3035_v48 }
 0x142   : > { %765 = vst [vmem:[#allocation2 + $0x60] sm:$0xff] %v656_v43  ;;  %767 = vst [vmem:[#allocation2 + $0x70] sm:$0xff] %v729_v50 }
 0x143   : > { %766 = vst [vmem:[#allocation2 + $0x68] sm:$0xff] %v658_v51  ;;  %768 = vst [vmem:[#allocation2 + $0x78] sm:$0xff] %v731_v53 }
 0x145   : > { %v661_v54 = vpop.f32.mrb[8].mxu0  ;;  %v734_v56 = vpop.f32.mrb[8].mxu1 }
 0x146   : > { %v662_v55 = vadd.f32 %v661_v54, %v3029_v45  ;;  %v663_v57 = vpop.f32.mrb[9].mxu0  ;;  %v735_v58 = vadd.f32 %v734_v56, %v3031_v46  ;;  %v736_v60 = vpop.f32.mrb[9].mxu1 }
 0x147   : > { %v664_v59 = vadd.f32 %v663_v57, %v3033_v47  ;;  %v665_v61 = vpop.f32.mrb[10].mxu0  ;;  %v737_v62 = vadd.f32 %v736_v60, %v3035_v48  ;;  %v738_v33 = vpop.f32.mrb[10].mxu1 }
 0x148   : > { %769 = vst [vmem:[#allocation2 + $0x80] sm:$0xff] %v662_v55  ;;  %v666_v63 = vadd.f32 %v665_v61, %v3029_v45  ;;  %v667_v34 = vpop.f32.mrb[11].mxu0  ;;  %771 = vst [vmem:[#allocation2 + $0x90] sm:$0xff] %v735_v58  ;;  %v739_v35 = vadd.f32 %v738_v33, %v3031_v46  ;;  %v740_v37 = vpop.f32.mrb[11].mxu1 }
 0x149   : > { %770 = vst [vmem:[#allocation2 + $0x88] sm:$0xff] %v664_v59  ;;  %v668_v36 = vadd.f32 %v667_v34, %v3033_v47  ;;  %772 = vst [vmem:[#allocation2 + $0x98] sm:$0xff] %v737_v62  ;;  %v741_v38 = vadd.f32 %v740_v37, %v3035_v48 }
 0x14a   : > { %773 = vst [vmem:[#allocation2 + $0xa0] sm:$0xff] %v666_v63  ;;  %775 = vst [vmem:[#allocation2 + $0xb0] sm:$0xff] %v739_v35 }
 0x14b   : > { %774 = vst [vmem:[#allocation2 + $0xa8] sm:$0xff] %v668_v36  ;;  %776 = vst [vmem:[#allocation2 + $0xb8] sm:$0xff] %v741_v38 }
 0x14d   : > { %v671_v39 = vpop.f32.mrb[12].mxu0  ;;  %v744_v41 = vpop.f32.mrb[12].mxu1  ;;  %820 = sbr.rel (%p2255_p5) target bundleno = 341 (0x155), region = 44 }
 0x14e   : > { %v672_v40 = vadd.f32 %v671_v39, %v3029_v45  ;;  %v673_v42 = vpop.f32.mrb[13].mxu0  ;;  %v745_v43 = vadd.f32 %v744_v41, %v3031_v46  ;;  %v746_v49 = vpop.f32.mrb[13].mxu1 }
 0x14f   : > { %v674_v44 = vadd.f32 %v673_v42, %v3033_v47  ;;  %v675_v50 = vpop.f32.mrb[14].mxu0  ;;  %v747_v51 = vadd.f32 %v746_v49, %v3035_v48  ;;  %v748_v53 = vpop.f32.mrb[14].mxu1 }
 0x150   : > { %777 = vst [vmem:[#allocation2 + $0xc0] sm:$0xff] %v672_v40  ;;  %v676_v52 = vadd.f32 %v675_v50, %v3029_v45  ;;  %v677_v54 = vpop.f32.mrb[15].mxu0  ;;  %779 = vst [vmem:[#allocation2 + $0xd0] sm:$0xff] %v745_v43  ;;  %v749_v55 = vadd.f32 %v748_v53, %v3031_v46  ;;  %v750_v57 = vpop.f32.mrb[15].mxu1  ;;  %v2713_v45 = vmov (!%p2255_p5), 0.0  }
 0x151   : > { %778 = vst [vmem:[#allocation2 + $0xc8] sm:$0xff] %v674_v44  ;;  %v678_v56 = vadd.f32 %v677_v54, %v3033_v47  ;;  %780 = vst [vmem:[#allocation2 + $0xd8] sm:$0xff] %v747_v51  ;;  %v751_v58 = vadd.f32 %v750_v57, %v3035_v48 }
 0x152   : > { %781 = vst [vmem:[#allocation2 + $0xe0] sm:$0xff] %v676_v52  ;;  %783 = vst [vmem:[#allocation2 + $0xf0] sm:$0xff] %v749_v55 }
 0x153   : > { %782 = vst [vmem:[#allocation2 + $0xe8] sm:$0xff] %v678_v56  ;;  %784 = vst [vmem:[#allocation2 + $0xf8] sm:$0xff] %v751_v58 }
 0x154   : > { %821 = vst [vmem:[#allocation3] sm:$0xff] %v2713_v45  ;;  %822 = vst [vmem:[#allocation4] sm:$0xff] %v2713_v45 }
 0x155 PF: > { %v3072_v46 = vcombine.high %v2867_v1, %v2873_v3  ;;  %v3076_v47 = vcombine.low %v2867_v1, %v2873_v3  ;;  %v3080_v48 = vcombine.high %v2879_v5, %v2886_v7  ;;  %1029 = vmatprep.mubr.bf16.mxu0 %v2712_v0  ;;  %v3085_v59 = vcombine.high %v2870_v2, %v2876_v4  ;;  %p823_p6 = scmp.eq.s32.totalorder %s2695_s19, 0 }
 0x156   : > { %1070 = vmatprep.mubr.bf16.mxu1 %v2712_v0  ;;  %v3091_v60 = vcombine.low %v2870_v2, %v2876_v4  ;;  %v3095_v1 = vcombine.high %v2882_v6, %v2889_v8  ;;  %v3100_v3 = vcombine.low %v2879_v5, %v2886_v7  ;;  %v3106_v61 = vcombine.high %v2892_v9, %v2900_v11 }
 0x157   : > { %997 = vmatprep.subr.bf16.mxu0 %v3072_v46  ;;  %1038 = vmatprep.subr.bf16.mxu1 %v3085_v59  ;;  %v3111_v2 = vcombine.low %v2882_v6, %v2889_v8  ;;  %v3116_v4 = vcombine.high %v2897_v10, %v2903_v12  ;;  %v3121_v5 = vcombine.low %v2892_v9, %v2900_v11  ;;  %s824_s18 = scalar_select %p823_p6, 0, 7 }
 0x158   : > { %998 = vmatpush1.bf16.msra.mxu0 %v3076_v47  ;;  %1039 = vmatpush1.bf16.msra.mxu1 %v3091_v60  ;;  %v3126_v7 = vcombine.high %v2906_v13, %v2912_v15  ;;  %v3131_v6 = vcombine.low %v2897_v10, %v2903_v12  ;;  %v3136_v8 = vcombine.high %v2909_v14, %v2916_v16  ;;  %s1114_s28 = scalar_select %p823_p6, 1, 6 }
 0x159   : > { %999 = vmatprep.subr.bf16.mxu0 %v3080_v48  ;;  %1040 = vmatprep.subr.bf16.mxu1 %v3095_v1  ;;  %v3141_v9 = vcombine.low %v2906_v13, %v2912_v15  ;;  %v3146_v11 = vcombine.high %v2919_v17, %v2926_v19  ;;  %v3151_v10 = vcombine.low %v2909_v14, %v2916_v16  ;;  %s2256_s14 = sshll.u32 %s824_s18, 3 }
 0x15a   : > { %v3156_v12 = vcombine.high %v2922_v18, %v2929_v20  ;;  %v3161_v13 = vcombine.low %v2919_v17, %v2926_v19  ;;  %v3166_v15 = vcombine.high %v2932_v21, %v2943_v23  ;;  %v3171_v14 = vcombine.low %v2922_v18, %v2929_v20  ;;  %s3271_s11 = sshra.s32 %s2256_s14, 3  ;;  %s2295_s29 = sshll.u32 %s1114_s28, 3 }
 0x15b   : > { %v3176_v16 = vcombine.high %v2940_v22, %v2946_v24  ;;  %v3181_v17 = vcombine.low %v2932_v21, %v2943_v23  ;;  %v3186_v19 = vcombine.high %v2949_v25, %v2955_v27  ;;  %v3191_v18 = vcombine.low %v2940_v22, %v2946_v24  ;;  %s2348_s15 = sshll.u32 %s3271_s11, 5  ;;  %v1102_v56 = vld [vmem:[#allocation4] sm:$0xff]  ;;  %s2294_s27 = sshll.u32 %s3271_s11, 2 }
 0x15c   : > { %1000 = vmatpush1.bf16.msra.mxu0 %v3100_v3  ;;  %1041 = vmatpush1.bf16.msra.mxu1 %v3111_v2  ;;  %v3196_v20 = vcombine.high %v2952_v26, %v2963_v28  ;;  %v3201_v21 = vcombine.low %v2949_v25, %v2955_v27  ;;  %v3206_v23 = vcombine.high %v2966_v29, %v2972_v31  ;;  %v835_v27 = vld [vmem:[#allocation3] sm:$0xff]  ;;  %s830_s23 = scalar_lea.vmem [#allocation2], %s2348_s15  ;;  %s1112_s10 = scalar_lea.vmem %s2937_s26, %s2294_s27 }
 0x15d   : > { %1001 = vmatprep.subr.bf16.mxu0 %v3106_v61  ;;  %1042 = vmatprep.subr.bf16.mxu1 %v3116_v4  ;;  %v3211_v22 = vcombine.low %v2952_v26, %v2963_v28  ;;  %v3216_v24 = vcombine.high %v2969_v30, %v2975_v32  ;;  %v3221_v25 = vcombine.low %v2966_v29, %v2972_v31  ;;  %v831_v29 = vld [vmem:[%s830_s23] sm:$0xff]  ;;  %v834_v40 = vld [vmem:[%s830_s23 + $0x18] sm:$0xff]  ;;  %v833_v43 = vld [vmem:[%s830_s23 + $0x10] sm:$0xff]  ;;  %s3315_s12 = sshra.s32 %s2295_s29, 3 }
 0x15e   : > { %v3227_v26 = vcombine.low %v2969_v30, %v2975_v32  ;;  %v836_v28 = vpack.c.bf16 %v835_v27, %v835_v27  ;;  %v832_v30 = vld [vmem:[%s830_s23 + $0x8] sm:$0xff]  ;;  %s2349_s13 = sshll.u32 %s3315_s12, 5  ;;  %s2301_s30 = sshll.u32 %s3315_s12, 2 }
 0x15f   : > { %s1120_s5 = scalar_lea.vmem [#allocation2], %s2349_s13  ;;  %s1242_s6 = scalar_lea.vmem %s2937_s26, %s2301_s30 }
 0x160   : > { %1002 = vmatpush1.bf16.msra.mxu0 %v3121_v5  ;;  %1043 = vmatpush1.bf16.msra.mxu1 %v3131_v6  ;;  %s1244_s8 = scalar_select %p823_p6, 2, 5 }
 0x161   : > { %1003 = vmatprep.subr.bf16.mxu0 %v3126_v7  ;;  %1044 = vmatprep.subr.bf16.mxu1 %v3136_v8  ;;  %s1374_s27 = scalar_select %p823_p6, 3, 4 }
 0x162   : > { %s2302_s9 = sshll.u32 %s1244_s8, 3 }
 0x163   : > { %s3360_s18 = sshra.s32 %s2302_s9, 3 }
 0x164   : > { %1004 = vmatpush1.bf16.msra.mxu0 %v3141_v9  ;;  %1045 = vmatpush1.bf16.msra.mxu1 %v3151_v10  ;;  %s2350_s14 = sshll.u32 %s3360_s18, 5  ;;  %s2308_s15 = sshll.u32 %s3360_s18, 2 }
 0x165   : > { %1005 = vmatprep.subr.bf16.mxu0 %v3146_v11  ;;  %1046 = vmatprep.subr.bf16.mxu1 %v3156_v12  ;;  %s1250_s11 = scalar_lea.vmem [#allocation2], %s2350_s14  ;;  %s1372_s23 = scalar_lea.vmem %s2937_s26, %s2308_s15 }
 0x166   : > { %s1504_s30 = scalar_select %p823_p6, 4, 3 }
 0x167   : > { %s1634_s15 = scalar_select %p823_p6, 5, 2 }
 0x168   : > { %1006 = vmatpush1.bf16.msra.mxu0 %v3161_v13  ;;  %1047 = vmatpush1.bf16.msra.mxu1 %v3171_v14 }
 0x169   : > { %1007 = vmatprep.subr.bf16.mxu0 %v3166_v15  ;;  %1048 = vmatprep.subr.bf16.mxu1 %v3176_v16 }
 0x16c   : > { %1008 = vmatpush1.bf16.msra.mxu0 %v3181_v17  ;;  %1049 = vmatpush1.bf16.msra.mxu1 %v3191_v18 }
 0x16d   : > { %1009 = vmatprep.subr.bf16.mxu0 %v3186_v19  ;;  %1050 = vmatprep.subr.bf16.mxu1 %v3196_v20 }
 0x170   : > { %1010 = vmatpush1.bf16.msra.mxu0 %v3201_v21  ;;  %1051 = vmatpush1.bf16.msra.mxu1 %v3211_v22 }
 0x171   : > { %1011 = vmatprep.subr.bf16.mxu0 %v3206_v23  ;;  %1052 = vmatprep.subr.bf16.mxu1 %v3216_v24 }
 0x174   : > { %1012 = vmatpush1.bf16.msra.mxu0 %v3221_v25  ;;  %1053 = vmatpush1.bf16.msra.mxu1 %v3227_v26 }
 0x175   : > { %1127 = vmatprep.subr.bf16.mxu0 %v3072_v46  ;;  %1168 = vmatprep.subr.bf16.mxu1 %v3085_v59 }
 0x177   : > { %1030 = vmatmul.mubr.bf16.vlgmr.msra.gmra.mrb[16].mxu0 %v836_v28  ;;  %1071 = vmatmul.mubr.bf16.vlgmr.msra.gmra.mrb[16].mxu1 %v836_v28 }
 0x178   : > { %1128 = vmatpush1.bf16.msra.mxu0 %v3076_v47  ;;  %1169 = vmatpush1.bf16.msra.mxu1 %v3091_v60 }
 0x179   : > { %1129 = vmatprep.subr.bf16.mxu0 %v3080_v48  ;;  %1170 = vmatprep.subr.bf16.mxu1 %v3095_v1 }
 0x17a   : > { %1159 = vmatprep.mubr.bf16.mxu0 %v2712_v0  ;;  %1200 = vmatprep.mubr.bf16.mxu1 %v2712_v0 }
 0x17c   : > { %1130 = vmatpush1.bf16.msra.mxu0 %v3100_v3  ;;  %1171 = vmatpush1.bf16.msra.mxu1 %v3111_v2 }
 0x17d   : > { %1131 = vmatprep.subr.bf16.mxu0 %v3106_v61  ;;  %1172 = vmatprep.subr.bf16.mxu1 %v3116_v4 }
 0x180   : > { %1132 = vmatpush1.bf16.msra.mxu0 %v3121_v5  ;;  %1173 = vmatpush1.bf16.msra.mxu1 %v3131_v6 }
 0x181   : > { %1133 = vmatprep.subr.bf16.mxu0 %v3126_v7  ;;  %1174 = vmatprep.subr.bf16.mxu1 %v3136_v8 }
 0x184   : > { %1134 = vmatpush1.bf16.msra.mxu0 %v3141_v9  ;;  %1175 = vmatpush1.bf16.msra.mxu1 %v3151_v10 }
 0x185   : > { %1135 = vmatprep.subr.bf16.mxu0 %v3146_v11  ;;  %1176 = vmatprep.subr.bf16.mxu1 %v3156_v12 }
 0x188   : > { %1136 = vmatpush1.bf16.msra.mxu0 %v3161_v13  ;;  %1177 = vmatpush1.bf16.msra.mxu1 %v3171_v14 }
 0x189   : > { %1137 = vmatprep.subr.bf16.mxu0 %v3166_v15  ;;  %1178 = vmatprep.subr.bf16.mxu1 %v3176_v16 }
 0x18c   : > { %1138 = vmatpush1.bf16.msra.mxu0 %v3181_v17  ;;  %1179 = vmatpush1.bf16.msra.mxu1 %v3191_v18 }
 0x18d   : > { %1139 = vmatprep.subr.bf16.mxu0 %v3186_v19  ;;  %1180 = vmatprep.subr.bf16.mxu1 %v3196_v20 }
 0x190   : > { %1140 = vmatpush1.bf16.msra.mxu0 %v3201_v21  ;;  %1181 = vmatpush1.bf16.msra.mxu1 %v3211_v22 }
 0x191   : > { %1141 = vmatprep.subr.bf16.mxu0 %v3206_v23  ;;  %1182 = vmatprep.subr.bf16.mxu1 %v3216_v24 }
 0x194   : > { %1142 = vmatpush1.bf16.msra.mxu0 %v3221_v25  ;;  %1183 = vmatpush1.bf16.msra.mxu1 %v3227_v26 }
 0x195   : > { %1257 = vmatprep.subr.bf16.mxu0 %v3072_v46  ;;  %1298 = vmatprep.subr.bf16.mxu1 %v3085_v59 }
 0x24a   : > { %v1031_v31 = vpop.f32.mrb[16].mxu0  ;;  %v1072_v63 = vpop.f32.mrb[16].mxu1 }
 0x24b   : > { %v1079_v32 = vadd.f32 %v1031_v31, %v831_v29  ;;  %v1033_v62 = vpop.f32.mrb[17].mxu0  ;;  %v1074_v35 = vpop.f32.mrb[17].mxu1  ;;  %v1081_v49 = vadd.f32 %v1072_v63, %v833_v43  ;;  %v1121_v63 = vld [vmem:[%s1120_s5] sm:$0xff] }
 0x24c   : > { %v1080_v33 = vadd.f32 %v1033_v62, %v832_v30  ;;  %v1035_v34 = vpop.f32.mrb[18].mxu0  ;;  %v1076_v38 = vpop.f32.mrb[18].mxu1  ;;  %v1082_v42 = vadd.f32 %v1074_v35, %v834_v40 }
 0x24d   : > { %v2291_v36 = vmul.f32 -1.442695, %v1079_v32  ;;  %v1036_v37 = vpop.f32.mrb[19].mxu0  ;;  %v1077_v41 = vpop.f32.mrb[19].mxu1 }
 0x24e   : > { %v2292_v39 = vmul.f32 -1.442695, %v1080_v33  ;;  %v2293_v44 = vmul.f32 -1.442695, %v1082_v42  ;;  %v1122_v33 = vld [vmem:[%s1120_s5 + $0x8] sm:$0xff] }
 0x24f   : > { %2483 = vpow2.f32 %v2291_v36 }
 0x250   : > { %2485 = vpow2.f32 %v2292_v39 }
 0x251   : > { %2487 = vpow2.f32 %v2293_v44 }
 0x252   : > { %2489 = vtanh.f32 %v1081_v49 }
 0x259   : > { %v2484_v50 = vpop.eup %2483 }
 0x25a   : > { %v2486_v51 = vpop.eup %2485  ;;  %v1086_v52 = vadd.f32 1.0, %v2484_v50  ;;  %v1124_v50 = vld [vmem:[%s1120_s5 + $0x18] sm:$0xff] }
 0x25b   : > { %v1092_v53 = vadd.f32 1.0, %v2486_v51  ;;  %v2488_v54 = vpop.eup %2487 }
 0x25c   : > { %2491 = vrcp.f32 %v1086_v52  ;;  %v2490_v55 = vpop.eup %2489  ;;  %v1099_v58 = vadd.f32 1.0, %v2488_v54  ;;  %v1123_v52 = vld [vmem:[%s1120_s5 + $0x10] sm:$0xff] }
 0x25d   : > { %2493 = vrcp.f32 %v1092_v53 }
 0x25e   : > { %2495 = vrcp.f32 %v1099_v58 }
 0x266   : > { %v2492_v57 = vpop.eup %2491 }
 0x267   : > { %v2494_v45 = vpop.eup %2493  ;;  %v1104_v27 = vmul.f32 %v2492_v57, %v2490_v55 }
 0x268   : > { %v1103_v28 = vmul.f32 %v2494_v45, %v1102_v56  ;;  %v2496_v30 = vpop.eup %2495 }
 0x26a   : > { %v3274_v29 = vadd.f32 %v1104_v27, %v1103_v28 }
 0x26c   : > { %2497 = vtanh.f32 %v3274_v29 }
 0x276   : > { %v2498_v31 = vpop.eup %2497 }
 0x277   : > { %v1107_v32 = vmul.f32 %v2498_v31, %v2496_v30 }
 0x279   : > { %v1110_v62 = vpack.c.bf16 %v1107_v32, %v1107_v32 }
 0x27b   : > { %1113 = vst [vmem:[%s1112_s10] sm:$0xf] %v1110_v62  ;;  %1160 = vmatmul.mubr.bf16.vlgmr.msra.gmra.mrb[20].mxu0 %v1110_v62  ;;  %1201 = vmatmul.mubr.bf16.vlgmr.msra.gmra.mrb[20].mxu1 %v1110_v62  ;;  %s2309_s10 = sshll.u32 %s1374_s27, 3 }
 0x27c   : > { %1258 = vmatpush1.bf16.msra.mxu0 %v3076_v47  ;;  %1299 = vmatpush1.bf16.msra.mxu1 %v3091_v60  ;;  %s3405_s28 = sshra.s32 %s2309_s10, 3 }
 0x27d   : > { %1259 = vmatprep.subr.bf16.mxu0 %v3080_v48  ;;  %1300 = vmatprep.subr.bf16.mxu1 %v3095_v1  ;;  %s2351_s29 = sshll.u32 %s3405_s28, 5  ;;  %s2315_s13 = sshll.u32 %s3405_s28, 2 }
 0x27e   : > { %1289 = vmatprep.mubr.bf16.mxu0 %v2712_v0  ;;  %1330 = vmatprep.mubr.bf16.mxu1 %v2712_v0  ;;  %s1380_s12 = scalar_lea.vmem [#allocation2], %s2351_s29  ;;  %s1502_s5 = scalar_lea.vmem %s2937_s26, %s2315_s13 }
 0x27f   : > { %s1764_s13 = scalar_select %p823_p6, 6, 1 }
 0x280   : > { %1260 = vmatpush1.bf16.msra.mxu0 %v3100_v3  ;;  %1301 = vmatpush1.bf16.msra.mxu1 %v3111_v2 }
 0x281   : > { %1261 = vmatprep.subr.bf16.mxu0 %v3106_v61  ;;  %1302 = vmatprep.subr.bf16.mxu1 %v3116_v4 }
 0x284   : > { %1262 = vmatpush1.bf16.msra.mxu0 %v3121_v5  ;;  %1303 = vmatpush1.bf16.msra.mxu1 %v3131_v6 }
 0x285   : > { %1263 = vmatprep.subr.bf16.mxu0 %v3126_v7  ;;  %1304 = vmatprep.subr.bf16.mxu1 %v3136_v8 }
 0x288   : > { %1264 = vmatpush1.bf16.msra.mxu0 %v3141_v9  ;;  %1305 = vmatpush1.bf16.msra.mxu1 %v3151_v10 }
 0x289   : > { %1265 = vmatprep.subr.bf16.mxu0 %v3146_v11  ;;  %1306 = vmatprep.subr.bf16.mxu1 %v3156_v12 }
 0x28c   : > { %1266 = vmatpush1.bf16.msra.mxu0 %v3161_v13  ;;  %1307 = vmatpush1.bf16.msra.mxu1 %v3171_v14 }
 0x28d   : > { %1267 = vmatprep.subr.bf16.mxu0 %v3166_v15  ;;  %1308 = vmatprep.subr.bf16.mxu1 %v3176_v16 }
 0x290   : > { %1268 = vmatpush1.bf16.msra.mxu0 %v3181_v17  ;;  %1309 = vmatpush1.bf16.msra.mxu1 %v3191_v18 }
 0x291   : > { %1269 = vmatprep.subr.bf16.mxu0 %v3186_v19  ;;  %1310 = vmatprep.subr.bf16.mxu1 %v3196_v20 }
 0x294   : > { %1270 = vmatpush1.bf16.msra.mxu0 %v3201_v21  ;;  %1311 = vmatpush1.bf16.msra.mxu1 %v3211_v22 }
 0x295   : > { %1271 = vmatprep.subr.bf16.mxu0 %v3206_v23  ;;  %1312 = vmatprep.subr.bf16.mxu1 %v3216_v24 }
 0x298   : > { %1272 = vmatpush1.bf16.msra.mxu0 %v3221_v25  ;;  %1313 = vmatpush1.bf16.msra.mxu1 %v3227_v26 }
 0x299   : > { %1387 = vmatprep.subr.bf16.mxu0 %v3072_v46  ;;  %1428 = vmatprep.subr.bf16.mxu1 %v3085_v59 }
 0x34e   : > { %v1161_v34 = vpop.f32.mrb[20].mxu0  ;;  %v1202_v35 = vpop.f32.mrb[20].mxu1 }
 0x34f   : > { %v1209_v36 = vadd.f32 %v1161_v34, %v1121_v63  ;;  %v1163_v37 = vpop.f32.mrb[21].mxu0  ;;  %v1204_v38 = vpop.f32.mrb[21].mxu1  ;;  %v1211_v54 = vadd.f32 %v1202_v35, %v1123_v52 }
 0x350   : > { %v1210_v39 = vadd.f32 %v1163_v37, %v1122_v33  ;;  %v1165_v40 = vpop.f32.mrb[22].mxu0  ;;  %v1206_v41 = vpop.f32.mrb[22].mxu1  ;;  %v1212_v51 = vadd.f32 %v1204_v38, %v1124_v50  ;;  %v1252_v37 = vld [vmem:[%s1250_s11 + $0x8] sm:$0xff] }
 0x351   : > { %v2298_v42 = vmul.f32 -1.442695, %v1209_v36  ;;  %v1166_v43 = vpop.f32.mrb[23].mxu0  ;;  %v1207_v44 = vpop.f32.mrb[23].mxu1 }
 0x352   : > { %v2299_v49 = vmul.f32 -1.442695, %v1210_v39  ;;  %v2300_v53 = vmul.f32 -1.442695, %v1212_v51 }
 0x353   : > { %2499 = vpow2.f32 %v2298_v42 }
 0x354   : > { %2501 = vpow2.f32 %v2299_v49 }
 0x355   : > { %2503 = vpow2.f32 %v2300_v53 }
 0x356   : > { %2505 = vtanh.f32 %v1211_v54  ;;  %v1254_v54 = vld [vmem:[%s1250_s11 + $0x18] sm:$0xff] }
 0x35d   : > { %v2500_v55 = vpop.eup %2499 }
 0x35e   : > { %v2502_v56 = vpop.eup %2501  ;;  %v1216_v57 = vadd.f32 1.0, %v2500_v55 }
 0x35f   : > { %v1222_v58 = vadd.f32 1.0, %v2502_v56  ;;  %v2504_v45 = vpop.eup %2503  ;;  %v1253_v56 = vld [vmem:[%s1250_s11 + $0x10] sm:$0xff] }
 0x360   : > { %2507 = vrcp.f32 %v1216_v57  ;;  %v2506_v27 = vpop.eup %2505  ;;  %v1229_v32 = vadd.f32 1.0, %v2504_v45 }
 0x361   : > { %2509 = vrcp.f32 %v1222_v58 }
 0x362   : > { %2511 = vrcp.f32 %v1229_v32 }
 0x36a   : > { %v2508_v28 = vpop.eup %2507 }
 0x36b   : > { %v2510_v30 = vpop.eup %2509  ;;  %v1234_v31 = vmul.f32 %v2508_v28, %v2506_v27 }
 0x36c   : > { %v1233_v62 = vmul.f32 %v2510_v30, %v3274_v29  ;;  %v2512_v33 = vpop.eup %2511  ;;  %v1251_v29 = vld [vmem:[%s1250_s11] sm:$0xff] }
 0x36e   : > { %v3319_v63 = vadd.f32 %v1234_v31, %v1233_v62 }
 0x370   : > { %2513 = vtanh.f32 %v3319_v63 }
 0x37a   : > { %v2514_v34 = vpop.eup %2513 }
 0x37b   : > { %v1237_v35 = vmul.f32 %v2514_v34, %v2512_v33 }
 0x37d   : > { %v1240_v36 = vpack.c.bf16 %v1237_v35, %v1237_v35 }
 0x37f   : > { %1243 = vst [vmem:[%s1242_s6] sm:$0xf] %v1240_v36  ;;  %1290 = vmatmul.mubr.bf16.vlgmr.msra.gmra.mrb[24].mxu0 %v1240_v36  ;;  %1331 = vmatmul.mubr.bf16.vlgmr.msra.gmra.mrb[24].mxu1 %v1240_v36  ;;  %s2316_s6 = sshll.u32 %s1504_s30, 3 }
 0x380   : > { %1388 = vmatpush1.bf16.msra.mxu0 %v3076_v47  ;;  %1429 = vmatpush1.bf16.msra.mxu1 %v3091_v60  ;;  %s3450_s8 = sshra.s32 %s2316_s6, 3 }
 0x381   : > { %1389 = vmatprep.subr.bf16.mxu0 %v3080_v48  ;;  %1430 = vmatprep.subr.bf16.mxu1 %v3095_v1  ;;  %s2352_s9 = sshll.u32 %s3450_s8, 5  ;;  %s2322_s14 = sshll.u32 %s3450_s8, 2 }
 0x382   : > { %1419 = vmatprep.mubr.bf16.mxu0 %v2712_v0  ;;  %1460 = vmatprep.mubr.bf16.mxu1 %v2712_v0  ;;  %s1510_s18 = scalar_lea.vmem [#allocation2], %s2352_s9  ;;  %s1632_s11 = scalar_lea.vmem %s2937_s26, %s2322_s14 }
 0x383   : > { %s1894_s14 = scalar_select %p823_p6, 7, 0 }
 0x384   : > { %1390 = vmatpush1.bf16.msra.mxu0 %v3100_v3  ;;  %1431 = vmatpush1.bf16.msra.mxu1 %v3111_v2 }
 0x385   : > { %1391 = vmatprep.subr.bf16.mxu0 %v3106_v61  ;;  %1432 = vmatprep.subr.bf16.mxu1 %v3116_v4 }
 0x388   : > { %1392 = vmatpush1.bf16.msra.mxu0 %v3121_v5  ;;  %1433 = vmatpush1.bf16.msra.mxu1 %v3131_v6 }
 0x389   : > { %1393 = vmatprep.subr.bf16.mxu0 %v3126_v7  ;;  %1434 = vmatprep.subr.bf16.mxu1 %v3136_v8 }
 0x38c   : > { %1394 = vmatpush1.bf16.msra.mxu0 %v3141_v9  ;;  %1435 = vmatpush1.bf16.msra.mxu1 %v3151_v10 }
 0x38d   : > { %1395 = vmatprep.subr.bf16.mxu0 %v3146_v11  ;;  %1436 = vmatprep.subr.bf16.mxu1 %v3156_v12 }
 0x390   : > { %1396 = vmatpush1.bf16.msra.mxu0 %v3161_v13  ;;  %1437 = vmatpush1.bf16.msra.mxu1 %v3171_v14 }
 0x391   : > { %1397 = vmatprep.subr.bf16.mxu0 %v3166_v15  ;;  %1438 = vmatprep.subr.bf16.mxu1 %v3176_v16 }
 0x394   : > { %1398 = vmatpush1.bf16.msra.mxu0 %v3181_v17  ;;  %1439 = vmatpush1.bf16.msra.mxu1 %v3191_v18 }
 0x395   : > { %1399 = vmatprep.subr.bf16.mxu0 %v3186_v19  ;;  %1440 = vmatprep.subr.bf16.mxu1 %v3196_v20 }
 0x398   : > { %1400 = vmatpush1.bf16.msra.mxu0 %v3201_v21  ;;  %1441 = vmatpush1.bf16.msra.mxu1 %v3211_v22 }
 0x399   : > { %1401 = vmatprep.subr.bf16.mxu0 %v3206_v23  ;;  %1442 = vmatprep.subr.bf16.mxu1 %v3216_v24 }
 0x39c   : > { %1402 = vmatpush1.bf16.msra.mxu0 %v3221_v25  ;;  %1443 = vmatpush1.bf16.msra.mxu1 %v3227_v26 }
 0x39d   : > { %1517 = vmatprep.subr.bf16.mxu0 %v3072_v46  ;;  %1558 = vmatprep.subr.bf16.mxu1 %v3085_v59 }
 0x452   : > { %v1291_v38 = vpop.f32.mrb[24].mxu0  ;;  %v1332_v39 = vpop.f32.mrb[24].mxu1 }
 0x453   : > { %v1339_v40 = vadd.f32 %v1291_v38, %v1251_v29  ;;  %v1293_v41 = vpop.f32.mrb[25].mxu0  ;;  %v1334_v42 = vpop.f32.mrb[25].mxu1  ;;  %v1341_v58 = vadd.f32 %v1332_v39, %v1253_v56 }
 0x454   : > { %v1340_v43 = vadd.f32 %v1293_v41, %v1252_v37  ;;  %v1295_v44 = vpop.f32.mrb[26].mxu0  ;;  %v1336_v49 = vpop.f32.mrb[26].mxu1  ;;  %v1342_v55 = vadd.f32 %v1334_v42, %v1254_v54  ;;  %v1382_v41 = vld [vmem:[%s1380_s12 + $0x8] sm:$0xff] }
 0x455   : > { %v2305_v50 = vmul.f32 -1.442695, %v1339_v40  ;;  %v1296_v51 = vpop.f32.mrb[27].mxu0  ;;  %v1337_v52 = vpop.f32.mrb[27].mxu1 }
 0x456   : > { %v2306_v53 = vmul.f32 -1.442695, %v1340_v43  ;;  %v2307_v57 = vmul.f32 -1.442695, %v1342_v55 }
 0x457   : > { %2515 = vpow2.f32 %v2305_v50 }
 0x458   : > { %2517 = vpow2.f32 %v2306_v53 }
 0x459   : > { %2519 = vpow2.f32 %v2307_v57 }
 0x45a   : > { %2521 = vtanh.f32 %v1341_v58  ;;  %v1384_v58 = vld [vmem:[%s1380_s12 + $0x18] sm:$0xff] }
 0x461   : > { %v2516_v45 = vpop.eup %2515 }
 0x462   : > { %v2518_v27 = vpop.eup %2517  ;;  %v1346_v28 = vadd.f32 1.0, %v2516_v45 }
 0x463   : > { %v1352_v30 = vadd.f32 1.0, %v2518_v27  ;;  %v2520_v31 = vpop.eup %2519  ;;  %v1383_v27 = vld [vmem:[%s1380_s12 + $0x10] sm:$0xff] }
 0x464   : > { %2523 = vrcp.f32 %v1346_v28  ;;  %v2522_v32 = vpop.eup %2521  ;;  %v1359_v35 = vadd.f32 1.0, %v2520_v31 }
 0x465   : > { %2525 = vrcp.f32 %v1352_v30 }
 0x466   : > { %2527 = vrcp.f32 %v1359_v35 }
 0x46e   : > { %v2524_v62 = vpop.eup %2523 }
 0x46f   : > { %v2526_v33 = vpop.eup %2525  ;;  %v1364_v34 = vmul.f32 %v2524_v62, %v2522_v32 }
 0x470   : > { %v1363_v36 = vmul.f32 %v2526_v33, %v3319_v63  ;;  %v2528_v37 = vpop.eup %2527  ;;  %v1381_v63 = vld [vmem:[%s1380_s12] sm:$0xff] }
 0x472   : > { %v3364_v29 = vadd.f32 %v1364_v34, %v1363_v36 }
 0x474   : > { %2529 = vtanh.f32 %v3364_v29 }
 0x47e   : > { %v2530_v38 = vpop.eup %2529 }
 0x47f   : > { %v1367_v39 = vmul.f32 %v2530_v38, %v2528_v37 }
 0x481   : > { %v1370_v40 = vpack.c.bf16 %v1367_v39, %v1367_v39 }
 0x483   : > { %1373 = vst [vmem:[%s1372_s23] sm:$0xf] %v1370_v40  ;;  %1420 = vmatmul.mubr.bf16.vlgmr.msra.gmra.mrb[28].mxu0 %v1370_v40  ;;  %1461 = vmatmul.mubr.bf16.vlgmr.msra.gmra.mrb[28].mxu1 %v1370_v40  ;;  %s2323_s23 = sshll.u32 %s1634_s15, 3 }
 0x484   : > { %1518 = vmatpush1.bf16.msra.mxu0 %v3076_v47  ;;  %1559 = vmatpush1.bf16.msra.mxu1 %v3091_v60  ;;  %s3495_s27 = sshra.s32 %s2323_s23, 3 }
 0x485   : > { %1519 = vmatprep.subr.bf16.mxu0 %v3080_v48  ;;  %1560 = vmatprep.subr.bf16.mxu1 %v3095_v1  ;;  %s2353_s10 = sshll.u32 %s3495_s27, 5  ;;  %s2329_s29 = sshll.u32 %s3495_s27, 2 }
 0x486   : > { %1549 = vmatprep.mubr.bf16.mxu0 %v2712_v0  ;;  %1590 = vmatprep.mubr.bf16.mxu1 %v2712_v0  ;;  %s1640_s28 = scalar_lea.vmem [#allocation2], %s2353_s10  ;;  %s1762_s12 = scalar_lea.vmem %s2937_s26, %s2329_s29 }
 0x488   : > { %1520 = vmatpush1.bf16.msra.mxu0 %v3100_v3  ;;  %1561 = vmatpush1.bf16.msra.mxu1 %v3111_v2 }
 0x489   : > { %1521 = vmatprep.subr.bf16.mxu0 %v3106_v61  ;;  %1562 = vmatprep.subr.bf16.mxu1 %v3116_v4 }
 0x48c   : > { %1522 = vmatpush1.bf16.msra.mxu0 %v3121_v5  ;;  %1563 = vmatpush1.bf16.msra.mxu1 %v3131_v6 }
 0x48d   : > { %1523 = vmatprep.subr.bf16.mxu0 %v3126_v7  ;;  %1564 = vmatprep.subr.bf16.mxu1 %v3136_v8 }
 0x490   : > { %1524 = vmatpush1.bf16.msra.mxu0 %v3141_v9  ;;  %1565 = vmatpush1.bf16.msra.mxu1 %v3151_v10 }
 0x491   : > { %1525 = vmatprep.subr.bf16.mxu0 %v3146_v11  ;;  %1566 = vmatprep.subr.bf16.mxu1 %v3156_v12 }
 0x494   : > { %1526 = vmatpush1.bf16.msra.mxu0 %v3161_v13  ;;  %1567 = vmatpush1.bf16.msra.mxu1 %v3171_v14 }
 0x495   : > { %1527 = vmatprep.subr.bf16.mxu0 %v3166_v15  ;;  %1568 = vmatprep.subr.bf16.mxu1 %v3176_v16 }
 0x498   : > { %1528 = vmatpush1.bf16.msra.mxu0 %v3181_v17  ;;  %1569 = vmatpush1.bf16.msra.mxu1 %v3191_v18 }
 0x499   : > { %1529 = vmatprep.subr.bf16.mxu0 %v3186_v19  ;;  %1570 = vmatprep.subr.bf16.mxu1 %v3196_v20 }
 0x49c   : > { %1530 = vmatpush1.bf16.msra.mxu0 %v3201_v21  ;;  %1571 = vmatpush1.bf16.msra.mxu1 %v3211_v22 }
 0x49d   : > { %1531 = vmatprep.subr.bf16.mxu0 %v3206_v23  ;;  %1572 = vmatprep.subr.bf16.mxu1 %v3216_v24 }
 0x4a0   : > { %1532 = vmatpush1.bf16.msra.mxu0 %v3221_v25  ;;  %1573 = vmatpush1.bf16.msra.mxu1 %v3227_v26 }
 0x4a1   : > { %1647 = vmatprep.subr.bf16.mxu0 %v3072_v46  ;;  %1688 = vmatprep.subr.bf16.mxu1 %v3085_v59 }
 0x556   : > { %v1421_v42 = vpop.f32.mrb[28].mxu0  ;;  %v1462_v43 = vpop.f32.mrb[28].mxu1 }
 0x557   : > { %v1469_v44 = vadd.f32 %v1421_v42, %v1381_v63  ;;  %v1423_v49 = vpop.f32.mrb[29].mxu0  ;;  %v1464_v50 = vpop.f32.mrb[29].mxu1  ;;  %v1471_v30 = vadd.f32 %v1462_v43, %v1383_v27 }
 0x558   : > { %v1470_v51 = vadd.f32 %v1423_v49, %v1382_v41  ;;  %v1425_v52 = vpop.f32.mrb[30].mxu0  ;;  %v1466_v53 = vpop.f32.mrb[30].mxu1  ;;  %v1472_v45 = vadd.f32 %v1464_v50, %v1384_v58  ;;  %v1512_v49 = vld [vmem:[%s1510_s18 + $0x8] sm:$0xff] }
 0x559   : > { %v2312_v54 = vmul.f32 -1.442695, %v1469_v44  ;;  %v1426_v55 = vpop.f32.mrb[31].mxu0  ;;  %v1467_v56 = vpop.f32.mrb[31].mxu1 }
 0x55a   : > { %v2313_v57 = vmul.f32 -1.442695, %v1470_v51  ;;  %v2314_v28 = vmul.f32 -1.442695, %v1472_v45 }
 0x55b   : > { %2531 = vpow2.f32 %v2312_v54 }
 0x55c   : > { %2533 = vpow2.f32 %v2313_v57 }
 0x55d   : > { %2535 = vpow2.f32 %v2314_v28 }
 0x55e   : > { %2537 = vtanh.f32 %v1471_v30  ;;  %v1514_v30 = vld [vmem:[%s1510_s18 + $0x18] sm:$0xff] }
 0x565   : > { %v2532_v31 = vpop.eup %2531 }
 0x566   : > { %v2534_v32 = vpop.eup %2533  ;;  %v1476_v62 = vadd.f32 1.0, %v2532_v31 }
 0x567   : > { %v1482_v33 = vadd.f32 1.0, %v2534_v32  ;;  %v2536_v34 = vpop.eup %2535  ;;  %v1513_v32 = vld [vmem:[%s1510_s18 + $0x10] sm:$0xff] }
 0x568   : > { %2539 = vrcp.f32 %v1476_v62  ;;  %v2538_v35 = vpop.eup %2537  ;;  %v1489_v39 = vadd.f32 1.0, %v2536_v34 }
 0x569   : > { %2541 = vrcp.f32 %v1482_v33 }
 0x56a   : > { %2543 = vrcp.f32 %v1489_v39 }
 0x572   : > { %v2540_v36 = vpop.eup %2539 }
 0x573   : > { %v2542_v37 = vpop.eup %2541  ;;  %v1494_v38 = vmul.f32 %v2540_v36, %v2538_v35 }
 0x574   : > { %v1493_v40 = vmul.f32 %v2542_v37, %v3364_v29  ;;  %v2544_v41 = vpop.eup %2543  ;;  %v1511_v29 = vld [vmem:[%s1510_s18] sm:$0xff] }
 0x576   : > { %v3409_v63 = vadd.f32 %v1494_v38, %v1493_v40 }
 0x578   : > { %2545 = vtanh.f32 %v3409_v63 }
 0x582   : > { %v2546_v42 = vpop.eup %2545 }
 0x583   : > { %v1497_v43 = vmul.f32 %v2546_v42, %v2544_v41 }
 0x585   : > { %v1500_v44 = vpack.c.bf16 %v1497_v43, %v1497_v43 }
 0x587   : > { %1503 = vst [vmem:[%s1502_s5] sm:$0xf] %v1500_v44  ;;  %1550 = vmatmul.mubr.bf16.vlgmr.msra.gmra.mrb[32].mxu0 %v1500_v44  ;;  %1591 = vmatmul.mubr.bf16.vlgmr.msra.gmra.mrb[32].mxu1 %v1500_v44  ;;  %s2330_s5 = sshll.u32 %s1764_s13, 3 }
 0x588   : > { %1648 = vmatpush1.bf16.msra.mxu0 %v3076_v47  ;;  %1689 = vmatpush1.bf16.msra.mxu1 %v3091_v60  ;;  %s3538_s30 = sshra.s32 %s2330_s5, 3 }
 0x589   : > { %1649 = vmatprep.subr.bf16.mxu0 %v3080_v48  ;;  %1690 = vmatprep.subr.bf16.mxu1 %v3095_v1  ;;  %s2354_s6 = sshll.u32 %s3538_s30, 5  ;;  %s2336_s9 = sshll.u32 %s3538_s30, 2 }
 0x58a   : > { %1679 = vmatprep.mubr.bf16.mxu0 %v2712_v0  ;;  %1720 = vmatprep.mubr.bf16.mxu1 %v2712_v0  ;;  %s1770_s8 = scalar_lea.vmem [#allocation2], %s2354_s6  ;;  %s1892_s18 = scalar_lea.vmem %s2937_s26, %s2336_s9 }
 0x58c   : > { %1650 = vmatpush1.bf16.msra.mxu0 %v3100_v3  ;;  %1691 = vmatpush1.bf16.msra.mxu1 %v3111_v2 }
 0x58d   : > { %1651 = vmatprep.subr.bf16.mxu0 %v3106_v61  ;;  %1692 = vmatprep.subr.bf16.mxu1 %v3116_v4 }
 0x590   : > { %1652 = vmatpush1.bf16.msra.mxu0 %v3121_v5  ;;  %1693 = vmatpush1.bf16.msra.mxu1 %v3131_v6 }
 0x591   : > { %1653 = vmatprep.subr.bf16.mxu0 %v3126_v7  ;;  %1694 = vmatprep.subr.bf16.mxu1 %v3136_v8 }
 0x594   : > { %1654 = vmatpush1.bf16.msra.mxu0 %v3141_v9  ;;  %1695 = vmatpush1.bf16.msra.mxu1 %v3151_v10 }
 0x595   : > { %1655 = vmatprep.subr.bf16.mxu0 %v3146_v11  ;;  %1696 = vmatprep.subr.bf16.mxu1 %v3156_v12 }
 0x598   : > { %1656 = vmatpush1.bf16.msra.mxu0 %v3161_v13  ;;  %1697 = vmatpush1.bf16.msra.mxu1 %v3171_v14 }
 0x599   : > { %1657 = vmatprep.subr.bf16.mxu0 %v3166_v15  ;;  %1698 = vmatprep.subr.bf16.mxu1 %v3176_v16 }
 0x59c   : > { %1658 = vmatpush1.bf16.msra.mxu0 %v3181_v17  ;;  %1699 = vmatpush1.bf16.msra.mxu1 %v3191_v18 }
 0x59d   : > { %1659 = vmatprep.subr.bf16.mxu0 %v3186_v19  ;;  %1700 = vmatprep.subr.bf16.mxu1 %v3196_v20 }
 0x5a0   : > { %1660 = vmatpush1.bf16.msra.mxu0 %v3201_v21  ;;  %1701 = vmatpush1.bf16.msra.mxu1 %v3211_v22 }
 0x5a1   : > { %1661 = vmatprep.subr.bf16.mxu0 %v3206_v23  ;;  %1702 = vmatprep.subr.bf16.mxu1 %v3216_v24 }
 0x5a4   : > { %1662 = vmatpush1.bf16.msra.mxu0 %v3221_v25  ;;  %1703 = vmatpush1.bf16.msra.mxu1 %v3227_v26 }
 0x5a5   : > { %1777 = vmatprep.subr.bf16.mxu0 %v3072_v46  ;;  %1818 = vmatprep.subr.bf16.mxu1 %v3085_v59 }
 0x65a   : > { %v1551_v50 = vpop.f32.mrb[32].mxu0  ;;  %v1592_v51 = vpop.f32.mrb[32].mxu1 }
 0x65b   : > { %v1599_v52 = vadd.f32 %v1551_v50, %v1511_v29  ;;  %v1553_v53 = vpop.f32.mrb[33].mxu0  ;;  %v1594_v54 = vpop.f32.mrb[33].mxu1  ;;  %v1601_v33 = vadd.f32 %v1592_v51, %v1513_v32  ;;  %v1644_v32 = vld [vmem:[%s1640_s28 + $0x18] sm:$0xff] }
 0x65c   : > { %v1600_v55 = vadd.f32 %v1553_v53, %v1512_v49  ;;  %v1555_v56 = vpop.f32.mrb[34].mxu0  ;;  %v1596_v57 = vpop.f32.mrb[34].mxu1  ;;  %v1602_v31 = vadd.f32 %v1594_v54, %v1514_v30  ;;  %v1642_v53 = vld [vmem:[%s1640_s28 + $0x8] sm:$0xff] }
 0x65d   : > { %v2319_v58 = vmul.f32 -1.442695, %v1599_v52  ;;  %v1556_v45 = vpop.f32.mrb[35].mxu0  ;;  %v1597_v27 = vpop.f32.mrb[35].mxu1 }
 0x65e   : > { %v2320_v28 = vmul.f32 -1.442695, %v1600_v55  ;;  %v2321_v62 = vmul.f32 -1.442695, %v1602_v31 }
 0x65f   : > { %2547 = vpow2.f32 %v2319_v58 }
 0x660   : > { %2549 = vpow2.f32 %v2320_v28 }
 0x661   : > { %2551 = vpow2.f32 %v2321_v62 }
 0x662   : > { %2553 = vtanh.f32 %v1601_v33  ;;  %v1643_v33 = vld [vmem:[%s1640_s28 + $0x10] sm:$0xff] }
 0x669   : > { %v2548_v34 = vpop.eup %2547 }
 0x66a   : > { %v2550_v35 = vpop.eup %2549  ;;  %v1606_v36 = vadd.f32 1.0, %v2548_v34 }
 0x66b   : > { %v1612_v37 = vadd.f32 1.0, %v2550_v35  ;;  %v2552_v38 = vpop.eup %2551 }
 0x66c   : > { %2555 = vrcp.f32 %v1606_v36  ;;  %v2554_v39 = vpop.eup %2553  ;;  %v1619_v43 = vadd.f32 1.0, %v2552_v38 }
 0x66d   : > { %2557 = vrcp.f32 %v1612_v37 }
 0x66e   : > { %2559 = vrcp.f32 %v1619_v43 }
 0x676   : > { %v2556_v40 = vpop.eup %2555 }
 0x677   : > { %v2558_v41 = vpop.eup %2557  ;;  %v1624_v42 = vmul.f32 %v2556_v40, %v2554_v39 }
 0x678   : > { %v1623_v44 = vmul.f32 %v2558_v41, %v3409_v63  ;;  %v2560_v49 = vpop.eup %2559  ;;  %v1641_v63 = vld [vmem:[%s1640_s28] sm:$0xff] }
 0x67a   : > { %v3454_v29 = vadd.f32 %v1624_v42, %v1623_v44 }
 0x67c   : > { %2561 = vtanh.f32 %v3454_v29 }
 0x686   : > { %v2562_v50 = vpop.eup %2561 }
 0x687   : > { %v1627_v51 = vmul.f32 %v2562_v50, %v2560_v49 }
 0x689   : > { %v1630_v52 = vpack.c.bf16 %v1627_v51, %v1627_v51 }
 0x68b   : > { %1633 = vst [vmem:[%s1632_s11] sm:$0xf] %v1630_v52  ;;  %1680 = vmatmul.mubr.bf16.vlgmr.msra.gmra.mrb[36].mxu0 %v1630_v52  ;;  %1721 = vmatmul.mubr.bf16.vlgmr.msra.gmra.mrb[36].mxu1 %v1630_v52  ;;  %s2337_s11 = sshll.u32 %s1894_s14, 3 }
 0x68c   : > { %1778 = vmatpush1.bf16.msra.mxu0 %v3076_v47  ;;  %1819 = vmatpush1.bf16.msra.mxu1 %v3091_v60  ;;  %s3546_s15 = sshra.s32 %s2337_s11, 3 }
 0x68d   : > { %1779 = vmatprep.subr.bf16.mxu0 %v3080_v48  ;;  %1820 = vmatprep.subr.bf16.mxu1 %v3095_v1  ;;  %s2355_s23 = sshll.u32 %s3546_s15, 5  ;;  %s2343_s19 = sshll.u32 %s3546_s15, 2 }
 0x68e   : > { %1809 = vmatprep.mubr.bf16.mxu0 %v2712_v0  ;;  %1850 = vmatprep.mubr.bf16.mxu1 %v2712_v0  ;;  %s1900_s27 = scalar_lea.vmem [#allocation2], %s2355_s23  ;;  %s2022_s10 = scalar_lea.vmem %s2937_s26, %s2343_s19 }
 0x690   : > { %1780 = vmatpush1.bf16.msra.mxu0 %v3100_v3  ;;  %1821 = vmatpush1.bf16.msra.mxu1 %v3111_v2 }
 0x691   : > { %1781 = vmatprep.subr.bf16.mxu0 %v3106_v61  ;;  %1822 = vmatprep.subr.bf16.mxu1 %v3116_v4 }
 0x694   : > { %1782 = vmatpush1.bf16.msra.mxu0 %v3121_v5  ;;  %1823 = vmatpush1.bf16.msra.mxu1 %v3131_v6 }
 0x695   : > { %1783 = vmatprep.subr.bf16.mxu0 %v3126_v7  ;;  %1824 = vmatprep.subr.bf16.mxu1 %v3136_v8 }
 0x698   : > { %1784 = vmatpush1.bf16.msra.mxu0 %v3141_v9  ;;  %1825 = vmatpush1.bf16.msra.mxu1 %v3151_v10 }
 0x699   : > { %1785 = vmatprep.subr.bf16.mxu0 %v3146_v11  ;;  %1826 = vmatprep.subr.bf16.mxu1 %v3156_v12 }
 0x69c   : > { %1786 = vmatpush1.bf16.msra.mxu0 %v3161_v13  ;;  %1827 = vmatpush1.bf16.msra.mxu1 %v3171_v14 }
 0x69d   : > { %1787 = vmatprep.subr.bf16.mxu0 %v3166_v15  ;;  %1828 = vmatprep.subr.bf16.mxu1 %v3176_v16 }
 0x6a0   : > { %1788 = vmatpush1.bf16.msra.mxu0 %v3181_v17  ;;  %1829 = vmatpush1.bf16.msra.mxu1 %v3191_v18 }
 0x6a1   : > { %1789 = vmatprep.subr.bf16.mxu0 %v3186_v19  ;;  %1830 = vmatprep.subr.bf16.mxu1 %v3196_v20 }
 0x6a4   : > { %1790 = vmatpush1.bf16.msra.mxu0 %v3201_v21  ;;  %1831 = vmatpush1.bf16.msra.mxu1 %v3211_v22 }
 0x6a5   : > { %1791 = vmatprep.subr.bf16.mxu0 %v3206_v23  ;;  %1832 = vmatprep.subr.bf16.mxu1 %v3216_v24 }
 0x6a8   : > { %1792 = vmatpush1.bf16.msra.mxu0 %v3221_v25  ;;  %1833 = vmatpush1.bf16.msra.mxu1 %v3227_v26 }
 0x6a9   : > { %1907 = vmatprep.subr.bf16.mxu0 %v3072_v46  ;;  %1948 = vmatprep.subr.bf16.mxu1 %v3085_v59 }
 0x75e   : > { %v1681_v54 = vpop.f32.mrb[36].mxu0  ;;  %v1722_v55 = vpop.f32.mrb[36].mxu1 }
 0x75f   : > { %v1729_v56 = vadd.f32 %v1681_v54, %v1641_v63  ;;  %v1683_v57 = vpop.f32.mrb[37].mxu0  ;;  %v1724_v58 = vpop.f32.mrb[37].mxu1  ;;  %v1731_v35 = vadd.f32 %v1722_v55, %v1643_v33 }
 0x760   : > { %v1730_v45 = vadd.f32 %v1683_v57, %v1642_v53  ;;  %v1685_v27 = vpop.f32.mrb[38].mxu0  ;;  %v1726_v46 = vpop.f32.mrb[38].mxu1  ;;  %v1732_v62 = vadd.f32 %v1724_v58, %v1644_v32  ;;  %v1901_v58 = vld [vmem:[%s1900_s27] sm:$0xff] }
 0x761   : > { %v2326_v28 = vmul.f32 -1.442695, %v1729_v56  ;;  %v1686_v59 = vpop.f32.mrb[39].mxu0  ;;  %v1727_v30 = vpop.f32.mrb[39].mxu1 }
 0x762   : > { %v2327_v31 = vmul.f32 -1.442695, %v1730_v45  ;;  %v2328_v34 = vmul.f32 -1.442695, %v1732_v62  ;;  %v1902_v45 = vld [vmem:[%s1900_s27 + $0x8] sm:$0xff] }
 0x763   : > { %2563 = vpow2.f32 %v2326_v28 }
 0x764   : > { %2565 = vpow2.f32 %v2327_v31 }
 0x765   : > { %2567 = vpow2.f32 %v2328_v34 }
 0x766   : > { %2569 = vtanh.f32 %v1731_v35 }
 0x76d   : > { %v2564_v36 = vpop.eup %2563 }
 0x76e   : > { %v2566_v37 = vpop.eup %2565  ;;  %v1736_v38 = vadd.f32 1.0, %v2564_v36 }
 0x76f   : > { %v1742_v39 = vadd.f32 1.0, %v2566_v37  ;;  %v2568_v40 = vpop.eup %2567  ;;  %v1904_v37 = vld [vmem:[%s1900_s27 + $0x18] sm:$0xff] }
 0x770   : > { %2571 = vrcp.f32 %v1736_v38  ;;  %v2570_v41 = vpop.eup %2569  ;;  %v1749_v49 = vadd.f32 1.0, %v2568_v40 }
 0x771   : > { %2573 = vrcp.f32 %v1742_v39  ;;  %v1903_v39 = vld [vmem:[%s1900_s27 + $0x10] sm:$0xff] }
 0x772   : > { %2575 = vrcp.f32 %v1749_v49 }
 0x77a   : > { %v2572_v42 = vpop.eup %2571 }
 0x77b   : > { %v2574_v43 = vpop.eup %2573  ;;  %v1754_v44 = vmul.f32 %v2572_v42, %v2570_v41 }
 0x77c   : > { %v1753_v50 = vmul.f32 %v2574_v43, %v3454_v29  ;;  %v2576_v52 = vpop.eup %2575 }
 0x77e   : > { %v3499_v51 = vadd.f32 %v1754_v44, %v1753_v50 }
 0x780   : > { %2577 = vtanh.f32 %v3499_v51 }
 0x78a   : > { %v2578_v63 = vpop.eup %2577 }
 0x78b   : > { %v1757_v53 = vmul.f32 %v2578_v63, %v2576_v52 }
 0x78d   : > { %v1760_v54 = vpack.c.bf16 %v1757_v53, %v1757_v53 }
 0x78f   : > { %1763 = vst [vmem:[%s1762_s12] sm:$0xf] %v1760_v54  ;;  %1810 = vmatmul.mubr.bf16.vlgmr.msra.gmra.mrb[40].mxu0 %v1760_v54  ;;  %1851 = vmatmul.mubr.bf16.vlgmr.msra.gmra.mrb[40].mxu1 %v1760_v54 }
 0x790   : > { %1908 = vmatpush1.bf16.msra.mxu0 %v3076_v47  ;;  %1949 = vmatpush1.bf16.msra.mxu1 %v3091_v60  ;;  %v1772_v47 = vld [vmem:[%s1770_s8 + $0x8] sm:$0xff] }
 0x791   : > { %1909 = vmatprep.subr.bf16.mxu0 %v3080_v48  ;;  %1950 = vmatprep.subr.bf16.mxu1 %v3095_v1 }
 0x792   : > { %1939 = vmatprep.mubr.bf16.mxu0 %v2712_v0  ;;  %1980 = vmatprep.mubr.bf16.mxu1 %v2712_v0  ;;  %v1771_v0 = vld [vmem:[%s1770_s8] sm:$0xff] }
 0x794   : > { %1910 = vmatpush1.bf16.msra.mxu0 %v3100_v3  ;;  %1951 = vmatpush1.bf16.msra.mxu1 %v3111_v2 }
 0x795   : > { %1911 = vmatprep.subr.bf16.mxu0 %v3106_v61  ;;  %1952 = vmatprep.subr.bf16.mxu1 %v3116_v4 }
 0x798   : > { %1912 = vmatpush1.bf16.msra.mxu0 %v3121_v5  ;;  %1953 = vmatpush1.bf16.msra.mxu1 %v3131_v6 }
 0x799   : > { %1913 = vmatprep.subr.bf16.mxu0 %v3126_v7  ;;  %1954 = vmatprep.subr.bf16.mxu1 %v3136_v8 }
 0x79c   : > { %1914 = vmatpush1.bf16.msra.mxu0 %v3141_v9  ;;  %1955 = vmatpush1.bf16.msra.mxu1 %v3151_v10 }
 0x79d   : > { %1915 = vmatprep.subr.bf16.mxu0 %v3146_v11  ;;  %1956 = vmatprep.subr.bf16.mxu1 %v3156_v12  ;;  %v1774_v11 = vld [vmem:[%s1770_s8 + $0x18] sm:$0xff]  ;;  %v1773_v12 = vld [vmem:[%s1770_s8 + $0x10] sm:$0xff] }
 0x7a0   : > { %1916 = vmatpush1.bf16.msra.mxu0 %v3161_v13  ;;  %1957 = vmatpush1.bf16.msra.mxu1 %v3171_v14 }
 0x7a1   : > { %1917 = vmatprep.subr.bf16.mxu0 %v3166_v15  ;;  %1958 = vmatprep.subr.bf16.mxu1 %v3176_v16 }
 0x7a4   : > { %1918 = vmatpush1.bf16.msra.mxu0 %v3181_v17  ;;  %1959 = vmatpush1.bf16.msra.mxu1 %v3191_v18 }
 0x7a5   : > { %1919 = vmatprep.subr.bf16.mxu0 %v3186_v19  ;;  %1960 = vmatprep.subr.bf16.mxu1 %v3196_v20 }
 0x7a8   : > { %1920 = vmatpush1.bf16.msra.mxu0 %v3201_v21  ;;  %1961 = vmatpush1.bf16.msra.mxu1 %v3211_v22 }
 0x7a9   : > { %1921 = vmatprep.subr.bf16.mxu0 %v3206_v23  ;;  %1962 = vmatprep.subr.bf16.mxu1 %v3216_v24 }
 0x7ac   : > { %1922 = vmatpush1.bf16.msra.mxu0 %v3221_v25  ;;  %1963 = vmatpush1.bf16.msra.mxu1 %v3227_v26 }
 0x862   : > { %v1811_v48 = vpop.f32.mrb[40].mxu0  ;;  %v1852_v60 = vpop.f32.mrb[40].mxu1 }
 0x863   : > { %v1859_v1 = vadd.f32 %v1811_v48, %v1771_v0  ;;  %v1813_v3 = vpop.f32.mrb[41].mxu0  ;;  %v1854_v61 = vpop.f32.mrb[41].mxu1  ;;  %v1861_v15 = vadd.f32 %v1852_v60, %v1773_v12 }
 0x864   : > { %v1860_v2 = vadd.f32 %v1813_v3, %v1772_v47  ;;  %v1815_v4 = vpop.f32.mrb[42].mxu0  ;;  %v1856_v5 = vpop.f32.mrb[42].mxu1  ;;  %v1862_v10 = vadd.f32 %v1854_v61, %v1774_v11 }
 0x865   : > { %v2333_v7 = vmul.f32 -1.442695, %v1859_v1  ;;  %v1816_v6 = vpop.f32.mrb[43].mxu0  ;;  %v1857_v8 = vpop.f32.mrb[43].mxu1 }
 0x866   : > { %v2334_v9 = vmul.f32 -1.442695, %v1860_v2  ;;  %v2335_v13 = vmul.f32 -1.442695, %v1862_v10 }
 0x867   : > { %2579 = vpow2.f32 %v2333_v7 }
 0x868   : > { %2581 = vpow2.f32 %v2334_v9 }
 0x869   : > { %2583 = vpow2.f32 %v2335_v13 }
 0x86a   : > { %2585 = vtanh.f32 %v1861_v15 }
 0x871   : > { %v2580_v14 = vpop.eup %2579 }
 0x872   : > { %v2582_v16 = vpop.eup %2581  ;;  %v1866_v17 = vadd.f32 1.0, %v2580_v14 }
 0x873   : > { %v1872_v19 = vadd.f32 1.0, %v2582_v16  ;;  %v2584_v18 = vpop.eup %2583 }
 0x874   : > { %2587 = vrcp.f32 %v1866_v17  ;;  %v2586_v20 = vpop.eup %2585  ;;  %v1879_v24 = vadd.f32 1.0, %v2584_v18 }
 0x875   : > { %2589 = vrcp.f32 %v1872_v19 }
 0x876   : > { %2591 = vrcp.f32 %v1879_v24 }
 0x87e   : > { %v2588_v21 = vpop.eup %2587 }
 0x87f   : > { %v2590_v23 = vpop.eup %2589  ;;  %v1884_v22 = vmul.f32 %v2588_v21, %v2586_v20 }
 0x880   : > { %v1883_v25 = vmul.f32 %v2590_v23, %v3499_v51  ;;  %v2592_v29 = vpop.eup %2591 }
 0x882   : > { %v1885_v26 = vadd.f32 %v1884_v22, %v1883_v25 }
 0x884   : > { %2593 = vtanh.f32 %v1885_v26 }
 0x88e   : > { %v2594_v55 = vpop.eup %2593 }
 0x88f   : > { %v1887_v56 = vmul.f32 %v2594_v55, %v2592_v29 }
 0x891   : > { %v1890_v57 = vpack.c.bf16 %v1887_v56, %v1887_v56 }
 0x893   : > { %1893 = vst [vmem:[%s1892_s18] sm:$0xf] %v1890_v57  ;;  %1940 = vmatmul.mubr.bf16.vlgmr.msra.gmra.mrb[44].mxu0 %v1890_v57  ;;  %1981 = vmatmul.mubr.bf16.vlgmr.msra.gmra.mrb[44].mxu1 %v1890_v57 }
 0x966   : > { %v1941_v27 = vpop.f32.mrb[44].mxu0  ;;  %v1982_v46 = vpop.f32.mrb[44].mxu1 }
 0x967   : > { %v1989_v28 = vadd.f32 %v1941_v27, %v1901_v58  ;;  %v1943_v59 = vpop.f32.mrb[45].mxu0  ;;  %v1984_v30 = vpop.f32.mrb[45].mxu1  ;;  %v1991_v41 = vadd.f32 %v1982_v46, %v1903_v39 }
 0x968   : > { %v1990_v31 = vadd.f32 %v1943_v59, %v1902_v45  ;;  %v1945_v32 = vpop.f32.mrb[46].mxu0  ;;  %v1986_v62 = vpop.f32.mrb[46].mxu1  ;;  %v1992_v38 = vadd.f32 %v1984_v30, %v1904_v37 }
 0x969   : > { %v2340_v33 = vmul.f32 -1.442695, %v1989_v28  ;;  %v1946_v34 = vpop.f32.mrb[47].mxu0  ;;  %v1987_v35 = vpop.f32.mrb[47].mxu1 }
 0x96a   : > { %v2341_v36 = vmul.f32 -1.442695, %v1990_v31  ;;  %v2342_v40 = vmul.f32 -1.442695, %v1992_v38 }
 0x96b   : > { %2595 = vpow2.f32 %v2340_v33 }
 0x96c   : > { %2597 = vpow2.f32 %v2341_v36 }
 0x96d   : > { %2599 = vpow2.f32 %v2342_v40 }
 0x96e   : > { %2601 = vtanh.f32 %v1991_v41 }
 0x975   : > { %v2596_v42 = vpop.eup %2595 }
 0x976   : > { %v2598_v43 = vpop.eup %2597  ;;  %v1996_v44 = vadd.f32 1.0, %v2596_v42 }
 0x977   : > { %v2002_v49 = vadd.f32 1.0, %v2598_v43  ;;  %v2600_v50 = vpop.eup %2599 }
 0x978   : > { %2603 = vrcp.f32 %v1996_v44  ;;  %v2602_v51 = vpop.eup %2601  ;;  %v2009_v54 = vadd.f32 1.0, %v2600_v50 }
 0x979   : > { %2605 = vrcp.f32 %v2002_v49 }
 0x97a   : > { %2607 = vrcp.f32 %v2009_v54 }
 0x982   : > { %v2604_v52 = vpop.eup %2603 }
 0x983   : > { %v2606_v63 = vpop.eup %2605  ;;  %v2014_v53 = vmul.f32 %v2604_v52, %v2602_v51 }
 0x984   : > { %v2013_v0 = vmul.f32 %v2606_v63, %v1885_v26  ;;  %v2608_v48 = vpop.eup %2607 }
 0x986   : > { %v2015_v47 = vadd.f32 %v2014_v53, %v2013_v0 }
 0x988   : > { %2609 = vtanh.f32 %v2015_v47  ;;  %2018 = vst [vmem:[#allocation4] sm:$0xff] %v2015_v47 }
 0x992   : > { %v2610_v60 = vpop.eup %2609 }
 0x993   : > { %v2017_v1 = vmul.f32 %v2610_v60, %v2608_v48 }
 0x995   : > { %2019 = vst [vmem:[#allocation3] sm:$0xff] %v2017_v1  ;;  %v2020_v3 = vpack.c.bf16 %v2017_v1, %v2017_v1 }
 0x997   : > { %2023 = vst [vmem:[%s2022_s10] sm:$0xf] %v2020_v3 }
 0x998 PF: > { %s17_s22 = sadd.s32 1, %s2707_s22   ;;  %s3583_s15 = smov %s2683_s16 }
 0x999   : > { %p14_p8 = scmp.ge.s32.totalorder %s17_s22, 6   ;;  %s3584_s16 = smov %s2687_s17 }
 0x99a   : > { %s3585_s17 = smov %s2804_s7  ;;  %s3586_s18 = smov %s2699_s20 }
 0x99b   : > { %s3587_s19 = smov %s2703_s21  ;;  %s3588_s20 = smov %s3591_s24 }
 0x99c   : > { %s3589_s21 = smov %s3595_s25  ;;  %16 = sbr.rel (!%p14_p8) target bundleno = 5 (0x5), region = 105 }
 0x9a3   :  { %2069 = vsyncpa [#allocation6], 1 }
 0x9a4   :  { %2071 = vsyncpa [#allocation6 + $0x1], 1 }

// kernel: bert_bilstm_crf_forward.4
= control target key start
LH: loop header
LB: loop body
LE: loop exit
PB: predicated region body
PF: predicated region fallthrough
CT: control target
= control target key end

     0   :  { %s3304_s21 = smov 0   ;;  %s3306_s22 = smov 0   ;;  %s4116_s0 = inlined_call_operand.vmem [shape: bf16[128,128], index: 0, kind: input, shape index: {}]   ;;  %s4117_s1 = inlined_call_operand.vmem [shape: bf16[128,128], index: 1, kind: input, shape index: {}]   ;;  %s4118_s2 = inlined_call_operand.vmem [shape: bf16[2,128,512], index: 2, kind: input, shape index: {}]   ;;  %s4119_s3 = inlined_call_operand.vmem [shape: bf16[2,128,512], index: 3, kind: input, shape index: {}]   ;;  %s4120_s4 = inlined_call_operand.vmem [shape: f32[2,1,512], index: 4, kind: input, shape index: {}]   ;;  %s4121_s5 = inlined_call_operand.vmem [shape: bf16[2,128,512], index: 5, kind: input, shape index: {}]   ;;  %s4122_s6 = inlined_call_operand.vmem [shape: bf16[2,128,128], index: 6, kind: output, shape index: {}]  }
   0x1   :  { %s3308_s23 = smov 0   ;;  %s3310_s24 = smov 0  }
   0x2   :  { %s3312_s25 = smov 0  }
   0x3 LB: > { %s25_s26 = sadd.s32 1, %s3257_s23  ;;  %s28_s27 = sadd.s32 1, %s3261_s24  ;;  %s3265_s25 = sphi %s3312_s25, %s16_s25   ;;  %s3261_s24 = sphi %s3310_s24, %s4126_s24   ;;  %s3257_s23 = sphi %s3308_s23, %s4125_s23   ;;  %s3253_s22 = sphi %s3306_s22, %s4124_s22   ;;  %s3249_s21 = sphi %s3304_s21, %s4123_s21  }
   0x4   : > { %p26_p0 = scmp.ge.s32.totalorder %s25_s26, 2  ;;  %p2732_p1 = scmp.ge.s32.totalorder %s3265_s25, 1 }
   0x5   : > { %p327_p2 = scmp.lt.s32.totalorder %s3265_s25, 5 }
   0x6   : > { %s4128_s26 = smov (%p26_p0, %s25_s26), 0  ;;  %s4130_s27 = smov (!%p26_p0, %s28_s27), %s3261_s24 }
   0x7   : > { %p328_p3 = pnand %p2732_p1, %p327_p2  ;;  %p30_p4 = scmp.ge.s32.totalorder %s4130_s27, 2 }
   0x8   : > { %p432_p5 = scmp.lt.s32.totalorder (!%p328_p3), %s3253_s22, 1  ;;  %s400_s28 = ssub.s32 (!%p328_p3), 1, %s3253_s22  ;;  %v3267_v0 = vmov (!%p328_p3), 0  }
   0x9   : > { %s4132_s27 = smov (%p30_p4, %s4130_s27), 0  ;;  %331 = sbr.rel (%p328_p3) target bundleno = 2454 (0x996), region = 44 }
   0xa   : > { %768 = vmatprep.mubr.bf16.mxu0 (!%p328_p3), %v3267_v0  ;;  %841 = vmatprep.mubr.bf16.mxu1 (!%p328_p3), %v3267_v0  ;;  %s401_s29 = smul.u32 (!%p328_p3), %s3249_s21, %s400_s28  ;;  %s402_s30 = ssub.s32 (!%p328_p3), 1, %s3249_s21 }
   0xb   : > { %s403_s8 = smul.u32 (!%p328_p3), %s3253_s22, %s402_s30  ;;  %p2819_p7 = scmp.ne.s32.totalorder (!%p328_p3), %s3249_s21, 0 }
   0xd   : > { %s404_s16 = sadd.s32 (!%p328_p3), %s403_s8, %s401_s29 }
   0xe   : > { %s2733_s17 = sshll.u32 (!%p328_p3), %s404_s16, 3 }
   0xf   : > { %p406_p6 = scmp.lt.s32.totalorder (!%p328_p3), %s2733_s17, 15 }
  0x10   : > { %s3345_s7 = scalar_select %p432_p5, %s3253_s22, 1 }
  0x11   : > { %s4134_s17 = smov (!%p406_p6, %s2733_s17), 15 }
  0x12   : > { %s3349_s9 = sshll.u32 %s3345_s7, 8  ;;  %s2745_s18 = sshll.u32 %s3345_s7, 4 }
  0x13   : > { %s3355_s12 = scalar_lea.vmem %s4119_s3, %s3349_s9  ;;  %s3361_s15 = scalar_lea.vmem %s4121_s5, %s3349_s9 }
  0x14   : > { %v2995_v1 = vld [vmem:[%s3355_s12 + $0x4] ss:$16 sps:$4 sm:$0xff]   ;;  %v3368_v3 = vld [vmem:[%s3361_s15 + $0x8] sm:$0xff]  ;;  %v3374_v5 = vld [vmem:[%s3361_s15 + $0x18] sm:$0xff]  ;;  %s462_s19 = sadd.s32 %s2745_s18, %s4134_s17  ;;  %s2734_s8 = sshll.u32 %s4134_s17, 2 }
  0x15   : > { %v3365_v2 = vld [vmem:[%s3361_s15] sm:$0xff]  ;;  %v3371_v4 = vld [vmem:[%s3361_s15 + $0x10] sm:$0xff]  ;;  %736 = vmatprep.subr.bf16.mxu0 %v2995_v1  ;;  %v3380_v7 = vld [vmem:[%s3361_s15 + $0x28] sm:$0xff]  ;;  %s2746_s20 = sshll.u32 %s462_s19, 2  ;;  %s3499_s13 = scalar_lea.vmem %s4117_s1, %s2734_s8 }
  0x16   : > { %v3377_v6 = vld [vmem:[%s3361_s15 + $0x20] sm:$0xff]  ;;  %v3383_v8 = vld [vmem:[%s3361_s15 + $0x30] sm:$0xff]  ;;  %v3386_v9 = vld [vmem:[%s3361_s15 + $0x38] sm:$0xff]  ;;  %s3452_s30 = scalar_lea.vmem %s4122_s6, %s2746_s20  ;;  %s3506_s16 = scalar_lea.vmem %s4118_s2, %s3349_s9 }
  0x17   : > { %v3389_v10 = vld [vmem:[%s3361_s15 + $0x40] sm:$0xff]  ;;  %v3393_v11 = vld [vmem:[%s3361_s15 + $0x48] sm:$0xff]  ;;  %v3396_v12 = vld [vmem:[%s3361_s15 + $0x50] sm:$0xff]  ;;  %s3541_s18 = scalar_lea.vmem %s4116_s0, %s2734_s8  ;;  %s2741_s17 = sshll.u32 %s3345_s7, 2 }
  0x18   : > { %v3399_v13 = vld [vmem:[%s3361_s15 + $0x58] sm:$0xff]  ;;  %v3404_v14 = vld [vmem:[%s3361_s15 + $0x60] sm:$0xff]  ;;  %v3407_v15 = vld [vmem:[%s3361_s15 + $0x68] sm:$0xff]  ;;  %s445_s28 = scalar_lea.vmem %s4120_s4, %s2741_s17 }
  0x19   : > { %v3410_v16 = vld [vmem:[%s3361_s15 + $0x70] sm:$0xff]  ;;  %v3413_v17 = vld [vmem:[%s3361_s15 + $0x78] sm:$0xff]  ;;  %v3416_v18 = vld [vmem:[%s3361_s15 + $0x80] sm:$0xff] }
  0x1a   : > { %v3419_v19 = vld [vmem:[%s3361_s15 + $0x88] sm:$0xff]  ;;  %v3423_v20 = vld [vmem:[%s3361_s15 + $0x90] sm:$0xff]  ;;  %v3426_v21 = vld [vmem:[%s3361_s15 + $0x98] sm:$0xff] }
  0x1b   : > { %v3429_v22 = vld [vmem:[%s3361_s15 + $0xa0] sm:$0xff]  ;;  %v3432_v23 = vld [vmem:[%s3361_s15 + $0xa8] sm:$0xff]  ;;  %v3435_v24 = vld [vmem:[%s3361_s15 + $0xb0] sm:$0xff] }
  0x1c   : > { %v3438_v25 = vld [vmem:[%s3361_s15 + $0xb8] sm:$0xff]  ;;  %v3441_v26 = vld [vmem:[%s3361_s15 + $0xc0] sm:$0xff]  ;;  %v3444_v27 = vld [vmem:[%s3361_s15 + $0xc8] sm:$0xff] }
  0x1d   : > { %v3447_v28 = vld [vmem:[%s3361_s15 + $0xd0] sm:$0xff]  ;;  %v3455_v29 = vld [vmem:[%s3361_s15 + $0xd8] sm:$0xff]  ;;  %v3458_v30 = vld [vmem:[%s3361_s15 + $0xe0] sm:$0xff] }
  0x1e   : > { %v3461_v31 = vld [vmem:[%s3361_s15 + $0xe8] sm:$0xff]  ;;  %v3464_v32 = vld [vmem:[%s3361_s15 + $0xf0] sm:$0xff]  ;;  %v3467_v33 = vld [vmem:[%s3361_s15 + $0xf8] sm:$0xff] }
  0x1f   : > { %v2997_v34 = vld [vmem:[%s3355_s12 + $0xc] ss:$16 sps:$4 sm:$0xff]   ;;  %v2999_v35 = vld [vmem:[%s3355_s12] ss:$16 sps:$4 sm:$0xff]   ;;  %v3000_v36 = vld [vmem:[%s3355_s12 + $0x8] ss:$16 sps:$4 sm:$0xff]  }
  0x20   : > { %809 = vmatprep.subr.bf16.mxu1 %v2997_v34  ;;  %737 = vmatpush1.bf16.msra.mxu0 %v2999_v35  ;;  %v3001_v37 = vld [vmem:[%s3355_s12 + $0x24] ss:$16 sps:$4 sm:$0xff]   ;;  %v3003_v38 = vld [vmem:[%s3355_s12 + $0x2c] ss:$16 sps:$4 sm:$0xff]   ;;  %v3005_v39 = vld [vmem:[%s3355_s12 + $0x20] ss:$16 sps:$4 sm:$0xff]  }
  0x21   : > { %810 = vmatpush1.bf16.msra.mxu1 %v3000_v36  ;;  %v3006_v40 = vld [vmem:[%s3355_s12 + $0x28] ss:$16 sps:$4 sm:$0xff]   ;;  %738 = vmatprep.subr.bf16.mxu0 %v3001_v37  ;;  %v3007_v41 = vld [vmem:[%s3355_s12 + $0x44] ss:$16 sps:$4 sm:$0xff]   ;;  %v3009_v42 = vld [vmem:[%s3355_s12 + $0x4c] ss:$16 sps:$4 sm:$0xff]  }
  0x22   : > { %811 = vmatprep.subr.bf16.mxu1 %v3003_v38  ;;  %v3011_v43 = vld [vmem:[%s3355_s12 + $0x40] ss:$16 sps:$4 sm:$0xff]   ;;  %v3012_v44 = vld [vmem:[%s3355_s12 + $0x48] ss:$16 sps:$4 sm:$0xff]   ;;  %v3013_v45 = vld [vmem:[%s3355_s12 + $0x64] ss:$16 sps:$4 sm:$0xff]  }
  0x23   : > { %v3015_v46 = vld [vmem:[%s3355_s12 + $0x6c] ss:$16 sps:$4 sm:$0xff]   ;;  %v3017_v47 = vld [vmem:[%s3355_s12 + $0x60] ss:$16 sps:$4 sm:$0xff]   ;;  %v3018_v48 = vld [vmem:[%s3355_s12 + $0x68] ss:$16 sps:$4 sm:$0xff]  }
  0x24   : > { %739 = vmatpush1.bf16.msra.mxu0 %v3005_v39  ;;  %v3019_v49 = vld [vmem:[%s3355_s12 + $0x84] ss:$16 sps:$4 sm:$0xff]   ;;  %v3021_v50 = vld [vmem:[%s3355_s12 + $0x8c] ss:$16 sps:$4 sm:$0xff]   ;;  %v3023_v51 = vld [vmem:[%s3355_s12 + $0x80] ss:$16 sps:$4 sm:$0xff]  }
  0x25   : > { %812 = vmatpush1.bf16.msra.mxu1 %v3006_v40  ;;  %740 = vmatprep.subr.bf16.mxu0 %v3007_v41  ;;  %v3024_v52 = vld [vmem:[%s3355_s12 + $0x88] ss:$16 sps:$4 sm:$0xff]   ;;  %v3025_v53 = vld [vmem:[%s3355_s12 + $0xa4] ss:$16 sps:$4 sm:$0xff]   ;;  %v3027_v54 = vld [vmem:[%s3355_s12 + $0xac] ss:$16 sps:$4 sm:$0xff]  }
  0x26   : > { %813 = vmatprep.subr.bf16.mxu1 %v3009_v42  ;;  %v3029_v55 = vld [vmem:[%s3355_s12 + $0xa0] ss:$16 sps:$4 sm:$0xff]   ;;  %v3030_v56 = vld [vmem:[%s3355_s12 + $0xa8] ss:$16 sps:$4 sm:$0xff]   ;;  %v3031_v57 = vld [vmem:[%s3355_s12 + $0xc4] ss:$16 sps:$4 sm:$0xff]  }
  0x27   : > { %v3033_v58 = vld [vmem:[%s3355_s12 + $0xcc] ss:$16 sps:$4 sm:$0xff]   ;;  %v3035_v59 = vld [vmem:[%s3355_s12 + $0xc0] ss:$16 sps:$4 sm:$0xff]   ;;  %v3036_v60 = vld [vmem:[%s3355_s12 + $0xc8] ss:$16 sps:$4 sm:$0xff]  }
  0x28   : > { %741 = vmatpush1.bf16.msra.mxu0 %v3011_v43  ;;  %v3037_v61 = vld [vmem:[%s3355_s12 + $0xe4] ss:$16 sps:$4 sm:$0xff]   ;;  %v3039_v62 = vld [vmem:[%s3355_s12 + $0xec] ss:$16 sps:$4 sm:$0xff]   ;;  %v3041_v63 = vld [vmem:[%s3355_s12 + $0xe0] ss:$16 sps:$4 sm:$0xff]  }
  0x29   : > { %814 = vmatpush1.bf16.msra.mxu1 %v3012_v44  ;;  %742 = vmatprep.subr.bf16.mxu0 %v3013_v45  ;;  %v3042_v1 = vld [vmem:[%s3355_s12 + $0xe8] ss:$16 sps:$4 sm:$0xff]   ;;  %v3046_v34 = vld [vmem:[%s3506_s16 + $0x4] ss:$16 sps:$4 sm:$0xff]   ;;  %v3049_v35 = vld [vmem:[%s3506_s16 + $0xc] ss:$16 sps:$4 sm:$0xff]  }
  0x2a   : > { %815 = vmatprep.subr.bf16.mxu1 %v3015_v46  ;;  %v3043_v36 = vld [vmem:[%s3499_s13] sm:$0xff]   ;;  %v3047_v38 = vld [vmem:[%s3506_s16 + $0x8] ss:$16 sps:$4 sm:$0xff]   ;;  %v3055_v40 = vld [vmem:[%s3506_s16 + $0x2c] ss:$16 sps:$4 sm:$0xff]  }
  0x2b   : > { %v3044_v37 = vld [vmem:[%s3506_s16] ss:$16 sps:$4 sm:$0xff]   ;;  %v3052_v39 = vld [vmem:[%s3506_s16 + $0x24] ss:$16 sps:$4 sm:$0xff]   ;;  %v3053_v42 = vld [vmem:[%s3506_s16 + $0x28] ss:$16 sps:$4 sm:$0xff]  }
  0x2c   : > { %743 = vmatpush1.bf16.msra.mxu0 %v3017_v47  ;;  %v3050_v41 = vld [vmem:[%s3506_s16 + $0x20] ss:$16 sps:$4 sm:$0xff]   ;;  %v3059_v43 = vld [vmem:[%s3506_s16 + $0x44] ss:$16 sps:$4 sm:$0xff]   ;;  %v3062_v44 = vld [vmem:[%s3506_s16 + $0x4c] ss:$16 sps:$4 sm:$0xff]  }
  0x2d   : > { %816 = vmatpush1.bf16.msra.mxu1 %v3018_v48  ;;  %744 = vmatprep.subr.bf16.mxu0 %v3019_v49  ;;  %v3056_v45 = vld [vmem:[%s3499_s13 + $0x8] sm:$0xff]   ;;  %v3057_v46 = vld [vmem:[%s3506_s16 + $0x40] ss:$16 sps:$4 sm:$0xff]   ;;  %v3065_v48 = vld [vmem:[%s3506_s16 + $0x64] ss:$16 sps:$4 sm:$0xff]  }
  0x2e   : > { %817 = vmatprep.subr.bf16.mxu1 %v3021_v50  ;;  %v3060_v47 = vld [vmem:[%s3506_s16 + $0x48] ss:$16 sps:$4 sm:$0xff]   ;;  %v3068_v49 = vld [vmem:[%s3506_s16 + $0x6c] ss:$16 sps:$4 sm:$0xff]   ;;  %v3063_v50 = vld [vmem:[%s3506_s16 + $0x60] ss:$16 sps:$4 sm:$0xff]  }
  0x30   : > { %745 = vmatpush1.bf16.msra.mxu0 %v3023_v51  ;;  %v3066_v51 = vld [vmem:[%s3506_s16 + $0x68] ss:$16 sps:$4 sm:$0xff]  }
  0x31   : > { %818 = vmatpush1.bf16.msra.mxu1 %v3024_v52  ;;  %746 = vmatprep.subr.bf16.mxu0 %v3025_v53  ;;  %v3069_v52 = vld [vmem:[%s3499_s13 + $0x10] sm:$0xff]  }
  0x32   : > { %819 = vmatprep.subr.bf16.mxu1 %v3027_v54  ;;  %v3072_v53 = vld [vmem:[%s3506_s16 + $0x84] ss:$16 sps:$4 sm:$0xff]   ;;  %v3075_v54 = vld [vmem:[%s3506_s16 + $0x8c] ss:$16 sps:$4 sm:$0xff]  }
  0x34   : > { %747 = vmatpush1.bf16.msra.mxu0 %v3029_v55  ;;  %v3070_v55 = vld [vmem:[%s3506_s16 + $0x80] ss:$16 sps:$4 sm:$0xff]  }
  0x35   : > { %820 = vmatpush1.bf16.msra.mxu1 %v3030_v56  ;;  %748 = vmatprep.subr.bf16.mxu0 %v3031_v57  ;;  %v3073_v56 = vld [vmem:[%s3506_s16 + $0x88] ss:$16 sps:$4 sm:$0xff]   ;;  %v3078_v57 = vld [vmem:[%s3506_s16 + $0xa4] ss:$16 sps:$4 sm:$0xff]  }
  0x36   : > { %821 = vmatprep.subr.bf16.mxu1 %v3033_v58  ;;  %v3081_v58 = vld [vmem:[%s3506_s16 + $0xac] ss:$16 sps:$4 sm:$0xff]  }
  0x38   : > { %749 = vmatpush1.bf16.msra.mxu0 %v3035_v59  ;;  %v3076_v59 = vld [vmem:[%s3506_s16 + $0xa0] ss:$16 sps:$4 sm:$0xff]  }
  0x39   : > { %822 = vmatpush1.bf16.msra.mxu1 %v3036_v60  ;;  %750 = vmatprep.subr.bf16.mxu0 %v3037_v61  ;;  %v3079_v60 = vld [vmem:[%s3506_s16 + $0xa8] ss:$16 sps:$4 sm:$0xff]   ;;  %v3085_v61 = vld [vmem:[%s3506_s16 + $0xc4] ss:$16 sps:$4 sm:$0xff]  }
  0x3a   : > { %823 = vmatprep.subr.bf16.mxu1 %v3039_v62  ;;  %v3088_v62 = vld [vmem:[%s3506_s16 + $0xcc] ss:$16 sps:$4 sm:$0xff]  }
  0x3c   : > { %751 = vmatpush1.bf16.msra.mxu0 %v3041_v63  ;;  %v3082_v63 = vld [vmem:[%s3499_s13 + $0x18] sm:$0xff]  }
  0x3d   : > { %824 = vmatpush1.bf16.msra.mxu1 %v3042_v1  ;;  %1066 = vmatprep.subr.bf16.mxu0 %v3046_v34  ;;  %v3083_v1 = vld [vmem:[%s3506_s16 + $0xc0] ss:$16 sps:$4 sm:$0xff]   ;;  %v3086_v34 = vld [vmem:[%s3506_s16 + $0xc8] ss:$16 sps:$4 sm:$0xff]  }
  0x3e   : > { %1139 = vmatprep.subr.bf16.mxu1 %v3049_v35  ;;  %v3091_v35 = vld [vmem:[%s3506_s16 + $0xe4] ss:$16 sps:$4 sm:$0xff]  }
  0x3f   : > { %769 = vmatmul.mubr.bf16.vlgmr.msra.gmra.mrb[0].mxu0 %v3043_v36 }
  0x40   : > { %842 = vmatmul.mubr.bf16.vlgmr.msra.gmra.mrb[0].mxu1 %v3043_v36  ;;  %1067 = vmatpush1.bf16.msra.mxu0 %v3044_v37  ;;  %v3094_v36 = vld [vmem:[%s3506_s16 + $0xec] ss:$16 sps:$4 sm:$0xff]   ;;  %v3089_v37 = vld [vmem:[%s3506_s16 + $0xe0] ss:$16 sps:$4 sm:$0xff]  }
  0x41   : > { %1140 = vmatpush1.bf16.msra.mxu1 %v3047_v38  ;;  %1068 = vmatprep.subr.bf16.mxu0 %v3052_v39  ;;  %v3092_v38 = vld [vmem:[%s3506_s16 + $0xe8] ss:$16 sps:$4 sm:$0xff]   ;;  %v3095_v39 = vld [vmem:[%s3541_s18] sm:$0xff]  }
  0x42   : > { %1141 = vmatprep.subr.bf16.mxu1 %v3055_v40  ;;  %778 = vmatprep.mubr.bf16.mxu0 %v3267_v0  ;;  %v3096_v40 = vld [vmem:[%s3541_s18 + $0x8] sm:$0xff]  }
  0x43   : > { %851 = vmatprep.mubr.bf16.mxu1 %v3267_v0 }
  0x44   : > { %1069 = vmatpush1.bf16.msra.mxu0 %v3050_v41  ;;  %v3097_v41 = vld [vmem:[%s3541_s18 + $0x10] sm:$0xff]  }
  0x45   : > { %1142 = vmatpush1.bf16.msra.mxu1 %v3053_v42  ;;  %1070 = vmatprep.subr.bf16.mxu0 %v3059_v43  ;;  %v3098_v42 = vld [vmem:[%s3541_s18 + $0x18] sm:$0xff]   ;;  %v1214_v43 = vlaneseq }
  0x46   : > { %1143 = vmatprep.subr.bf16.mxu1 %v3062_v44 }
  0x47   : > { %779 = vmatmul.mubr.bf16.gmra.mrb[4].mxu0 %v3056_v45  ;;  %v1215_v44 = vshrl.u32 %v1214_v43, 7 }
  0x48   : > { %852 = vmatmul.mubr.bf16.gmra.mrb[4].mxu1 %v3056_v45  ;;  %1071 = vmatpush1.bf16.msra.mxu0 %v3057_v46  ;;  %v1212_v46 = vld [vmem:[%s445_s28] sm:$0xf] }
  0x49   : > { %1144 = vmatpush1.bf16.msra.mxu1 %v3060_v47  ;;  %1072 = vmatprep.subr.bf16.mxu0 %v3065_v48  ;;  %v1216_v45 = vsub.s32 0, %v1215_v44  ;;  %v1224_v47 = vsub.s32 2, %v1215_v44  ;;  %v1220_v48 = vsub.s32 1, %v1215_v44 }
  0x4a   : > { %1145 = vmatprep.subr.bf16.mxu1 %v3068_v49  ;;  %788 = vmatprep.mubr.bf16.mxu0 %v3267_v0  ;;  %v1228_v49 = vsub.s32 3, %v1215_v44 }
  0x4b   : > { %861 = vmatprep.mubr.bf16.mxu1 %v3267_v0 }
  0x4c   : > { %1073 = vmatpush1.bf16.msra.mxu0 %v3063_v50  ;;  %v3579_v50 = vrot.slane %v1212_v46, %v1216_v45 }
  0x4d   : > { %1146 = vmatpush1.bf16.msra.mxu1 %v3066_v51  ;;  %1074 = vmatprep.subr.bf16.mxu0 %v3072_v53  ;;  %v3581_v51 = vrot.slane %v1212_v46, %v1224_v47  ;;  %v3585_v53 = vrot.slane %v1212_v46, %v1228_v49 }
  0x4e   : > { %1147 = vmatprep.subr.bf16.mxu1 %v3075_v54 }
  0x4f   : > { %789 = vmatmul.mubr.bf16.gmra.mrb[8].mxu0 %v3069_v52 }
  0x50   : > { %862 = vmatmul.mubr.bf16.gmra.mrb[8].mxu1 %v3069_v52  ;;  %1075 = vmatpush1.bf16.msra.mxu0 %v3070_v55  ;;  %v3583_v52 = vrot.slane %v1212_v46, %v1220_v48 }
  0x51   : > { %1148 = vmatpush1.bf16.msra.mxu1 %v3073_v56  ;;  %1076 = vmatprep.subr.bf16.mxu0 %v3078_v57 }
  0x52   : > { %1149 = vmatprep.subr.bf16.mxu1 %v3081_v58  ;;  %798 = vmatprep.mubr.bf16.mxu0 %v3267_v0 }
  0x53   : > { %871 = vmatprep.mubr.bf16.mxu1 %v3267_v0 }
  0x54   : > { %1077 = vmatpush1.bf16.msra.mxu0 %v3076_v59 }
  0x55   : > { %1150 = vmatpush1.bf16.msra.mxu1 %v3079_v60  ;;  %1078 = vmatprep.subr.bf16.mxu0 %v3085_v61 }
  0x56   : > { %1151 = vmatprep.subr.bf16.mxu1 %v3088_v62 }
  0x57   : > { %799 = vmatmul.mubr.bf16.gmra.mrb[12].mxu0 %v3082_v63 }
  0x58   : > { %872 = vmatmul.mubr.bf16.gmra.mrb[12].mxu1 %v3082_v63  ;;  %1079 = vmatpush1.bf16.msra.mxu0 %v3083_v1 }
  0x59   : > { %1152 = vmatpush1.bf16.msra.mxu1 %v3086_v34  ;;  %1080 = vmatprep.subr.bf16.mxu0 %v3091_v35 }
  0x5a   : > { %1153 = vmatprep.subr.bf16.mxu1 %v3094_v36  ;;  %1098 = vmatprep.mubr.bf16.mxu0 %v3267_v0 }
  0x5b   : > { %1171 = vmatprep.mubr.bf16.mxu1 %v3267_v0 }
  0x5c   : > { %1081 = vmatpush1.bf16.msra.mxu0 %v3089_v37 }
  0x5d   : > { %1154 = vmatpush1.bf16.msra.mxu1 %v3092_v38 }
  0x5f   : > { %1099 = vmatmul.mubr.bf16.vlgmr.msra.gmra.mrb[0].mxu0 %v3095_v39 }
  0x60   : > { %1172 = vmatmul.mubr.bf16.vlgmr.msra.gmra.mrb[0].mxu1 %v3095_v39  ;;  %1108 = vmatprep.mubr.bf16.mxu0 %v3267_v0 }
  0x61   : > { %1181 = vmatprep.mubr.bf16.mxu1 %v3267_v0 }
  0x67   : > { %1109 = vmatmul.mubr.bf16.gmra.mrb[4].mxu0 %v3096_v40 }
  0x68   : > { %1182 = vmatmul.mubr.bf16.gmra.mrb[4].mxu1 %v3096_v40  ;;  %1118 = vmatprep.mubr.bf16.mxu0 %v3267_v0 }
  0x69   : > { %1191 = vmatprep.mubr.bf16.mxu1 %v3267_v0 }
  0x6f   : > { %1119 = vmatmul.mubr.bf16.gmra.mrb[8].mxu0 %v3097_v41 }
  0x70   : > { %1192 = vmatmul.mubr.bf16.gmra.mrb[8].mxu1 %v3097_v41  ;;  %1128 = vmatprep.mubr.bf16.mxu0 %v3267_v0 }
  0x71   : > { %1201 = vmatprep.mubr.bf16.mxu1 %v3267_v0 }
  0x77   : > { %1129 = vmatmul.mubr.bf16.gmra.mrb[12].mxu0 %v3098_v42 }
  0x78   : > { %1202 = vmatmul.mubr.bf16.gmra.mrb[12].mxu1 %v3098_v42 }
 0x132   : > { %v1100_v54 = vpop.f32.mrb[0].mxu0 }
 0x133   : > { %v1234_v55 = vadd.f32 %v3579_v50, %v1100_v54  ;;  %v1173_v56 = vpop.f32.mrb[0].mxu1  ;;  %v1102_v57 = vpop.f32.mrb[1].mxu0 }
 0x134   : > { %v1236_v58 = vadd.f32 %v3581_v51, %v1173_v56  ;;  %v1235_v59 = vadd.f32 %v3583_v52, %v1102_v57  ;;  %v1175_v60 = vpop.f32.mrb[1].mxu1  ;;  %v1104_v61 = vpop.f32.mrb[2].mxu0 }
 0x135   : > { %1266 = vst [vmem:[#allocation2] sm:$0xff] %v1234_v55  ;;  %v1237_v62 = vadd.f32 %v3585_v53, %v1175_v60  ;;  %v1238_v63 = vadd.f32 %v3579_v50, %v1104_v61  ;;  %v1177_v1 = vpop.f32.mrb[2].mxu1  ;;  %v1106_v34 = vpop.f32.mrb[3].mxu0 }
 0x136   : > { %1268 = vst [vmem:[#allocation2 + $0x10] sm:$0xff] %v1236_v58  ;;  %1267 = vst [vmem:[#allocation2 + $0x8] sm:$0xff] %v1235_v59  ;;  %v1240_v35 = vadd.f32 %v3581_v51, %v1177_v1  ;;  %v1239_v36 = vadd.f32 %v3583_v52, %v1106_v34  ;;  %v1179_v37 = vpop.f32.mrb[3].mxu1 }
 0x137   : > { %1269 = vst [vmem:[#allocation2 + $0x18] sm:$0xff] %v1237_v62  ;;  %1270 = vst [vmem:[#allocation2 + $0x20] sm:$0xff] %v1238_v63  ;;  %v1241_v38 = vadd.f32 %v3585_v53, %v1179_v37 }
 0x138   : > { %1272 = vst [vmem:[#allocation2 + $0x30] sm:$0xff] %v1240_v35  ;;  %1271 = vst [vmem:[#allocation2 + $0x28] sm:$0xff] %v1239_v36 }
 0x139   : > { %1273 = vst [vmem:[#allocation2 + $0x38] sm:$0xff] %v1241_v38 }
 0x13a   : > { %v1110_v39 = vpop.f32.mrb[4].mxu0 }
 0x13b   : > { %v1242_v40 = vadd.f32 %v3579_v50, %v1110_v39  ;;  %v1183_v41 = vpop.f32.mrb[4].mxu1  ;;  %v1112_v42 = vpop.f32.mrb[5].mxu0 }
 0x13c   : > { %v1244_v43 = vadd.f32 %v3581_v51, %v1183_v41  ;;  %v1243_v44 = vadd.f32 %v3583_v52, %v1112_v42  ;;  %v1185_v45 = vpop.f32.mrb[5].mxu1  ;;  %v1114_v46 = vpop.f32.mrb[6].mxu0 }
 0x13d   : > { %1274 = vst [vmem:[#allocation2 + $0x40] sm:$0xff] %v1242_v40  ;;  %v1245_v47 = vadd.f32 %v3585_v53, %v1185_v45  ;;  %v1246_v48 = vadd.f32 %v3579_v50, %v1114_v46  ;;  %v1187_v49 = vpop.f32.mrb[6].mxu1  ;;  %v1116_v54 = vpop.f32.mrb[7].mxu0 }
 0x13e   : > { %1276 = vst [vmem:[#allocation2 + $0x50] sm:$0xff] %v1244_v43  ;;  %1275 = vst [vmem:[#allocation2 + $0x48] sm:$0xff] %v1243_v44  ;;  %v1248_v55 = vadd.f32 %v3581_v51, %v1187_v49  ;;  %v1247_v56 = vadd.f32 %v3583_v52, %v1116_v54  ;;  %v1189_v57 = vpop.f32.mrb[7].mxu1 }
 0x13f   : > { %1277 = vst [vmem:[#allocation2 + $0x58] sm:$0xff] %v1245_v47  ;;  %1278 = vst [vmem:[#allocation2 + $0x60] sm:$0xff] %v1246_v48  ;;  %v1249_v58 = vadd.f32 %v3585_v53, %v1189_v57 }
 0x140   : > { %1280 = vst [vmem:[#allocation2 + $0x70] sm:$0xff] %v1248_v55  ;;  %1279 = vst [vmem:[#allocation2 + $0x68] sm:$0xff] %v1247_v56 }
 0x141   : > { %1281 = vst [vmem:[#allocation2 + $0x78] sm:$0xff] %v1249_v58 }
 0x142   : > { %v1120_v59 = vpop.f32.mrb[8].mxu0 }
 0x143   : > { %v1250_v60 = vadd.f32 %v3579_v50, %v1120_v59  ;;  %v1193_v61 = vpop.f32.mrb[8].mxu1  ;;  %v1122_v62 = vpop.f32.mrb[9].mxu0 }
 0x144   : > { %v1252_v63 = vadd.f32 %v3581_v51, %v1193_v61  ;;  %v1251_v1 = vadd.f32 %v3583_v52, %v1122_v62  ;;  %v1195_v34 = vpop.f32.mrb[9].mxu1  ;;  %v1124_v35 = vpop.f32.mrb[10].mxu0 }
 0x145   : > { %1282 = vst [vmem:[#allocation2 + $0x80] sm:$0xff] %v1250_v60  ;;  %v1253_v36 = vadd.f32 %v3585_v53, %v1195_v34  ;;  %v1254_v37 = vadd.f32 %v3579_v50, %v1124_v35  ;;  %v1197_v38 = vpop.f32.mrb[10].mxu1  ;;  %v1126_v39 = vpop.f32.mrb[11].mxu0 }
 0x146   : > { %1284 = vst [vmem:[#allocation2 + $0x90] sm:$0xff] %v1252_v63  ;;  %1283 = vst [vmem:[#allocation2 + $0x88] sm:$0xff] %v1251_v1  ;;  %v1256_v40 = vadd.f32 %v3581_v51, %v1197_v38  ;;  %v1255_v41 = vadd.f32 %v3583_v52, %v1126_v39  ;;  %v1199_v42 = vpop.f32.mrb[11].mxu1 }
 0x147   : > { %1285 = vst [vmem:[#allocation2 + $0x98] sm:$0xff] %v1253_v36  ;;  %1286 = vst [vmem:[#allocation2 + $0xa0] sm:$0xff] %v1254_v37  ;;  %v1257_v43 = vadd.f32 %v3585_v53, %v1199_v42 }
 0x148   : > { %1288 = vst [vmem:[#allocation2 + $0xb0] sm:$0xff] %v1256_v40  ;;  %1287 = vst [vmem:[#allocation2 + $0xa8] sm:$0xff] %v1255_v41 }
 0x149   : > { %1289 = vst [vmem:[#allocation2 + $0xb8] sm:$0xff] %v1257_v43 }
 0x14a   : > { %v1130_v44 = vpop.f32.mrb[12].mxu0 }
 0x14b   : > { %v1258_v45 = vadd.f32 %v3579_v50, %v1130_v44  ;;  %v1203_v46 = vpop.f32.mrb[12].mxu1  ;;  %v1132_v47 = vpop.f32.mrb[13].mxu0  ;;  %1333 = sbr.rel (%p2819_p7) target bundleno = 339 (0x153), region = 48 }
 0x14c   : > { %v1260_v48 = vadd.f32 %v3581_v51, %v1203_v46  ;;  %v1259_v49 = vadd.f32 %v3583_v52, %v1132_v47  ;;  %v1205_v54 = vpop.f32.mrb[13].mxu1  ;;  %v1134_v55 = vpop.f32.mrb[14].mxu0 }
 0x14d   : > { %1290 = vst [vmem:[#allocation2 + $0xc0] sm:$0xff] %v1258_v45  ;;  %v1261_v56 = vadd.f32 %v3585_v53, %v1205_v54  ;;  %v1262_v57 = vadd.f32 %v3579_v50, %v1134_v55  ;;  %v1207_v58 = vpop.f32.mrb[14].mxu1  ;;  %v1136_v59 = vpop.f32.mrb[15].mxu0  ;;  %v3268_v50 = vmov (!%p2819_p7), 0.0  }
 0x14e   : > { %1292 = vst [vmem:[#allocation2 + $0xd0] sm:$0xff] %v1260_v48  ;;  %1291 = vst [vmem:[#allocation2 + $0xc8] sm:$0xff] %v1259_v49  ;;  %v1264_v60 = vadd.f32 %v3581_v51, %v1207_v58  ;;  %v1263_v61 = vadd.f32 %v3583_v52, %v1136_v59  ;;  %v1209_v62 = vpop.f32.mrb[15].mxu1 }
 0x14f   : > { %1293 = vst [vmem:[#allocation2 + $0xd8] sm:$0xff] %v1261_v56  ;;  %1294 = vst [vmem:[#allocation2 + $0xe0] sm:$0xff] %v1262_v57  ;;  %v1265_v63 = vadd.f32 %v3585_v53, %v1209_v62 }
 0x150   : > { %1296 = vst [vmem:[#allocation2 + $0xf0] sm:$0xff] %v1264_v60  ;;  %1295 = vst [vmem:[#allocation2 + $0xe8] sm:$0xff] %v1263_v61 }
 0x151   : > { %1297 = vst [vmem:[#allocation2 + $0xf8] sm:$0xff] %v1265_v63  ;;  %1334 = vst [vmem:[#allocation3] sm:$0xff] (!%p2819_p7), %v3268_v50 }
 0x152   : > { %1335 = vst [vmem:[#allocation4] sm:$0xff] %v3268_v50 }
 0x153 PF: > { %v3622_v51 = vcombine.high %v3365_v2, %v3371_v4  ;;  %v3626_v52 = vcombine.low %v3365_v2, %v3371_v4  ;;  %v3630_v53 = vcombine.high %v3377_v6, %v3383_v8  ;;  %1542 = vmatprep.mubr.bf16.mxu0 %v3267_v0  ;;  %v3635_v1 = vcombine.high %v3368_v3, %v3374_v5  ;;  %p1336_p8 = scmp.eq.s32.totalorder %s3253_s22, 0 }
 0x154   : > { %1583 = vmatprep.mubr.bf16.mxu1 %v3267_v0  ;;  %v3641_v34 = vcombine.low %v3368_v3, %v3374_v5  ;;  %v3645_v2 = vcombine.high %v3380_v7, %v3386_v9  ;;  %v3650_v4 = vcombine.low %v3377_v6, %v3383_v8  ;;  %v3656_v35 = vcombine.high %v3389_v10, %v3396_v12 }
 0x155   : > { %1510 = vmatprep.subr.bf16.mxu0 %v3622_v51  ;;  %1551 = vmatprep.subr.bf16.mxu1 %v3635_v1  ;;  %v3661_v3 = vcombine.low %v3380_v7, %v3386_v9  ;;  %v3666_v5 = vcombine.high %v3393_v11, %v3399_v13  ;;  %v3671_v6 = vcombine.low %v3389_v10, %v3396_v12  ;;  %s1337_s21 = scalar_select %p1336_p8, 0, 7 }
 0x156   : > { %1511 = vmatpush1.bf16.msra.mxu0 %v3626_v52  ;;  %1552 = vmatpush1.bf16.msra.mxu1 %v3641_v34  ;;  %v3676_v8 = vcombine.high %v3404_v14, %v3410_v16  ;;  %v3681_v7 = vcombine.low %v3393_v11, %v3399_v13  ;;  %v3686_v9 = vcombine.high %v3407_v15, %v3413_v17  ;;  %s1627_s14 = scalar_select %p1336_p8, 1, 6 }
 0x157   : > { %1512 = vmatprep.subr.bf16.mxu0 %v3630_v53  ;;  %1553 = vmatprep.subr.bf16.mxu1 %v3645_v2  ;;  %v3691_v10 = vcombine.low %v3404_v14, %v3410_v16  ;;  %v3696_v12 = vcombine.high %v3416_v18, %v3423_v20  ;;  %v3701_v11 = vcombine.low %v3407_v15, %v3413_v17  ;;  %s2820_s7 = sshll.u32 %s1337_s21, 3 }
 0x158   : > { %v3706_v13 = vcombine.high %v3419_v19, %v3426_v21  ;;  %v3711_v14 = vcombine.low %v3416_v18, %v3423_v20  ;;  %v3716_v16 = vcombine.high %v3429_v22, %v3435_v24  ;;  %v3721_v15 = vcombine.low %v3419_v19, %v3426_v21  ;;  %s3821_s29 = sshra.s32 %s2820_s7, 3  ;;  %s2859_s15 = sshll.u32 %s1627_s14, 3 }
 0x159   : > { %v3726_v17 = vcombine.high %v3432_v23, %v3438_v25  ;;  %v3731_v18 = vcombine.low %v3429_v22, %v3435_v24  ;;  %v3736_v20 = vcombine.high %v3441_v26, %v3447_v28  ;;  %v3741_v19 = vcombine.low %v3432_v23, %v3438_v25  ;;  %s2913_s8 = sshll.u32 %s3821_s29, 5  ;;  %v1615_v61 = vld [vmem:[#allocation4] sm:$0xff]  ;;  %s2858_s11 = sshll.u32 %s3821_s29, 2 }
 0x15a   : > { %1513 = vmatpush1.bf16.msra.mxu0 %v3650_v4  ;;  %1554 = vmatpush1.bf16.msra.mxu1 %v3661_v3  ;;  %v3746_v21 = vcombine.high %v3444_v27, %v3455_v29  ;;  %v3751_v22 = vcombine.low %v3441_v26, %v3447_v28  ;;  %v3756_v24 = vcombine.high %v3458_v30, %v3464_v32  ;;  %v1348_v28 = vld [vmem:[#allocation3] sm:$0xff]  ;;  %s1343_s10 = scalar_lea.vmem [#allocation2], %s2913_s8  ;;  %s1625_s13 = scalar_lea.vmem %s3452_s30, %s2858_s11 }
 0x15b   : > { %1514 = vmatprep.subr.bf16.mxu0 %v3656_v35  ;;  %1555 = vmatprep.subr.bf16.mxu1 %v3666_v5  ;;  %v3761_v23 = vcombine.low %v3444_v27, %v3455_v29  ;;  %v3766_v25 = vcombine.high %v3461_v31, %v3467_v33  ;;  %v3771_v26 = vcombine.low %v3458_v30, %v3464_v32  ;;  %v1344_v30 = vld [vmem:[%s1343_s10] sm:$0xff]  ;;  %v1347_v45 = vld [vmem:[%s1343_s10 + $0x18] sm:$0xff]  ;;  %v1346_v48 = vld [vmem:[%s1343_s10 + $0x10] sm:$0xff]  ;;  %s3865_s16 = sshra.s32 %s2859_s15, 3 }
 0x15c   : > { %v3777_v27 = vcombine.low %v3461_v31, %v3467_v33  ;;  %v1349_v29 = vpack.c.bf16 %v1348_v28, %v1348_v28  ;;  %v1345_v31 = vld [vmem:[%s1343_s10 + $0x8] sm:$0xff]  ;;  %s2914_s9 = sshll.u32 %s3865_s16, 5  ;;  %s2865_s18 = sshll.u32 %s3865_s16, 2 }
 0x15d   : > { %s1633_s12 = scalar_lea.vmem [#allocation2], %s2914_s9  ;;  %s1755_s17 = scalar_lea.vmem %s3452_s30, %s2865_s18 }
 0x15e   : > { %1515 = vmatpush1.bf16.msra.mxu0 %v3671_v6  ;;  %1556 = vmatpush1.bf16.msra.mxu1 %v3681_v7  ;;  %s1757_s19 = scalar_select %p1336_p8, 2, 5 }
 0x15f   : > { %1516 = vmatprep.subr.bf16.mxu0 %v3676_v8  ;;  %1557 = vmatprep.subr.bf16.mxu1 %v3686_v9  ;;  %s1887_s10 = scalar_select %p1336_p8, 3, 4 }
 0x160   : > { %s2866_s20 = sshll.u32 %s1757_s19, 3 }
 0x161   : > { %s3910_s28 = sshra.s32 %s2866_s20, 3  ;;  %s2873_s11 = sshll.u32 %s1887_s10, 3 }
 0x162   : > { %1517 = vmatpush1.bf16.msra.mxu0 %v3691_v10  ;;  %1558 = vmatpush1.bf16.msra.mxu1 %v3701_v11  ;;  %s2915_s21 = sshll.u32 %s3910_s28, 5  ;;  %s2872_s29 = sshll.u32 %s3910_s28, 2 }
 0x163   : > { %1518 = vmatprep.subr.bf16.mxu0 %v3696_v12  ;;  %1559 = vmatprep.subr.bf16.mxu1 %v3706_v13  ;;  %s1763_s7 = scalar_lea.vmem [#allocation2], %s2915_s21  ;;  %s1885_s8 = scalar_lea.vmem %s3452_s30, %s2872_s29 }
 0x166   : > { %1519 = vmatpush1.bf16.msra.mxu0 %v3711_v14  ;;  %1560 = vmatpush1.bf16.msra.mxu1 %v3721_v15 }
 0x167   : > { %1520 = vmatprep.subr.bf16.mxu0 %v3716_v16  ;;  %1561 = vmatprep.subr.bf16.mxu1 %v3726_v17 }
 0x16a   : > { %1521 = vmatpush1.bf16.msra.mxu0 %v3731_v18  ;;  %1562 = vmatpush1.bf16.msra.mxu1 %v3741_v19 }
 0x16b   : > { %1522 = vmatprep.subr.bf16.mxu0 %v3736_v20  ;;  %1563 = vmatprep.subr.bf16.mxu1 %v3746_v21 }
 0x16e   : > { %1523 = vmatpush1.bf16.msra.mxu0 %v3751_v22  ;;  %1564 = vmatpush1.bf16.msra.mxu1 %v3761_v23 }
 0x16f   : > { %1524 = vmatprep.subr.bf16.mxu0 %v3756_v24  ;;  %1565 = vmatprep.subr.bf16.mxu1 %v3766_v25 }
 0x172   : > { %1525 = vmatpush1.bf16.msra.mxu0 %v3771_v26  ;;  %1566 = vmatpush1.bf16.msra.mxu1 %v3777_v27 }
 0x173   : > { %1640 = vmatprep.subr.bf16.mxu0 %v3622_v51  ;;  %1681 = vmatprep.subr.bf16.mxu1 %v3635_v1 }
 0x175   : > { %1543 = vmatmul.mubr.bf16.vlgmr.msra.gmra.mrb[16].mxu0 %v1349_v29  ;;  %1584 = vmatmul.mubr.bf16.vlgmr.msra.gmra.mrb[16].mxu1 %v1349_v29 }
 0x176   : > { %1641 = vmatpush1.bf16.msra.mxu0 %v3626_v52  ;;  %1682 = vmatpush1.bf16.msra.mxu1 %v3641_v34 }
 0x177   : > { %1642 = vmatprep.subr.bf16.mxu0 %v3630_v53  ;;  %1683 = vmatprep.subr.bf16.mxu1 %v3645_v2 }
 0x178   : > { %1672 = vmatprep.mubr.bf16.mxu0 %v3267_v0  ;;  %1713 = vmatprep.mubr.bf16.mxu1 %v3267_v0 }
 0x17a   : > { %1643 = vmatpush1.bf16.msra.mxu0 %v3650_v4  ;;  %1684 = vmatpush1.bf16.msra.mxu1 %v3661_v3 }
 0x17b   : > { %1644 = vmatprep.subr.bf16.mxu0 %v3656_v35  ;;  %1685 = vmatprep.subr.bf16.mxu1 %v3666_v5 }
 0x17e   : > { %1645 = vmatpush1.bf16.msra.mxu0 %v3671_v6  ;;  %1686 = vmatpush1.bf16.msra.mxu1 %v3681_v7 }
 0x17f   : > { %1646 = vmatprep.subr.bf16.mxu0 %v3676_v8  ;;  %1687 = vmatprep.subr.bf16.mxu1 %v3686_v9 }
 0x182   : > { %1647 = vmatpush1.bf16.msra.mxu0 %v3691_v10  ;;  %1688 = vmatpush1.bf16.msra.mxu1 %v3701_v11 }
 0x183   : > { %1648 = vmatprep.subr.bf16.mxu0 %v3696_v12  ;;  %1689 = vmatprep.subr.bf16.mxu1 %v3706_v13 }
 0x186   : > { %1649 = vmatpush1.bf16.msra.mxu0 %v3711_v14  ;;  %1690 = vmatpush1.bf16.msra.mxu1 %v3721_v15 }
 0x187   : > { %1650 = vmatprep.subr.bf16.mxu0 %v3716_v16  ;;  %1691 = vmatprep.subr.bf16.mxu1 %v3726_v17 }
 0x18a   : > { %1651 = vmatpush1.bf16.msra.mxu0 %v3731_v18  ;;  %1692 = vmatpush1.bf16.msra.mxu1 %v3741_v19 }
 0x18b   : > { %1652 = vmatprep.subr.bf16.mxu0 %v3736_v20  ;;  %1693 = vmatprep.subr.bf16.mxu1 %v3746_v21 }
 0x18e   : > { %1653 = vmatpush1.bf16.msra.mxu0 %v3751_v22  ;;  %1694 = vmatpush1.bf16.msra.mxu1 %v3761_v23 }
 0x18f   : > { %1654 = vmatprep.subr.bf16.mxu0 %v3756_v24  ;;  %1695 = vmatprep.subr.bf16.mxu1 %v3766_v25 }
 0x192   : > { %1655 = vmatpush1.bf16.msra.mxu0 %v3771_v26  ;;  %1696 = vmatpush1.bf16.msra.mxu1 %v3777_v27 }
 0x193   : > { %1770 = vmatprep.subr.bf16.mxu0 %v3622_v51  ;;  %1811 = vmatprep.subr.bf16.mxu1 %v3635_v1 }
 0x248   : > { %v1544_v32 = vpop.f32.mrb[16].mxu0  ;;  %v1585_v37 = vpop.f32.mrb[16].mxu1 }
 0x249   : > { %v1592_v33 = vadd.f32 %v1544_v32, %v1344_v30  ;;  %v1546_v36 = vpop.f32.mrb[17].mxu0  ;;  %v1587_v40 = vpop.f32.mrb[17].mxu1  ;;  %v1594_v54 = vadd.f32 %v1585_v37, %v1346_v48  ;;  %v1634_v37 = vld [vmem:[%s1633_s12] sm:$0xff] }
 0x24a   : > { %v1593_v38 = vadd.f32 %v1546_v36, %v1345_v31  ;;  %v1548_v39 = vpop.f32.mrb[18].mxu0  ;;  %v1589_v43 = vpop.f32.mrb[18].mxu1  ;;  %v1595_v47 = vadd.f32 %v1587_v40, %v1347_v45 }
 0x24b   : > { %v2855_v41 = vmul.f32 -1.442695, %v1592_v33  ;;  %v1549_v42 = vpop.f32.mrb[19].mxu0  ;;  %v1590_v46 = vpop.f32.mrb[19].mxu1 }
 0x24c   : > { %v2856_v44 = vmul.f32 -1.442695, %v1593_v38  ;;  %v2857_v49 = vmul.f32 -1.442695, %v1595_v47  ;;  %v1635_v38 = vld [vmem:[%s1633_s12 + $0x8] sm:$0xff] }
 0x24d   : > { %3099 = vpow2.f32 %v2855_v41 }
 0x24e   : > { %3101 = vpow2.f32 %v2856_v44 }
 0x24f   : > { %3103 = vpow2.f32 %v2857_v49 }
 0x250   : > { %3105 = vtanh.f32 %v1594_v54 }
 0x257   : > { %v3100_v55 = vpop.eup %3099 }
 0x258   : > { %v3102_v56 = vpop.eup %3101  ;;  %v1599_v57 = vadd.f32 1.0, %v3100_v55  ;;  %v1637_v55 = vld [vmem:[%s1633_s12 + $0x18] sm:$0xff] }
 0x259   : > { %v1605_v58 = vadd.f32 1.0, %v3102_v56  ;;  %v3104_v59 = vpop.eup %3103 }
 0x25a   : > { %3107 = vrcp.f32 %v1599_v57  ;;  %v3106_v60 = vpop.eup %3105  ;;  %v1612_v63 = vadd.f32 1.0, %v3104_v59  ;;  %v1636_v57 = vld [vmem:[%s1633_s12 + $0x10] sm:$0xff]  ;;  %s2017_s12 = scalar_select %p1336_p8, 4, 3 }
 0x25b   : > { %3109 = vrcp.f32 %v1605_v58 }
 0x25c   : > { %3111 = vrcp.f32 %v1612_v63  ;;  %s2880_s18 = sshll.u32 %s2017_s12, 3 }
 0x264   : > { %v3108_v62 = vpop.eup %3107 }
 0x265   : > { %v3110_v50 = vpop.eup %3109  ;;  %v1617_v28 = vmul.f32 %v3108_v62, %v3106_v60 }
 0x266   : > { %v1616_v29 = vmul.f32 %v3110_v50, %v1615_v61  ;;  %v3112_v31 = vpop.eup %3111 }
 0x268   : > { %v3824_v30 = vadd.f32 %v1617_v28, %v1616_v29 }
 0x26a   : > { %3113 = vtanh.f32 %v3824_v30 }
 0x274   : > { %v3114_v32 = vpop.eup %3113 }
 0x275   : > { %v1620_v33 = vmul.f32 %v3114_v32, %v3112_v31 }
 0x277   : > { %v1623_v36 = vpack.c.bf16 %v1620_v33, %v1620_v33 }
 0x279   : > { %1626 = vst [vmem:[%s1625_s13] sm:$0xf] %v1623_v36  ;;  %1673 = vmatmul.mubr.bf16.vlgmr.msra.gmra.mrb[20].mxu0 %v1623_v36  ;;  %1714 = vmatmul.mubr.bf16.vlgmr.msra.gmra.mrb[20].mxu1 %v1623_v36  ;;  %s3955_s13 = sshra.s32 %s2873_s11, 3 }
 0x27a   : > { %1771 = vmatpush1.bf16.msra.mxu0 %v3626_v52  ;;  %1812 = vmatpush1.bf16.msra.mxu1 %v3641_v34  ;;  %s2916_s14 = sshll.u32 %s3955_s13, 5  ;;  %s2879_s16 = sshll.u32 %s3955_s13, 2 }
 0x27b   : > { %1772 = vmatprep.subr.bf16.mxu0 %v3630_v53  ;;  %1813 = vmatprep.subr.bf16.mxu1 %v3645_v2  ;;  %s1893_s15 = scalar_lea.vmem [#allocation2], %s2916_s14  ;;  %s2015_s9 = scalar_lea.vmem %s3452_s30, %s2879_s16 }
 0x27c   : > { %1802 = vmatprep.mubr.bf16.mxu0 %v3267_v0  ;;  %1843 = vmatprep.mubr.bf16.mxu1 %v3267_v0 }
 0x27e   : > { %1773 = vmatpush1.bf16.msra.mxu0 %v3650_v4  ;;  %1814 = vmatpush1.bf16.msra.mxu1 %v3661_v3 }
 0x27f   : > { %1774 = vmatprep.subr.bf16.mxu0 %v3656_v35  ;;  %1815 = vmatprep.subr.bf16.mxu1 %v3666_v5 }
 0x282   : > { %1775 = vmatpush1.bf16.msra.mxu0 %v3671_v6  ;;  %1816 = vmatpush1.bf16.msra.mxu1 %v3681_v7 }
 0x283   : > { %1776 = vmatprep.subr.bf16.mxu0 %v3676_v8  ;;  %1817 = vmatprep.subr.bf16.mxu1 %v3686_v9 }
 0x286   : > { %1777 = vmatpush1.bf16.msra.mxu0 %v3691_v10  ;;  %1818 = vmatpush1.bf16.msra.mxu1 %v3701_v11 }
 0x287   : > { %1778 = vmatprep.subr.bf16.mxu0 %v3696_v12  ;;  %1819 = vmatprep.subr.bf16.mxu1 %v3706_v13 }
 0x28a   : > { %1779 = vmatpush1.bf16.msra.mxu0 %v3711_v14  ;;  %1820 = vmatpush1.bf16.msra.mxu1 %v3721_v15 }
 0x28b   : > { %1780 = vmatprep.subr.bf16.mxu0 %v3716_v16  ;;  %1821 = vmatprep.subr.bf16.mxu1 %v3726_v17 }
 0x28e   : > { %1781 = vmatpush1.bf16.msra.mxu0 %v3731_v18  ;;  %1822 = vmatpush1.bf16.msra.mxu1 %v3741_v19 }
 0x28f   : > { %1782 = vmatprep.subr.bf16.mxu0 %v3736_v20  ;;  %1823 = vmatprep.subr.bf16.mxu1 %v3746_v21 }
 0x292   : > { %1783 = vmatpush1.bf16.msra.mxu0 %v3751_v22  ;;  %1824 = vmatpush1.bf16.msra.mxu1 %v3761_v23 }
 0x293   : > { %1784 = vmatprep.subr.bf16.mxu0 %v3756_v24  ;;  %1825 = vmatprep.subr.bf16.mxu1 %v3766_v25 }
 0x296   : > { %1785 = vmatpush1.bf16.msra.mxu0 %v3771_v26  ;;  %1826 = vmatpush1.bf16.msra.mxu1 %v3777_v27 }
 0x297   : > { %1900 = vmatprep.subr.bf16.mxu0 %v3622_v51  ;;  %1941 = vmatprep.subr.bf16.mxu1 %v3635_v1 }
 0x34c   : > { %v1674_v39 = vpop.f32.mrb[20].mxu0  ;;  %v1715_v40 = vpop.f32.mrb[20].mxu1 }
 0x34d   : > { %v1722_v41 = vadd.f32 %v1674_v39, %v1634_v37  ;;  %v1676_v42 = vpop.f32.mrb[21].mxu0  ;;  %v1717_v43 = vpop.f32.mrb[21].mxu1  ;;  %v1724_v59 = vadd.f32 %v1715_v40, %v1636_v57 }
 0x34e   : > { %v1723_v44 = vadd.f32 %v1676_v42, %v1635_v38  ;;  %v1678_v45 = vpop.f32.mrb[22].mxu0  ;;  %v1719_v46 = vpop.f32.mrb[22].mxu1  ;;  %v1725_v56 = vadd.f32 %v1717_v43, %v1637_v55  ;;  %v1765_v42 = vld [vmem:[%s1763_s7 + $0x8] sm:$0xff] }
 0x34f   : > { %v2862_v47 = vmul.f32 -1.442695, %v1722_v41  ;;  %v1679_v48 = vpop.f32.mrb[23].mxu0  ;;  %v1720_v49 = vpop.f32.mrb[23].mxu1 }
 0x350   : > { %v2863_v54 = vmul.f32 -1.442695, %v1723_v44  ;;  %v2864_v58 = vmul.f32 -1.442695, %v1725_v56 }
 0x351   : > { %3115 = vpow2.f32 %v2862_v47 }
 0x352   : > { %3117 = vpow2.f32 %v2863_v54 }
 0x353   : > { %3119 = vpow2.f32 %v2864_v58 }
 0x354   : > { %3121 = vtanh.f32 %v1724_v59  ;;  %v1767_v59 = vld [vmem:[%s1763_s7 + $0x18] sm:$0xff] }
 0x35b   : > { %v3116_v60 = vpop.eup %3115 }
 0x35c   : > { %v3118_v61 = vpop.eup %3117  ;;  %v1729_v62 = vadd.f32 1.0, %v3116_v60 }
 0x35d   : > { %v1735_v63 = vadd.f32 1.0, %v3118_v61  ;;  %v3120_v50 = vpop.eup %3119  ;;  %v1766_v61 = vld [vmem:[%s1763_s7 + $0x10] sm:$0xff] }
 0x35e   : > { %3123 = vrcp.f32 %v1729_v62  ;;  %v3122_v28 = vpop.eup %3121  ;;  %v1742_v33 = vadd.f32 1.0, %v3120_v50 }
 0x35f   : > { %3125 = vrcp.f32 %v1735_v63 }
 0x360   : > { %3127 = vrcp.f32 %v1742_v33 }
 0x368   : > { %v3124_v29 = vpop.eup %3123 }
 0x369   : > { %v3126_v31 = vpop.eup %3125  ;;  %v1747_v32 = vmul.f32 %v3124_v29, %v3122_v28 }
 0x36a   : > { %v1746_v36 = vmul.f32 %v3126_v31, %v3824_v30  ;;  %v3128_v38 = vpop.eup %3127  ;;  %v1764_v30 = vld [vmem:[%s1763_s7] sm:$0xff]  ;;  %s2147_s7 = scalar_select %p1336_p8, 5, 2 }
 0x36c   : > { %v3869_v37 = vadd.f32 %v1747_v32, %v1746_v36  ;;  %s2887_s29 = sshll.u32 %s2147_s7, 3 }
 0x36e   : > { %3129 = vtanh.f32 %v3869_v37 }
 0x378   : > { %v3130_v39 = vpop.eup %3129 }
 0x379   : > { %v1750_v40 = vmul.f32 %v3130_v39, %v3128_v38 }
 0x37b   : > { %v1753_v41 = vpack.c.bf16 %v1750_v40, %v1750_v40 }
 0x37d   : > { %1756 = vst [vmem:[%s1755_s17] sm:$0xf] %v1753_v41  ;;  %1803 = vmatmul.mubr.bf16.vlgmr.msra.gmra.mrb[24].mxu0 %v1753_v41  ;;  %1844 = vmatmul.mubr.bf16.vlgmr.msra.gmra.mrb[24].mxu1 %v1753_v41  ;;  %s4000_s17 = sshra.s32 %s2880_s18, 3 }
 0x37e   : > { %1901 = vmatpush1.bf16.msra.mxu0 %v3626_v52  ;;  %1942 = vmatpush1.bf16.msra.mxu1 %v3641_v34  ;;  %s2917_s19 = sshll.u32 %s4000_s17, 5  ;;  %s2886_s28 = sshll.u32 %s4000_s17, 2 }
 0x37f   : > { %1902 = vmatprep.subr.bf16.mxu0 %v3630_v53  ;;  %1943 = vmatprep.subr.bf16.mxu1 %v3645_v2  ;;  %s2023_s20 = scalar_lea.vmem [#allocation2], %s2917_s19  ;;  %s2145_s21 = scalar_lea.vmem %s3452_s30, %s2886_s28 }
 0x380   : > { %1932 = vmatprep.mubr.bf16.mxu0 %v3267_v0  ;;  %1973 = vmatprep.mubr.bf16.mxu1 %v3267_v0 }
 0x382   : > { %1903 = vmatpush1.bf16.msra.mxu0 %v3650_v4  ;;  %1944 = vmatpush1.bf16.msra.mxu1 %v3661_v3 }
 0x383   : > { %1904 = vmatprep.subr.bf16.mxu0 %v3656_v35  ;;  %1945 = vmatprep.subr.bf16.mxu1 %v3666_v5 }
 0x386   : > { %1905 = vmatpush1.bf16.msra.mxu0 %v3671_v6  ;;  %1946 = vmatpush1.bf16.msra.mxu1 %v3681_v7 }
 0x387   : > { %1906 = vmatprep.subr.bf16.mxu0 %v3676_v8  ;;  %1947 = vmatprep.subr.bf16.mxu1 %v3686_v9 }
 0x38a   : > { %1907 = vmatpush1.bf16.msra.mxu0 %v3691_v10  ;;  %1948 = vmatpush1.bf16.msra.mxu1 %v3701_v11 }
 0x38b   : > { %1908 = vmatprep.subr.bf16.mxu0 %v3696_v12  ;;  %1949 = vmatprep.subr.bf16.mxu1 %v3706_v13 }
 0x38e   : > { %1909 = vmatpush1.bf16.msra.mxu0 %v3711_v14  ;;  %1950 = vmatpush1.bf16.msra.mxu1 %v3721_v15 }
 0x38f   : > { %1910 = vmatprep.subr.bf16.mxu0 %v3716_v16  ;;  %1951 = vmatprep.subr.bf16.mxu1 %v3726_v17 }
 0x392   : > { %1911 = vmatpush1.bf16.msra.mxu0 %v3731_v18  ;;  %1952 = vmatpush1.bf16.msra.mxu1 %v3741_v19 }
 0x393   : > { %1912 = vmatprep.subr.bf16.mxu0 %v3736_v20  ;;  %1953 = vmatprep.subr.bf16.mxu1 %v3746_v21 }
 0x396   : > { %1913 = vmatpush1.bf16.msra.mxu0 %v3751_v22  ;;  %1954 = vmatpush1.bf16.msra.mxu1 %v3761_v23 }
 0x397   : > { %1914 = vmatprep.subr.bf16.mxu0 %v3756_v24  ;;  %1955 = vmatprep.subr.bf16.mxu1 %v3766_v25 }
 0x39a   : > { %1915 = vmatpush1.bf16.msra.mxu0 %v3771_v26  ;;  %1956 = vmatpush1.bf16.msra.mxu1 %v3777_v27 }
 0x39b   : > { %2030 = vmatprep.subr.bf16.mxu0 %v3622_v51  ;;  %2071 = vmatprep.subr.bf16.mxu1 %v3635_v1 }
 0x450   : > { %v1804_v43 = vpop.f32.mrb[24].mxu0  ;;  %v1845_v44 = vpop.f32.mrb[24].mxu1 }
 0x451   : > { %v1852_v45 = vadd.f32 %v1804_v43, %v1764_v30  ;;  %v1806_v46 = vpop.f32.mrb[25].mxu0  ;;  %v1847_v47 = vpop.f32.mrb[25].mxu1  ;;  %v1854_v63 = vadd.f32 %v1845_v44, %v1766_v61 }
 0x452   : > { %v1853_v48 = vadd.f32 %v1806_v46, %v1765_v42  ;;  %v1808_v49 = vpop.f32.mrb[26].mxu0  ;;  %v1849_v54 = vpop.f32.mrb[26].mxu1  ;;  %v1855_v60 = vadd.f32 %v1847_v47, %v1767_v59  ;;  %v1895_v46 = vld [vmem:[%s1893_s15 + $0x8] sm:$0xff] }
 0x453   : > { %v2869_v55 = vmul.f32 -1.442695, %v1852_v45  ;;  %v1809_v56 = vpop.f32.mrb[27].mxu0  ;;  %v1850_v57 = vpop.f32.mrb[27].mxu1 }
 0x454   : > { %v2870_v58 = vmul.f32 -1.442695, %v1853_v48  ;;  %v2871_v62 = vmul.f32 -1.442695, %v1855_v60 }
 0x455   : > { %3131 = vpow2.f32 %v2869_v55 }
 0x456   : > { %3133 = vpow2.f32 %v2870_v58 }
 0x457   : > { %3135 = vpow2.f32 %v2871_v62 }
 0x458   : > { %3137 = vtanh.f32 %v1854_v63  ;;  %v1897_v63 = vld [vmem:[%s1893_s15 + $0x18] sm:$0xff] }
 0x45f   : > { %v3132_v50 = vpop.eup %3131 }
 0x460   : > { %v3134_v28 = vpop.eup %3133  ;;  %v1859_v29 = vadd.f32 1.0, %v3132_v50 }
 0x461   : > { %v1865_v31 = vadd.f32 1.0, %v3134_v28  ;;  %v3136_v32 = vpop.eup %3135  ;;  %v1896_v28 = vld [vmem:[%s1893_s15 + $0x10] sm:$0xff] }
 0x462   : > { %3139 = vrcp.f32 %v1859_v29  ;;  %v3138_v33 = vpop.eup %3137  ;;  %v1872_v40 = vadd.f32 1.0, %v3136_v32 }
 0x463   : > { %3141 = vrcp.f32 %v1865_v31 }
 0x464   : > { %3143 = vrcp.f32 %v1872_v40 }
 0x46c   : > { %v3140_v36 = vpop.eup %3139 }
 0x46d   : > { %v3142_v38 = vpop.eup %3141  ;;  %v1877_v39 = vmul.f32 %v3140_v36, %v3138_v33 }
 0x46e   : > { %v1876_v41 = vmul.f32 %v3142_v38, %v3869_v37  ;;  %v3144_v42 = vpop.eup %3143  ;;  %v1894_v37 = vld [vmem:[%s1893_s15] sm:$0xff]  ;;  %s2277_s15 = scalar_select %p1336_p8, 6, 1 }
 0x470   : > { %v3914_v30 = vadd.f32 %v1877_v39, %v1876_v41  ;;  %s2894_s16 = sshll.u32 %s2277_s15, 3 }
 0x472   : > { %3145 = vtanh.f32 %v3914_v30 }
 0x47c   : > { %v3146_v43 = vpop.eup %3145 }
 0x47d   : > { %v1880_v44 = vmul.f32 %v3146_v43, %v3144_v42 }
 0x47f   : > { %v1883_v45 = vpack.c.bf16 %v1880_v44, %v1880_v44 }
 0x481   : > { %1886 = vst [vmem:[%s1885_s8] sm:$0xf] %v1883_v45  ;;  %1933 = vmatmul.mubr.bf16.vlgmr.msra.gmra.mrb[28].mxu0 %v1883_v45  ;;  %1974 = vmatmul.mubr.bf16.vlgmr.msra.gmra.mrb[28].mxu1 %v1883_v45  ;;  %s4045_s8 = sshra.s32 %s2887_s29, 3 }
 0x482   : > { %2031 = vmatpush1.bf16.msra.mxu0 %v3626_v52  ;;  %2072 = vmatpush1.bf16.msra.mxu1 %v3641_v34  ;;  %s2918_s10 = sshll.u32 %s4045_s8, 5  ;;  %s2893_s13 = sshll.u32 %s4045_s8, 2 }
 0x483   : > { %2032 = vmatprep.subr.bf16.mxu0 %v3630_v53  ;;  %2073 = vmatprep.subr.bf16.mxu1 %v3645_v2  ;;  %s2153_s11 = scalar_lea.vmem [#allocation2], %s2918_s10  ;;  %s2275_s14 = scalar_lea.vmem %s3452_s30, %s2893_s13 }
 0x484   : > { %2062 = vmatprep.mubr.bf16.mxu0 %v3267_v0  ;;  %2103 = vmatprep.mubr.bf16.mxu1 %v3267_v0 }
 0x486   : > { %2033 = vmatpush1.bf16.msra.mxu0 %v3650_v4  ;;  %2074 = vmatpush1.bf16.msra.mxu1 %v3661_v3 }
 0x487   : > { %2034 = vmatprep.subr.bf16.mxu0 %v3656_v35  ;;  %2075 = vmatprep.subr.bf16.mxu1 %v3666_v5 }
 0x48a   : > { %2035 = vmatpush1.bf16.msra.mxu0 %v3671_v6  ;;  %2076 = vmatpush1.bf16.msra.mxu1 %v3681_v7 }
 0x48b   : > { %2036 = vmatprep.subr.bf16.mxu0 %v3676_v8  ;;  %2077 = vmatprep.subr.bf16.mxu1 %v3686_v9 }
 0x48e   : > { %2037 = vmatpush1.bf16.msra.mxu0 %v3691_v10  ;;  %2078 = vmatpush1.bf16.msra.mxu1 %v3701_v11 }
 0x48f   : > { %2038 = vmatprep.subr.bf16.mxu0 %v3696_v12  ;;  %2079 = vmatprep.subr.bf16.mxu1 %v3706_v13 }
 0x492   : > { %2039 = vmatpush1.bf16.msra.mxu0 %v3711_v14  ;;  %2080 = vmatpush1.bf16.msra.mxu1 %v3721_v15 }
 0x493   : > { %2040 = vmatprep.subr.bf16.mxu0 %v3716_v16  ;;  %2081 = vmatprep.subr.bf16.mxu1 %v3726_v17 }
 0x496   : > { %2041 = vmatpush1.bf16.msra.mxu0 %v3731_v18  ;;  %2082 = vmatpush1.bf16.msra.mxu1 %v3741_v19 }
 0x497   : > { %2042 = vmatprep.subr.bf16.mxu0 %v3736_v20  ;;  %2083 = vmatprep.subr.bf16.mxu1 %v3746_v21 }
 0x49a   : > { %2043 = vmatpush1.bf16.msra.mxu0 %v3751_v22  ;;  %2084 = vmatpush1.bf16.msra.mxu1 %v3761_v23 }
 0x49b   : > { %2044 = vmatprep.subr.bf16.mxu0 %v3756_v24  ;;  %2085 = vmatprep.subr.bf16.mxu1 %v3766_v25 }
 0x49e   : > { %2045 = vmatpush1.bf16.msra.mxu0 %v3771_v26  ;;  %2086 = vmatpush1.bf16.msra.mxu1 %v3777_v27 }
 0x49f   : > { %2160 = vmatprep.subr.bf16.mxu0 %v3622_v51  ;;  %2201 = vmatprep.subr.bf16.mxu1 %v3635_v1 }
 0x554   : > { %v1934_v47 = vpop.f32.mrb[28].mxu0  ;;  %v1975_v48 = vpop.f32.mrb[28].mxu1 }
 0x555   : > { %v1982_v49 = vadd.f32 %v1934_v47, %v1894_v37  ;;  %v1936_v54 = vpop.f32.mrb[29].mxu0  ;;  %v1977_v55 = vpop.f32.mrb[29].mxu1  ;;  %v1984_v31 = vadd.f32 %v1975_v48, %v1896_v28 }
 0x556   : > { %v1983_v56 = vadd.f32 %v1936_v54, %v1895_v46  ;;  %v1938_v57 = vpop.f32.mrb[30].mxu0  ;;  %v1979_v58 = vpop.f32.mrb[30].mxu1  ;;  %v1985_v50 = vadd.f32 %v1977_v55, %v1897_v63  ;;  %v2025_v54 = vld [vmem:[%s2023_s20 + $0x8] sm:$0xff] }
 0x557   : > { %v2876_v59 = vmul.f32 -1.442695, %v1982_v49  ;;  %v1939_v60 = vpop.f32.mrb[31].mxu0  ;;  %v1980_v61 = vpop.f32.mrb[31].mxu1 }
 0x558   : > { %v2877_v62 = vmul.f32 -1.442695, %v1983_v56  ;;  %v2878_v29 = vmul.f32 -1.442695, %v1985_v50 }
 0x559   : > { %3147 = vpow2.f32 %v2876_v59 }
 0x55a   : > { %3149 = vpow2.f32 %v2877_v62 }
 0x55b   : > { %3151 = vpow2.f32 %v2878_v29 }
 0x55c   : > { %3153 = vtanh.f32 %v1984_v31  ;;  %v2027_v31 = vld [vmem:[%s2023_s20 + $0x18] sm:$0xff] }
 0x563   : > { %v3148_v32 = vpop.eup %3147 }
 0x564   : > { %v3150_v33 = vpop.eup %3149  ;;  %v1989_v36 = vadd.f32 1.0, %v3148_v32 }
 0x565   : > { %v1995_v38 = vadd.f32 1.0, %v3150_v33  ;;  %v3152_v39 = vpop.eup %3151  ;;  %v2026_v33 = vld [vmem:[%s2023_s20 + $0x10] sm:$0xff] }
 0x566   : > { %3155 = vrcp.f32 %v1989_v36  ;;  %v3154_v40 = vpop.eup %3153  ;;  %v2002_v44 = vadd.f32 1.0, %v3152_v39 }
 0x567   : > { %3157 = vrcp.f32 %v1995_v38 }
 0x568   : > { %3159 = vrcp.f32 %v2002_v44 }
 0x570   : > { %v3156_v41 = vpop.eup %3155 }
 0x571   : > { %v3158_v42 = vpop.eup %3157  ;;  %v2007_v43 = vmul.f32 %v3156_v41, %v3154_v40 }
 0x572   : > { %v2006_v45 = vmul.f32 %v3158_v42, %v3914_v30  ;;  %v3160_v46 = vpop.eup %3159  ;;  %v2024_v30 = vld [vmem:[%s2023_s20] sm:$0xff]  ;;  %s2407_s20 = scalar_select %p1336_p8, 7, 0 }
 0x574   : > { %v3959_v37 = vadd.f32 %v2007_v43, %v2006_v45  ;;  %s2901_s28 = sshll.u32 %s2407_s20, 3 }
 0x576   : > { %3161 = vtanh.f32 %v3959_v37 }
 0x580   : > { %v3162_v47 = vpop.eup %3161 }
 0x581   : > { %v2010_v48 = vmul.f32 %v3162_v47, %v3160_v46 }
 0x583   : > { %v2013_v49 = vpack.c.bf16 %v2010_v48, %v2010_v48 }
 0x585   : > { %2016 = vst [vmem:[%s2015_s9] sm:$0xf] %v2013_v49  ;;  %2063 = vmatmul.mubr.bf16.vlgmr.msra.gmra.mrb[32].mxu0 %v2013_v49  ;;  %2104 = vmatmul.mubr.bf16.vlgmr.msra.gmra.mrb[32].mxu1 %v2013_v49  ;;  %s4088_s9 = sshra.s32 %s2894_s16, 3 }
 0x586   : > { %2161 = vmatpush1.bf16.msra.mxu0 %v3626_v52  ;;  %2202 = vmatpush1.bf16.msra.mxu1 %v3641_v34  ;;  %s2919_s12 = sshll.u32 %s4088_s9, 5  ;;  %s2900_s17 = sshll.u32 %s4088_s9, 2 }
 0x587   : > { %2162 = vmatprep.subr.bf16.mxu0 %v3630_v53  ;;  %2203 = vmatprep.subr.bf16.mxu1 %v3645_v2  ;;  %s2283_s18 = scalar_lea.vmem [#allocation2], %s2919_s12  ;;  %s2405_s19 = scalar_lea.vmem %s3452_s30, %s2900_s17 }
 0x588   : > { %2192 = vmatprep.mubr.bf16.mxu0 %v3267_v0  ;;  %2233 = vmatprep.mubr.bf16.mxu1 %v3267_v0 }
 0x58a   : > { %2163 = vmatpush1.bf16.msra.mxu0 %v3650_v4  ;;  %2204 = vmatpush1.bf16.msra.mxu1 %v3661_v3 }
 0x58b   : > { %2164 = vmatprep.subr.bf16.mxu0 %v3656_v35  ;;  %2205 = vmatprep.subr.bf16.mxu1 %v3666_v5 }
 0x58e   : > { %2165 = vmatpush1.bf16.msra.mxu0 %v3671_v6  ;;  %2206 = vmatpush1.bf16.msra.mxu1 %v3681_v7 }
 0x58f   : > { %2166 = vmatprep.subr.bf16.mxu0 %v3676_v8  ;;  %2207 = vmatprep.subr.bf16.mxu1 %v3686_v9 }
 0x592   : > { %2167 = vmatpush1.bf16.msra.mxu0 %v3691_v10  ;;  %2208 = vmatpush1.bf16.msra.mxu1 %v3701_v11 }
 0x593   : > { %2168 = vmatprep.subr.bf16.mxu0 %v3696_v12  ;;  %2209 = vmatprep.subr.bf16.mxu1 %v3706_v13 }
 0x596   : > { %2169 = vmatpush1.bf16.msra.mxu0 %v3711_v14  ;;  %2210 = vmatpush1.bf16.msra.mxu1 %v3721_v15 }
 0x597   : > { %2170 = vmatprep.subr.bf16.mxu0 %v3716_v16  ;;  %2211 = vmatprep.subr.bf16.mxu1 %v3726_v17 }
 0x59a   : > { %2171 = vmatpush1.bf16.msra.mxu0 %v3731_v18  ;;  %2212 = vmatpush1.bf16.msra.mxu1 %v3741_v19 }
 0x59b   : > { %2172 = vmatprep.subr.bf16.mxu0 %v3736_v20  ;;  %2213 = vmatprep.subr.bf16.mxu1 %v3746_v21 }
 0x59e   : > { %2173 = vmatpush1.bf16.msra.mxu0 %v3751_v22  ;;  %2214 = vmatpush1.bf16.msra.mxu1 %v3761_v23 }
 0x59f   : > { %2174 = vmatprep.subr.bf16.mxu0 %v3756_v24  ;;  %2215 = vmatprep.subr.bf16.mxu1 %v3766_v25 }
 0x5a2   : > { %2175 = vmatpush1.bf16.msra.mxu0 %v3771_v26  ;;  %2216 = vmatpush1.bf16.msra.mxu1 %v3777_v27 }
 0x5a3   : > { %2290 = vmatprep.subr.bf16.mxu0 %v3622_v51  ;;  %2331 = vmatprep.subr.bf16.mxu1 %v3635_v1 }
 0x658   : > { %v2064_v55 = vpop.f32.mrb[32].mxu0  ;;  %v2105_v56 = vpop.f32.mrb[32].mxu1 }
 0x659   : > { %v2112_v57 = vadd.f32 %v2064_v55, %v2024_v30  ;;  %v2066_v58 = vpop.f32.mrb[33].mxu0  ;;  %v2107_v59 = vpop.f32.mrb[33].mxu1  ;;  %v2114_v38 = vadd.f32 %v2105_v56, %v2026_v33  ;;  %v2157_v33 = vld [vmem:[%s2153_s11 + $0x18] sm:$0xff] }
 0x65a   : > { %v2113_v60 = vadd.f32 %v2066_v58, %v2025_v54  ;;  %v2068_v61 = vpop.f32.mrb[34].mxu0  ;;  %v2109_v62 = vpop.f32.mrb[34].mxu1  ;;  %v2115_v32 = vadd.f32 %v2107_v59, %v2027_v31  ;;  %v2155_v58 = vld [vmem:[%s2153_s11 + $0x8] sm:$0xff] }
 0x65b   : > { %v2883_v63 = vmul.f32 -1.442695, %v2112_v57  ;;  %v2069_v50 = vpop.f32.mrb[35].mxu0  ;;  %v2110_v28 = vpop.f32.mrb[35].mxu1 }
 0x65c   : > { %v2884_v29 = vmul.f32 -1.442695, %v2113_v60  ;;  %v2885_v36 = vmul.f32 -1.442695, %v2115_v32 }
 0x65d   : > { %3163 = vpow2.f32 %v2883_v63 }
 0x65e   : > { %3165 = vpow2.f32 %v2884_v29 }
 0x65f   : > { %3167 = vpow2.f32 %v2885_v36 }
 0x660   : > { %3169 = vtanh.f32 %v2114_v38  ;;  %v2156_v38 = vld [vmem:[%s2153_s11 + $0x10] sm:$0xff] }
 0x667   : > { %v3164_v39 = vpop.eup %3163 }
 0x668   : > { %v3166_v40 = vpop.eup %3165  ;;  %v2119_v41 = vadd.f32 1.0, %v3164_v39 }
 0x669   : > { %v2125_v42 = vadd.f32 1.0, %v3166_v40  ;;  %v3168_v43 = vpop.eup %3167 }
 0x66a   : > { %3171 = vrcp.f32 %v2119_v41  ;;  %v3170_v44 = vpop.eup %3169  ;;  %v2132_v48 = vadd.f32 1.0, %v3168_v43 }
 0x66b   : > { %3173 = vrcp.f32 %v2125_v42 }
 0x66c   : > { %3175 = vrcp.f32 %v2132_v48 }
 0x674   : > { %v3172_v45 = vpop.eup %3171 }
 0x675   : > { %v3174_v46 = vpop.eup %3173  ;;  %v2137_v47 = vmul.f32 %v3172_v45, %v3170_v44 }
 0x676   : > { %v2136_v49 = vmul.f32 %v3174_v46, %v3959_v37  ;;  %v3176_v54 = vpop.eup %3175  ;;  %v2154_v37 = vld [vmem:[%s2153_s11] sm:$0xff] }
 0x678   : > { %v4004_v30 = vadd.f32 %v2137_v47, %v2136_v49 }
 0x67a   : > { %3177 = vtanh.f32 %v4004_v30 }
 0x684   : > { %v3178_v55 = vpop.eup %3177 }
 0x685   : > { %v2140_v56 = vmul.f32 %v3178_v55, %v3176_v54 }
 0x687   : > { %v2143_v57 = vpack.c.bf16 %v2140_v56, %v2140_v56 }
 0x689   : > { %2146 = vst [vmem:[%s2145_s21] sm:$0xf] %v2143_v57  ;;  %2193 = vmatmul.mubr.bf16.vlgmr.msra.gmra.mrb[36].mxu0 %v2143_v57  ;;  %2234 = vmatmul.mubr.bf16.vlgmr.msra.gmra.mrb[36].mxu1 %v2143_v57  ;;  %s4096_s21 = sshra.s32 %s2901_s28, 3 }
 0x68a   : > { %2291 = vmatpush1.bf16.msra.mxu0 %v3626_v52  ;;  %2332 = vmatpush1.bf16.msra.mxu1 %v3641_v34  ;;  %s2920_s7 = sshll.u32 %s4096_s21, 5  ;;  %s2907_s22 = sshll.u32 %s4096_s21, 2 }
 0x68b   : > { %2292 = vmatprep.subr.bf16.mxu0 %v3630_v53  ;;  %2333 = vmatprep.subr.bf16.mxu1 %v3645_v2  ;;  %s2413_s29 = scalar_lea.vmem [#allocation2], %s2920_s7  ;;  %s2535_s8 = scalar_lea.vmem %s3452_s30, %s2907_s22 }
 0x68c   : > { %2322 = vmatprep.mubr.bf16.mxu0 %v3267_v0  ;;  %2363 = vmatprep.mubr.bf16.mxu1 %v3267_v0 }
 0x68e   : > { %2293 = vmatpush1.bf16.msra.mxu0 %v3650_v4  ;;  %2334 = vmatpush1.bf16.msra.mxu1 %v3661_v3 }
 0x68f   : > { %2294 = vmatprep.subr.bf16.mxu0 %v3656_v35  ;;  %2335 = vmatprep.subr.bf16.mxu1 %v3666_v5 }
 0x692   : > { %2295 = vmatpush1.bf16.msra.mxu0 %v3671_v6  ;;  %2336 = vmatpush1.bf16.msra.mxu1 %v3681_v7 }
 0x693   : > { %2296 = vmatprep.subr.bf16.mxu0 %v3676_v8  ;;  %2337 = vmatprep.subr.bf16.mxu1 %v3686_v9 }
 0x696   : > { %2297 = vmatpush1.bf16.msra.mxu0 %v3691_v10  ;;  %2338 = vmatpush1.bf16.msra.mxu1 %v3701_v11 }
 0x697   : > { %2298 = vmatprep.subr.bf16.mxu0 %v3696_v12  ;;  %2339 = vmatprep.subr.bf16.mxu1 %v3706_v13 }
 0x69a   : > { %2299 = vmatpush1.bf16.msra.mxu0 %v3711_v14  ;;  %2340 = vmatpush1.bf16.msra.mxu1 %v3721_v15 }
 0x69b   : > { %2300 = vmatprep.subr.bf16.mxu0 %v3716_v16  ;;  %2341 = vmatprep.subr.bf16.mxu1 %v3726_v17 }
 0x69e   : > { %2301 = vmatpush1.bf16.msra.mxu0 %v3731_v18  ;;  %2342 = vmatpush1.bf16.msra.mxu1 %v3741_v19 }
 0x69f   : > { %2302 = vmatprep.subr.bf16.mxu0 %v3736_v20  ;;  %2343 = vmatprep.subr.bf16.mxu1 %v3746_v21 }
 0x6a2   : > { %2303 = vmatpush1.bf16.msra.mxu0 %v3751_v22  ;;  %2344 = vmatpush1.bf16.msra.mxu1 %v3761_v23 }
 0x6a3   : > { %2304 = vmatprep.subr.bf16.mxu0 %v3756_v24  ;;  %2345 = vmatprep.subr.bf16.mxu1 %v3766_v25 }
 0x6a6   : > { %2305 = vmatpush1.bf16.msra.mxu0 %v3771_v26  ;;  %2346 = vmatpush1.bf16.msra.mxu1 %v3777_v27 }
 0x6a7   : > { %2420 = vmatprep.subr.bf16.mxu0 %v3622_v51  ;;  %2461 = vmatprep.subr.bf16.mxu1 %v3635_v1 }
 0x75c   : > { %v2194_v59 = vpop.f32.mrb[36].mxu0  ;;  %v2235_v60 = vpop.f32.mrb[36].mxu1 }
 0x75d   : > { %v2242_v61 = vadd.f32 %v2194_v59, %v2154_v37  ;;  %v2196_v62 = vpop.f32.mrb[37].mxu0  ;;  %v2237_v63 = vpop.f32.mrb[37].mxu1  ;;  %v2244_v40 = vadd.f32 %v2235_v60, %v2156_v38 }
 0x75e   : > { %v2243_v50 = vadd.f32 %v2196_v62, %v2155_v58  ;;  %v2198_v28 = vpop.f32.mrb[38].mxu0  ;;  %v2239_v51 = vpop.f32.mrb[38].mxu1  ;;  %v2245_v36 = vadd.f32 %v2237_v63, %v2157_v33  ;;  %v2414_v63 = vld [vmem:[%s2413_s29] sm:$0xff] }
 0x75f   : > { %v2890_v29 = vmul.f32 -1.442695, %v2242_v61  ;;  %v2199_v1 = vpop.f32.mrb[39].mxu0  ;;  %v2240_v31 = vpop.f32.mrb[39].mxu1 }
 0x760   : > { %v2891_v32 = vmul.f32 -1.442695, %v2243_v50  ;;  %v2892_v39 = vmul.f32 -1.442695, %v2245_v36  ;;  %v2415_v50 = vld [vmem:[%s2413_s29 + $0x8] sm:$0xff] }
 0x761   : > { %3179 = vpow2.f32 %v2890_v29 }
 0x762   : > { %3181 = vpow2.f32 %v2891_v32 }
 0x763   : > { %3183 = vpow2.f32 %v2892_v39 }
 0x764   : > { %3185 = vtanh.f32 %v2244_v40 }
 0x76b   : > { %v3180_v41 = vpop.eup %3179 }
 0x76c   : > { %v3182_v42 = vpop.eup %3181  ;;  %v2249_v43 = vadd.f32 1.0, %v3180_v41 }
 0x76d   : > { %v2255_v44 = vadd.f32 1.0, %v3182_v42  ;;  %v3184_v45 = vpop.eup %3183  ;;  %v2417_v42 = vld [vmem:[%s2413_s29 + $0x18] sm:$0xff] }
 0x76e   : > { %3187 = vrcp.f32 %v2249_v43  ;;  %v3186_v46 = vpop.eup %3185  ;;  %v2262_v54 = vadd.f32 1.0, %v3184_v45 }
 0x76f   : > { %3189 = vrcp.f32 %v2255_v44  ;;  %v2416_v44 = vld [vmem:[%s2413_s29 + $0x10] sm:$0xff] }
 0x770   : > { %3191 = vrcp.f32 %v2262_v54 }
 0x778   : > { %v3188_v47 = vpop.eup %3187 }
 0x779   : > { %v3190_v48 = vpop.eup %3189  ;;  %v2267_v49 = vmul.f32 %v3188_v47, %v3186_v46 }
 0x77a   : > { %v2266_v55 = vmul.f32 %v3190_v48, %v4004_v30  ;;  %v3192_v57 = vpop.eup %3191 }
 0x77c   : > { %v4049_v56 = vadd.f32 %v2267_v49, %v2266_v55 }
 0x77e   : > { %3193 = vtanh.f32 %v4049_v56 }
 0x788   : > { %v3194_v37 = vpop.eup %3193 }
 0x789   : > { %v2270_v58 = vmul.f32 %v3194_v37, %v3192_v57 }
 0x78b   : > { %v2273_v59 = vpack.c.bf16 %v2270_v58, %v2270_v58 }
 0x78d   : > { %2276 = vst [vmem:[%s2275_s14] sm:$0xf] %v2273_v59  ;;  %2323 = vmatmul.mubr.bf16.vlgmr.msra.gmra.mrb[40].mxu0 %v2273_v59  ;;  %2364 = vmatmul.mubr.bf16.vlgmr.msra.gmra.mrb[40].mxu1 %v2273_v59 }
 0x78e   : > { %2421 = vmatpush1.bf16.msra.mxu0 %v3626_v52  ;;  %2462 = vmatpush1.bf16.msra.mxu1 %v3641_v34  ;;  %v2285_v52 = vld [vmem:[%s2283_s18 + $0x8] sm:$0xff] }
 0x78f   : > { %2422 = vmatprep.subr.bf16.mxu0 %v3630_v53  ;;  %2463 = vmatprep.subr.bf16.mxu1 %v3645_v2 }
 0x790   : > { %2452 = vmatprep.mubr.bf16.mxu0 %v3267_v0  ;;  %2493 = vmatprep.mubr.bf16.mxu1 %v3267_v0  ;;  %v2284_v0 = vld [vmem:[%s2283_s18] sm:$0xff] }
 0x792   : > { %2423 = vmatpush1.bf16.msra.mxu0 %v3650_v4  ;;  %2464 = vmatpush1.bf16.msra.mxu1 %v3661_v3 }
 0x793   : > { %2424 = vmatprep.subr.bf16.mxu0 %v3656_v35  ;;  %2465 = vmatprep.subr.bf16.mxu1 %v3666_v5 }
 0x796   : > { %2425 = vmatpush1.bf16.msra.mxu0 %v3671_v6  ;;  %2466 = vmatpush1.bf16.msra.mxu1 %v3681_v7 }
 0x797   : > { %2426 = vmatprep.subr.bf16.mxu0 %v3676_v8  ;;  %2467 = vmatprep.subr.bf16.mxu1 %v3686_v9 }
 0x79a   : > { %2427 = vmatpush1.bf16.msra.mxu0 %v3691_v10  ;;  %2468 = vmatpush1.bf16.msra.mxu1 %v3701_v11 }
 0x79b   : > { %2428 = vmatprep.subr.bf16.mxu0 %v3696_v12  ;;  %2469 = vmatprep.subr.bf16.mxu1 %v3706_v13  ;;  %v2287_v12 = vld [vmem:[%s2283_s18 + $0x18] sm:$0xff]  ;;  %v2286_v13 = vld [vmem:[%s2283_s18 + $0x10] sm:$0xff] }
 0x79e   : > { %2429 = vmatpush1.bf16.msra.mxu0 %v3711_v14  ;;  %2470 = vmatpush1.bf16.msra.mxu1 %v3721_v15 }
 0x79f   : > { %2430 = vmatprep.subr.bf16.mxu0 %v3716_v16  ;;  %2471 = vmatprep.subr.bf16.mxu1 %v3726_v17 }
 0x7a2   : > { %2431 = vmatpush1.bf16.msra.mxu0 %v3731_v18  ;;  %2472 = vmatpush1.bf16.msra.mxu1 %v3741_v19 }
 0x7a3   : > { %2432 = vmatprep.subr.bf16.mxu0 %v3736_v20  ;;  %2473 = vmatprep.subr.bf16.mxu1 %v3746_v21 }
 0x7a6   : > { %2433 = vmatpush1.bf16.msra.mxu0 %v3751_v22  ;;  %2474 = vmatpush1.bf16.msra.mxu1 %v3761_v23 }
 0x7a7   : > { %2434 = vmatprep.subr.bf16.mxu0 %v3756_v24  ;;  %2475 = vmatprep.subr.bf16.mxu1 %v3766_v25 }
 0x7aa   : > { %2435 = vmatpush1.bf16.msra.mxu0 %v3771_v26  ;;  %2476 = vmatpush1.bf16.msra.mxu1 %v3777_v27 }
 0x860   : > { %v2324_v53 = vpop.f32.mrb[40].mxu0  ;;  %v2365_v34 = vpop.f32.mrb[40].mxu1 }
 0x861   : > { %v2372_v2 = vadd.f32 %v2324_v53, %v2284_v0  ;;  %v2326_v4 = vpop.f32.mrb[41].mxu0  ;;  %v2367_v35 = vpop.f32.mrb[41].mxu1  ;;  %v2374_v16 = vadd.f32 %v2365_v34, %v2286_v13 }
 0x862   : > { %v2373_v3 = vadd.f32 %v2326_v4, %v2285_v52  ;;  %v2328_v5 = vpop.f32.mrb[42].mxu0  ;;  %v2369_v6 = vpop.f32.mrb[42].mxu1  ;;  %v2375_v11 = vadd.f32 %v2367_v35, %v2287_v12 }
 0x863   : > { %v2897_v8 = vmul.f32 -1.442695, %v2372_v2  ;;  %v2329_v7 = vpop.f32.mrb[43].mxu0  ;;  %v2370_v9 = vpop.f32.mrb[43].mxu1 }
 0x864   : > { %v2898_v10 = vmul.f32 -1.442695, %v2373_v3  ;;  %v2899_v14 = vmul.f32 -1.442695, %v2375_v11 }
 0x865   : > { %3195 = vpow2.f32 %v2897_v8 }
 0x866   : > { %3197 = vpow2.f32 %v2898_v10 }
 0x867   : > { %3199 = vpow2.f32 %v2899_v14 }
 0x868   : > { %3201 = vtanh.f32 %v2374_v16 }
 0x86f   : > { %v3196_v15 = vpop.eup %3195 }
 0x870   : > { %v3198_v17 = vpop.eup %3197  ;;  %v2379_v18 = vadd.f32 1.0, %v3196_v15 }
 0x871   : > { %v2385_v20 = vadd.f32 1.0, %v3198_v17  ;;  %v3200_v19 = vpop.eup %3199 }
 0x872   : > { %3203 = vrcp.f32 %v2379_v18  ;;  %v3202_v21 = vpop.eup %3201  ;;  %v2392_v25 = vadd.f32 1.0, %v3200_v19 }
 0x873   : > { %3205 = vrcp.f32 %v2385_v20 }
 0x874   : > { %3207 = vrcp.f32 %v2392_v25 }
 0x87c   : > { %v3204_v22 = vpop.eup %3203 }
 0x87d   : > { %v3206_v24 = vpop.eup %3205  ;;  %v2397_v23 = vmul.f32 %v3204_v22, %v3202_v21 }
 0x87e   : > { %v2396_v26 = vmul.f32 %v3206_v24, %v4049_v56  ;;  %v3208_v30 = vpop.eup %3207 }
 0x880   : > { %v2398_v27 = vadd.f32 %v2397_v23, %v2396_v26 }
 0x882   : > { %3209 = vtanh.f32 %v2398_v27 }
 0x88c   : > { %v3210_v60 = vpop.eup %3209 }
 0x88d   : > { %v2400_v61 = vmul.f32 %v3210_v60, %v3208_v30 }
 0x88f   : > { %v2403_v62 = vpack.c.bf16 %v2400_v61, %v2400_v61 }
 0x891   : > { %2406 = vst [vmem:[%s2405_s19] sm:$0xf] %v2403_v62  ;;  %2453 = vmatmul.mubr.bf16.vlgmr.msra.gmra.mrb[44].mxu0 %v2403_v62  ;;  %2494 = vmatmul.mubr.bf16.vlgmr.msra.gmra.mrb[44].mxu1 %v2403_v62 }
 0x964   : > { %v2454_v28 = vpop.f32.mrb[44].mxu0  ;;  %v2495_v51 = vpop.f32.mrb[44].mxu1 }
 0x965   : > { %v2502_v29 = vadd.f32 %v2454_v28, %v2414_v63  ;;  %v2456_v1 = vpop.f32.mrb[45].mxu0  ;;  %v2497_v31 = vpop.f32.mrb[45].mxu1  ;;  %v2504_v46 = vadd.f32 %v2495_v51, %v2416_v44 }
 0x966   : > { %v2503_v32 = vadd.f32 %v2456_v1, %v2415_v50  ;;  %v2458_v33 = vpop.f32.mrb[46].mxu0  ;;  %v2499_v36 = vpop.f32.mrb[46].mxu1  ;;  %v2505_v43 = vadd.f32 %v2497_v31, %v2417_v42 }
 0x967   : > { %v2904_v38 = vmul.f32 -1.442695, %v2502_v29  ;;  %v2459_v39 = vpop.f32.mrb[47].mxu0  ;;  %v2500_v40 = vpop.f32.mrb[47].mxu1 }
 0x968   : > { %v2905_v41 = vmul.f32 -1.442695, %v2503_v32  ;;  %v2906_v45 = vmul.f32 -1.442695, %v2505_v43 }
 0x969   : > { %3211 = vpow2.f32 %v2904_v38 }
 0x96a   : > { %3213 = vpow2.f32 %v2905_v41 }
 0x96b   : > { %3215 = vpow2.f32 %v2906_v45 }
 0x96c   : > { %3217 = vtanh.f32 %v2504_v46 }
 0x973   : > { %v3212_v47 = vpop.eup %3211 }
 0x974   : > { %v3214_v48 = vpop.eup %3213  ;;  %v2509_v49 = vadd.f32 1.0, %v3212_v47 }
 0x975   : > { %v2515_v54 = vadd.f32 1.0, %v3214_v48  ;;  %v3216_v55 = vpop.eup %3215 }
 0x976   : > { %3219 = vrcp.f32 %v2509_v49  ;;  %v3218_v56 = vpop.eup %3217  ;;  %v2522_v59 = vadd.f32 1.0, %v3216_v55 }
 0x977   : > { %3221 = vrcp.f32 %v2515_v54 }
 0x978   : > { %3223 = vrcp.f32 %v2522_v59 }
 0x980   : > { %v3220_v57 = vpop.eup %3219 }
 0x981   : > { %v3222_v37 = vpop.eup %3221  ;;  %v2527_v58 = vmul.f32 %v3220_v57, %v3218_v56 }
 0x982   : > { %v2526_v0 = vmul.f32 %v3222_v37, %v2398_v27  ;;  %v3224_v53 = vpop.eup %3223 }
 0x984   : > { %v2528_v52 = vadd.f32 %v2527_v58, %v2526_v0 }
 0x986   : > { %3225 = vtanh.f32 %v2528_v52  ;;  %2531 = vst [vmem:[#allocation4] sm:$0xff] %v2528_v52 }
 0x990   : > { %v3226_v34 = vpop.eup %3225 }
 0x991   : > { %v2530_v2 = vmul.f32 %v3226_v34, %v3224_v53 }
 0x993   : > { %2532 = vst [vmem:[#allocation3] sm:$0xff] %v2530_v2  ;;  %v2533_v4 = vpack.c.bf16 %v2530_v2, %v2530_v2 }
 0x995   : > { %2536 = vst [vmem:[%s2535_s8] sm:$0xf] %v2533_v4 }
 0x996 PF: > { %s16_s25 = sadd.s32 1, %s3265_s25   ;;  %s4123_s21 = smov %s3257_s23 }
 0x997   : > { %p13_p9 = scmp.ge.s32.totalorder %s16_s25, 6   ;;  %s4124_s22 = smov %s3261_s24 }
 0x998   : > { %s4125_s23 = smov %s4128_s26  ;;  %s4126_s24 = smov %s4132_s27 }
 0x999   :  { %15 = sbr.rel (!%p13_p9) target bundleno = 3 (0x3), region = 109 }

</bundles_post_ra>
